<compile_context>
chip_gen: v7x
topology: tpu7x:2x2x1
jax: 0.10.0
libtpu: 0.0.40
codegen_flags: <defaults>
</compile_context>

<pallas_src>
import jax
import jax.numpy as jnp
from jax.experimental import pallas as pl
from jax.experimental.pallas import tpu as pltpu

# ----------------------- scaled-down model dimensions -----------------------
B          = 2      # number of graphs (batch)              (orig: batch)
P          = 64     # pixel nodes per graph                 (orig: 4096)
FDIM       = 16     # feature-node raw dim                  (orig: 64)
MF         = 2      # raw rows of x_f                       -> NF = MF * FDIM feature nodes
NP_NODES   = B * P
NF_NODES   = MF * FDIM
GCN_DIM    = 32     # (orig: 128)
CNN_DIM    = 16     # (orig: 64)
KSIZE      = 4      # conv1d kernel size                    (orig: 8)
FC_DIM     = 32     # (orig: 100)
NUM_LAYERS = 3
NUM_EDGES  = 256
LN_EPS     = 1e-5
L3_OUT     = P - 3 * (KSIZE - 1)          # length after the 3 valid convs

# streaming-matmul tile sizes for the pnode input linear (one tile at this scale;
# at original scale: tk ~ 2048, tn ~ 512 so the 12288x12288 bf16 weight streams through VMEM)
TK_IN = min(P * 3, 2048)
TN_IN = min(P * 3, 512)

_VMEM = pl.BlockSpec(memory_space=pltpu.MemorySpace.VMEM)
_BF16 = jnp.bfloat16
_VMEM_LIMIT = 32 * 1024 * 1024            # explicit scoped-VMEM budget (safe on v5e/v6e/v7x)


def _vmem_specs(n):
    return [pl.BlockSpec(memory_space=pltpu.MemorySpace.VMEM)] * n


# ============================ Pallas kernels ============================
def _input_linears_kernel(xp_ref, pw_ref, pb_ref, xf_ref, fw_ref, fb_ref,
                          op_ref, of_ref, acc_ref):
    """pnode_d as an (N, K)-tiled streaming matmul (f32 VMEM accumulator, reduction axis last);
    the tiny fnode_d linear is fused into the same launch at grid step (0, 0)."""
    n = pl.program_id(0)
    k = pl.program_id(1)

    @pl.when(k == 0)
    def _():
        acc_ref[...] = jnp.zeros_like(acc_ref)

    acc_ref[...] += jnp.dot(xp_ref[...].astype(_BF16), pw_ref[...],
                            preferred_element_type=jnp.float32)

    @pl.when(k == pl.num_programs(1) - 1)
    def _():
        op_ref[...] = (acc_ref[...] + pb_ref[...]).astype(op_ref.dtype)

    @pl.when(jnp.logical_and(n == 0, k == 0))
    def _():
        of_ref[...] = (jnp.dot(xf_ref[...].astype(_BF16), fw_ref[...],
                               preferred_element_type=jnp.float32)
                       + fb_ref[...]).astype(of_ref.dtype)


def _vpu_small_k_matmul(x, w):
    """(M, K) @ (K, N) with tiny K (=3) as VPU broadcast-FMAs instead of a <3%-utilized
    MXU push; f32 accumulation."""
    acc = x[:, 0:1].astype(jnp.float32) * w[0:1, :].astype(jnp.float32)
    for j in range(1, x.shape[1]):
        acc = acc + x[:, j:j + 1].astype(jnp.float32) * w[j:j + 1, :].astype(jnp.float32)
    return acc


def _layernorm_f32(x, g, b):
    x = x.astype(jnp.float32)
    mu = jnp.mean(x, axis=-1, keepdims=True)
    d = x - mu
    var = jnp.mean(d * d, axis=-1, keepdims=True)
    return d * jax.lax.rsqrt(var + LN_EPS) * g + b


def _gnn_stack_kernel(xp_ref, xf_ref, adjf_ref, adjb_ref, *refs):
    """All NUM_LAYERS SAGE layers (both directions) + LayerNorms in a single kernel.

    refs layout: per layer i: (wl1, bl1, wr1, wl2, bl2, wr2)   [6 * NUM_LAYERS refs]
                 then LN params (g0, b0, g1, b1)               [2 * (NUM_LAYERS-1) refs]
                 then the output ref (x_p, bf16).
    SAGEConv semantics (PyG): out = lin_l(mean_agg(x_src)) + lin_r(x_dst), relu fused,
    dropout = identity (eval mode).  xp / xf are carried in bf16 between layers; the
    SAGE accumulators and LayerNorm math stay f32.
    """
    o_ref = refs[-1]
    n_sage = 6 * NUM_LAYERS
    sage_refs = refs[:n_sage]
    ln_refs = refs[n_sage:n_sage + 2 * (NUM_LAYERS - 1)]

    xp = xp_ref[...]            # (NP, 3)  bf16
    xf = xf_ref[...]            # (NF, 3)  bf16
    a_f = adjf_ref[...]         # (NP, NF) bf16  row-normalized adjacency (mean agg)
    a_b = adjb_ref[...]         # (NF, NP) bf16

    for i in range(NUM_LAYERS):
        wl1, bl1, wr1, wl2, bl2, wr2 = (r[...] for r in sage_refs[6 * i:6 * i + 6])
        last = (i == NUM_LAYERS - 1)

        # ---- convs_1: dst = x_p, src = x_f.  Project-first: A @ (x W) == (A x) W,
        #      so the big adjacency matmul is lane-dense in GCN_DIM (never N=3).
        if i == 0:      # K=3 projections -> VPU FMAs (MXU slot stays free for the adjacency dot)
            src1 = _vpu_small_k_matmul(xf, wl1)                                         # (NF, G)
            dst1 = _vpu_small_k_matmul(xp, wr1)                                         # (NP, G)
        else:
            src1 = jnp.dot(xf, wl1, preferred_element_type=jnp.float32)
            dst1 = jnp.dot(xp, wr1, preferred_element_type=jnp.float32)
        agg1 = jnp.dot(a_f, src1.astype(_BF16), preferred_element_type=jnp.float32)     # (NP, G)
        xp_new = jnp.maximum(agg1 + bl1 + dst1, 0.0)                                    # relu, f32
        xp_b = xp_new.astype(_BF16)

        if last:
            xp = xp_b           # reference's last-layer x_f update is dead -> skipped
            break

        # ---- convs_2: dst = x_f, src = x_p (updated, pre-LN).  Aggregate-first (NF << NP).
        agg2 = jnp.dot(a_b, xp_b, preferred_element_type=jnp.float32)                   # (NF, G)
        agg2 = jnp.dot(agg2.astype(_BF16), wl2, preferred_element_type=jnp.float32)     # (NF, G)
        if i == 0:
            dst2 = _vpu_small_k_matmul(xf, wr2)
        else:
            dst2 = jnp.dot(xf, wr2, preferred_element_type=jnp.float32)
        xf_new = jnp.maximum(agg2 + bl2 + dst2, 0.0)                                    # relu, f32

        # Same LayerNorm parameters for both streams — matches the reference,
        # which applies self.lns[i] to x_p and x_f.
        g = ln_refs[2 * i][...]
        bt = ln_refs[2 * i + 1][...]
        xp = _layernorm_f32(xp_new, g, bt).astype(_BF16)
        xf = _layernorm_f32(xf_new, g, bt).astype(_BF16)

    o_ref[...] = xp


def _conv_head_kernel(x_ref, w1_ref, b1_ref, w2_ref, b2_ref, w3_ref, b3_ref,
                      d1w_ref, d1b_ref, d2w_ref, d2b_ref, o_ref):
    """Three chained valid Conv1d(+relu) layers + d1+relu+d2+softmax head, fully fused.

    Conv weights are pre-packed as (Cout, K*Cin); each layer builds one (K*Cin, Lout) staging
    slab (sublane concat of the K shifted lane-slices) and does a SINGLE deep-K matmul.
    d1 weights are pre-packed as (CNN_DIM, L3_OUT, FC_DIM) so the head is a per-channel
    accumulation — no (C, L) -> (1, C*L) reshape inside Mosaic.
    The B=2 batch is a short unrolled loop (no grid: avoids serial grid overhead on 1-TC
    v5e/v6e; on v7x a "parallel" B grid axis could be re-introduced to shard across its 2 TCs).
    """
    h_rows = []
    for b in range(B):
        y = x_ref[b]                                            # (GCN_DIM, P) bf16
        for w_ref, b_ref in ((w1_ref, b1_ref), (w2_ref, b2_ref), (w3_ref, b3_ref)):
            lout = y.shape[1] - KSIZE + 1
            y_stack = jnp.concatenate([y[:, k:k + lout] for k in range(KSIZE)], axis=0)
            acc = jnp.dot(w_ref[...], y_stack, preferred_element_type=jnp.float32)
            y = jnp.maximum(acc + b_ref[...], 0.0).astype(_BF16)   # bias + relu; dropout = id
        # fused d1: h = sum_c y[c, :] @ d1_w[c]   (flatten order is channel-major, as in torch)
        h = jnp.dot(y[0:1, :], d1w_ref[0], preferred_element_type=jnp.float32)
        for c in range(1, CNN_DIM):
            h = h + jnp.dot(y[c:c + 1, :], d1w_ref[c], preferred_element_type=jnp.float32)
        h_rows.append(jnp.maximum(h + d1b_ref[...], 0.0))       # (1, FC_DIM)

    hmat = jnp.concatenate(h_rows, axis=0).astype(_BF16)        # (B, FC_DIM)
    logits = jnp.dot(hmat, d2w_ref[...], preferred_element_type=jnp.float32) + d2b_ref[...]
    m = jnp.max(logits, axis=-1, keepdims=True)
    e = jnp.exp(logits - m)
    o_ref[...] = e / jnp.sum(e, axis=-1, keepdims=True)         # exact f32 softmax


# ============================ kernel wrappers ============================
def fused_input_linears(xp_flat, pw, pb, xf_flat, fw, fb):
    k_in, n_out = pw.shape
    grid = (pl.cdiv(n_out, TN_IN), pl.cdiv(k_in, TK_IN))        # (1, 1) at this scale
    return pl.pallas_call(
        _input_linears_kernel,
        out_shape=(jax.ShapeDtypeStruct((xp_flat.shape[0], n_out), _BF16),
                   jax.ShapeDtypeStruct((xf_flat.shape[0], fw.shape[1]), _BF16)),
        grid_spec=pltpu.PrefetchScalarGridSpec(
            num_scalar_prefetch=0,
            grid=grid,
            in_specs=[
                pl.BlockSpec((xp_flat.shape[0], TK_IN), lambda n, k: (0, k)),
                pl.BlockSpec((TK_IN, TN_IN), lambda n, k: (k, n)),
                pl.BlockSpec((1, TN_IN), lambda n, k: (0, n)),
                pl.BlockSpec(xf_flat.shape, lambda n, k: (0, 0)),
                pl.BlockSpec(fw.shape, lambda n, k: (0, 0)),
                pl.BlockSpec(fb.shape, lambda n, k: (0, 0)),
            ],
            out_specs=(pl.BlockSpec((xp_flat.shape[0], TN_IN), lambda n, k: (0, n)),
                       pl.BlockSpec((xf_flat.shape[0], fw.shape[1]), lambda n, k: (0, 0))),
            scratch_shapes=[pltpu.VMEM((xp_flat.shape[0], TN_IN), jnp.float32)],
        ),
        # reduction axis (k) last & "arbitrary"; at original scale mark n "parallel"
        compiler_params=pltpu.CompilerParams(
            dimension_semantics=("arbitrary", "arbitrary"),
            vmem_limit_bytes=_VMEM_LIMIT),
    )(xp_flat, pw, pb, xf_flat, fw, fb)


def fused_gnn_stack(x_p, x_f, adj_fwd, adj_bwd, sage_flat, ln_flat):
    args = [x_p, x_f, adj_fwd, adj_bwd] + list(sage_flat) + list(ln_flat)
    flops = NUM_LAYERS * 2 * GCN_DIM * (2 * NP_NODES * NF_NODES
                                        + NP_NODES * GCN_DIM
                                        + 2 * NF_NODES * GCN_DIM)
    bytes_accessed = sum(int(a.size) * jnp.dtype(a.dtype).itemsize for a in args) \
        + NP_NODES * GCN_DIM * 2
    return pl.pallas_call(
        _gnn_stack_kernel,
        out_shape=jax.ShapeDtypeStruct((NP_NODES, GCN_DIM), _BF16),
        in_specs=_vmem_specs(len(args)),
        out_specs=_VMEM,
        compiler_params=pltpu.CompilerParams(vmem_limit_bytes=_VMEM_LIMIT),
        cost_estimate=pl.CostEstimate(
            flops=int(flops),
            transcendentals=int((NUM_LAYERS - 1) * (NP_NODES + NF_NODES)),
            bytes_accessed=int(bytes_accessed)),
    )(*args)


def fused_conv_head(x_ncl, w1, b1, w2, b2, w3, b3, d1w, d1b, d2w, d2b):
    return pl.pallas_call(
        _conv_head_kernel,
        out_shape=jax.ShapeDtypeStruct((B, 2), jnp.float32),
        in_specs=_vmem_specs(11),
        out_specs=_VMEM,
        compiler_params=pltpu.CompilerParams(vmem_limit_bytes=_VMEM_LIMIT),
    )(x_ncl, w1, b1, w2, b2, w3, b3, d1w, d1b, d2w, d2b)


# ============================ glue (plain JAX) ============================
def build_mean_adj(dst_idx, src_idx, n_dst, n_src):
    """Row-normalized adjacency so that A @ x_src == scatter-mean of neighbor features
    (zero rows for isolated destination nodes, matching PyG mean aggregation)."""
    adj = jnp.zeros((n_dst, n_src), jnp.float32).at[dst_idx, src_idx].add(1.0)
    deg = jnp.sum(adj, axis=-1, keepdims=True)
    return adj / jnp.where(deg > 0, deg, 1.0)


def build_adjacency(edge_index):
    """Edge splits exactly as in the reference forward.  Built ONCE per graph, outside the
    jitted hot path (edge_index is static across calls), so the dense scatter is not re-run."""
    ei_fwd = edge_index[:, ::2]                    # src = feature idx, dst = pixel idx
    ei_bwd = edge_index[::-1, :][:, 1::2]          # src = pixel idx,   dst = feature idx
    adj_fwd = build_mean_adj(ei_fwd[1], ei_fwd[0], NP_NODES, NF_NODES).astype(_BF16)   # (NP, NF)
    adj_bwd = build_mean_adj(ei_bwd[1], ei_bwd[0], NF_NODES, NP_NODES).astype(_BF16)   # (NF, NP)
    return adj_fwd, adj_bwd


# ============================ parameters ============================
def init_params(key):
    keys = iter(jax.random.split(key, 64))

    def rnd(shape, scale=0.05):
        return scale * jax.random.normal(next(keys), shape, dtype=jnp.float32)

    p = {}
    p["pnode_w"] = rnd((P * 3, P * 3))
    p["pnode_b"] = rnd((P * 3,))
    p["fnode_w"] = rnd((FDIM, 3 * FDIM))
    p["fnode_b"] = rnd((3 * FDIM,))

    # SAGEConv: out = lin_l(mean_agg(x_src)) + lin_r(x_dst); lin_r has no bias (PyG default)
    p["sage1"], p["sage2"] = [], []
    for l in range(NUM_LAYERS):
        src1, dst1 = (3, 3) if l == 0 else (GCN_DIM, GCN_DIM)          # convs_1: (x_f, x_p)
        src2, dst2 = (GCN_DIM, 3) if l == 0 else (GCN_DIM, GCN_DIM)    # convs_2: (x_p, x_f)
        p["sage1"].append((rnd((src1, GCN_DIM)), rnd((GCN_DIM,)), rnd((dst1, GCN_DIM))))
        p["sage2"].append((rnd((src2, GCN_DIM)), rnd((GCN_DIM,)), rnd((dst2, GCN_DIM))))

    p["ln"] = [(jnp.ones((GCN_DIM,), jnp.float32), jnp.zeros((GCN_DIM,), jnp.float32))
               for _ in range(NUM_LAYERS - 1)]

    p["conv1_w"] = rnd((CNN_DIM, GCN_DIM, KSIZE)); p["conv1_b"] = rnd((CNN_DIM,))
    p["conv2_w"] = rnd((CNN_DIM, CNN_DIM, KSIZE)); p["conv2_b"] = rnd((CNN_DIM,))
    p["conv3_w"] = rnd((CNN_DIM, CNN_DIM, KSIZE)); p["conv3_b"] = rnd((CNN_DIM,))

    p["d1_w"] = rnd((L3_OUT * CNN_DIM, FC_DIM)); p["d1_b"] = rnd((FC_DIM,))
    p["d2_w"] = rnd((FC_DIM, 2));                p["d2_b"] = rnd((2,))
    return p


def pack_params(p):
    """One-time conversion to kernel layout:
       * bf16 matmul weights, (1,N)/(N,1) biases
       * conv weights (Cout, Cin, K) -> (Cout, K*Cin) matching the k-major staging slab
       * d1 weight (CNN_DIM*L3, FC) -> (CNN_DIM, L3, FC) for the per-channel head accumulation
    TODO(synk): at original scale quantize pnode_w / d1_w for streaming (int8 on v5e/v6e,
                fp8 on v7x) with per-tile scales in SMEM."""
    packed = {
        "pnode_w": p["pnode_w"].astype(_BF16), "pnode_b": p["pnode_b"].reshape(1, -1),
        "fnode_w": p["fnode_w"].astype(_BF16), "fnode_b": p["fnode_b"].reshape(1, -1),
        "d1_w": p["d1_w"].reshape(CNN_DIM, L3_OUT, FC_DIM).astype(_BF16),
        "d1_b": p["d1_b"].reshape(1, -1),
        "d2_w": p["d2_w"].astype(_BF16), "d2_b": p["d2_b"].reshape(1, -1),
    }
    sage_flat = []
    for i in range(NUM_LAYERS):
        for (wl, bl, wr) in (p["sage1"][i], p["sage2"][i]):
            sage_flat += [wl.astype(_BF16), bl.reshape(1, -1), wr.astype(_BF16)]
    packed["sage_flat"] = sage_flat

    ln_flat = []
    for (g, b) in p["ln"]:
        ln_flat += [g.reshape(1, -1), b.reshape(1, -1)]
    packed["ln_flat"] = ln_flat

    for name in ("conv1", "conv2", "conv3"):
        w = p[name + "_w"]                                        # (Cout, Cin, K)
        packed[name + "_w"] = jnp.transpose(w, (0, 2, 1)).reshape(CNN_DIM, -1).astype(_BF16)
        packed[name + "_b"] = p[name + "_b"].reshape(-1, 1)
    return packed


# ============================ forward ============================
def gnn_forward(packed, x_f_raw, x_p_raw, adj_fwd, adj_bwd):
    # input linears (one fused, K-streamable launch) + raw-memory reshapes (JAX glue)
    xp_flat = x_p_raw.reshape(-1, P * 3)
    xf_flat = x_f_raw.reshape(-1, FDIM)
    xp_lin, xf_lin = fused_input_linears(xp_flat, packed["pnode_w"], packed["pnode_b"],
                                         xf_flat, packed["fnode_w"], packed["fnode_b"])
    x_p = xp_lin.reshape(-1, 3)                    # (NP, 3) bf16
    x_f = xf_lin.reshape(-1, 3)                    # (NF, 3) bf16

    # the whole SAGE / LayerNorm stack in a single pallas_call (state stays in VMEM)
    xp_out = fused_gnn_stack(x_p, x_f, adj_fwd, adj_bwd,
                             packed["sage_flat"], packed["ln_flat"])

    # torch.reshape raw-memory semantics: (B*P, GCN_DIM) -> (B, GCN_DIM, P) NCL
    # (this interleaves node/channel data exactly like the PyTorch reference)
    x = xp_out.reshape(-1, GCN_DIM, P)

    # conv1..conv3 (+relu) + flatten + d1 + relu + d2 + softmax — ONE fused pallas_call
    return fused_conv_head(x,
                           packed["conv1_w"], packed["conv1_b"],
                           packed["conv2_w"], packed["conv2_b"],
                           packed["conv3_w"], packed["conv3_b"],
                           packed["d1_w"], packed["d1_b"],
                           packed["d2_w"], packed["d2_b"])        # (B, 2)


# ============================ main ============================
if __name__ == "__main__":
    key = jax.random.PRNGKey(0)
    k_par, k_xf, k_xp, k_es, k_ed = jax.random.split(key, 5)

    params = init_params(k_par)
    packed = pack_params(params)

    x_f = jax.random.normal(k_xf, (MF, FDIM), dtype=jnp.float32)         # data.x_src
    x_p = jax.random.normal(k_xp, (NP_NODES, 3), dtype=jnp.float32)      # data.x_dst
    edge_src = jax.random.randint(k_es, (NUM_EDGES,), 0, NF_NODES, dtype=jnp.int32)
    edge_dst = jax.random.randint(k_ed, (NUM_EDGES,), 0, NP_NODES, dtype=jnp.int32)
    edge_index = jnp.stack([edge_src, edge_dst], axis=0)                 # data.edge_index (2, E)

    # adjacency is static per graph -> built once, outside the jitted hot path
    adj_fwd, adj_bwd = build_adjacency(edge_index)

    fwd = jax.jit(gnn_forward)
    out = fwd(packed, x_f, x_p, adj_fwd, adj_bwd)
    out = jax.block_until_ready(out)

    assert out.shape == (B, 2)
    assert bool(jnp.all(jnp.isfinite(out)))
    assert bool(jnp.allclose(jnp.sum(out, axis=1), 1.0, atol=1e-5))
    print("KERNEL_OK")
</pallas_src>

<mosaic_0001>
module attributes {stable_mosaic.version = 11 : i64} {
  func.func @_input_linears_kernel(%arg0: i32, %arg1: i32, %arg2: memref<2x192xf32, #tpu.memory_space<vmem>>, %arg3: memref<192x192xbf16, #tpu.memory_space<vmem>>, %arg4: memref<1x192xf32, #tpu.memory_space<vmem>>, %arg5: memref<2x16xf32, #tpu.memory_space<vmem>>, %arg6: memref<16x48xbf16, #tpu.memory_space<vmem>>, %arg7: memref<1x48xf32, #tpu.memory_space<vmem>>, %arg8: memref<2x192xbf16, #tpu.memory_space<vmem>>, %arg9: memref<2x48xbf16, #tpu.memory_space<vmem>>, %arg10: memref<2x192xf32, #tpu.memory_space<vmem>>) attributes {dimension_semantics = [#tpu.dimension_semantics<arbitrary>, #tpu.dimension_semantics<arbitrary>], iteration_bounds = array<i64: 1, 1>, scalar_prefetch = 0 : i64, scratch_operands = 1 : i64, tpu.core_type = #tpu.core_type<tc>, window_params = [{transform_indices = @transform_0, window_bounds = array<i64: 2, 192>}, {transform_indices = @transform_1, window_bounds = array<i64: 192, 192>}, {transform_indices = @transform_2, window_bounds = array<i64: 1, 192>}, {pipeline_mode = #tpu.pipeline_mode<synchronous>, transform_indices = @transform_3, window_bounds = array<i64: 2, 16>}, {pipeline_mode = #tpu.pipeline_mode<synchronous>, transform_indices = @transform_4, window_bounds = array<i64: 16, 48>}, {pipeline_mode = #tpu.pipeline_mode<synchronous>, transform_indices = @transform_5, window_bounds = array<i64: 1, 48>}, {transform_indices = @transform_6, window_bounds = array<i64: 2, 192>}, {pipeline_mode = #tpu.pipeline_mode<synchronous>, transform_indices = @transform_7, window_bounds = array<i64: 2, 48>}]} {
    %c0_i32 = arith.constant 0 : i32
    %0 = arith.cmpi eq, %arg1, %c0_i32 : i32
    %1 = arith.extui %0 : i1 to i32
    %c0_i32_0 = arith.constant 0 : i32
    %2 = arith.cmpi ne, %1, %c0_i32_0 : i32
    scf.if %2 {
      %cst_13 = arith.constant 0.000000e+00 : f32
      %18 = vector.broadcast %cst_13 : f32 to vector<2x192xf32>
      %c0_14 = arith.constant 0 : index
      %c0_15 = arith.constant 0 : index
      %19 = vector.load %arg10[%c0_14, %c0_15] : memref<2x192xf32, #tpu.memory_space<vmem>>, vector<2x192xf32>
      tpu.vector_store %arg10[%c0_14, %c0_15], %18 {strides = array<i32>} : memref<2x192xf32, #tpu.memory_space<vmem>>, vector<2x192xf32>,
    } else {
    }
    %c0 = arith.constant 0 : index
    %c0_1 = arith.constant 0 : index
    %3 = vector.load %arg10[%c0, %c0_1] : memref<2x192xf32, #tpu.memory_space<vmem>>, vector<2x192xf32>
    %c0_2 = arith.constant 0 : index
    %c0_3 = arith.constant 0 : index
    %4 = vector.load %arg2[%c0_2, %c0_3] : memref<2x192xf32, #tpu.memory_space<vmem>>, vector<2x192xf32>
    %5 = arith.truncf %4 : vector<2x192xf32> to vector<2x192xbf16>
    %c0_4 = arith.constant 0 : index
    %c0_5 = arith.constant 0 : index
    %6 = vector.load %arg3[%c0_4, %c0_5] : memref<192x192xbf16, #tpu.memory_space<vmem>>, vector<192x192xbf16>
    %cst = arith.constant dense<0.000000e+00> : vector<2x192xf32>
    %7 = tpu.matmul %5, %6, %cst {dimension_numbers = #tpu.dot_dimension_numbers<[1], [0], [0], [1], [0, 0, 1, 1], [], []>} : vector<2x192xbf16>, vector<192x192xbf16>, vector<2x192xf32> -> vector<2x192xf32>
    %8 = arith.addf %3, %7 : vector<2x192xf32>
    %c0_6 = arith.constant 0 : index
    %c0_7 = arith.constant 0 : index
    %9 = vector.load %arg10[%c0_6, %c0_7] : memref<2x192xf32, #tpu.memory_space<vmem>>, vector<2x192xf32>
    tpu.vector_store %arg10[%c0_6, %c0_7], %8 {strides = array<i32>} : memref<2x192xf32, #tpu.memory_space<vmem>>, vector<2x192xf32>,
    %c0_i32_8 = arith.constant 0 : i32
    %10 = arith.cmpi eq, %arg1, %c0_i32_8 : i32
    %11 = arith.extui %10 : i1 to i32
    %c0_i32_9 = arith.constant 0 : i32
    %12 = arith.cmpi ne, %11, %c0_i32_9 : i32
    scf.if %12 {
      %c0_13 = arith.constant 0 : index
      %c0_14 = arith.constant 0 : index
      %18 = vector.load %arg10[%c0_13, %c0_14] : memref<2x192xf32, #tpu.memory_space<vmem>>, vector<2x192xf32>
      %c0_15 = arith.constant 0 : index
      %c0_16 = arith.constant 0 : index
      %19 = vector.load %arg4[%c0_15, %c0_16] : memref<1x192xf32, #tpu.memory_space<vmem>>, vector<1x192xf32>
      %20 = vector.broadcast %19 : vector<1x192xf32> to vector<2x192xf32>
      %21 = arith.addf %18, %20 : vector<2x192xf32>
      %22 = arith.truncf %21 : vector<2x192xf32> to vector<2x192xbf16>
      %c0_17 = arith.constant 0 : index
      %c0_18 = arith.constant 0 : index
      %23 = vector.load %arg8[%c0_17, %c0_18] : memref<2x192xbf16, #tpu.memory_space<vmem>>, vector<2x192xbf16>
      tpu.vector_store %arg8[%c0_17, %c0_18], %22 {strides = array<i32>} : memref<2x192xbf16, #tpu.memory_space<vmem>>, vector<2x192xbf16>,
    } else {
    }
    %c0_i32_10 = arith.constant 0 : i32
    %13 = arith.cmpi eq, %arg0, %c0_i32_10 : i32
    %c0_i32_11 = arith.constant 0 : i32
    %14 = arith.cmpi eq, %arg1, %c0_i32_11 : i32
    %15 = arith.andi %13, %14 : i1
    %16 = arith.extui %15 : i1 to i32
    %c0_i32_12 = arith.constant 0 : i32
    %17 = arith.cmpi ne, %16, %c0_i32_12 : i32
    scf.if %17 {
      %c0_13 = arith.constant 0 : index
      %c0_14 = arith.constant 0 : index
      %18 = vector.load %arg5[%c0_13, %c0_14] : memref<2x16xf32, #tpu.memory_space<vmem>>, vector<2x16xf32>
      %19 = arith.truncf %18 : vector<2x16xf32> to vector<2x16xbf16>
      %c0_15 = arith.constant 0 : index
      %c0_16 = arith.constant 0 : index
      %20 = vector.load %arg6[%c0_15, %c0_16] : memref<16x48xbf16, #tpu.memory_space<vmem>>, vector<16x48xbf16>
      %cst_17 = arith.constant dense<0.000000e+00> : vector<2x48xf32>
      %21 = tpu.matmul %19, %20, %cst_17 {dimension_numbers = #tpu.dot_dimension_numbers<[1], [0], [0], [1], [0, 0, 1, 1], [], []>} : vector<2x16xbf16>, vector<16x48xbf16>, vector<2x48xf32> -> vector<2x48xf32>
      %c0_18 = arith.constant 0 : index
      %c0_19 = arith.constant 0 : index
      %22 = vector.load %arg7[%c0_18, %c0_19] : memref<1x48xf32, #tpu.memory_space<vmem>>, vector<1x48xf32>
      %23 = vector.broadcast %22 : vector<1x48xf32> to vector<2x48xf32>
      %24 = arith.addf %21, %23 : vector<2x48xf32>
      %25 = arith.truncf %24 : vector<2x48xf32> to vector<2x48xbf16>
      %c0_20 = arith.constant 0 : index
      %c0_21 = arith.constant 0 : index
      %26 = vector.load %arg9[%c0_20, %c0_21] : memref<2x48xbf16, #tpu.memory_space<vmem>>, vector<2x48xbf16>
      tpu.vector_store %arg9[%c0_20, %c0_21], %25 {strides = array<i32>} : memref<2x48xbf16, #tpu.memory_space<vmem>>, vector<2x48xbf16>,
    } else {
    }
    return
  }
  func.func @transform_0(%arg0: i32, %arg1: i32) -> (i32, i32) {
    %c0_i32 = arith.constant 0 : i32
    %c0_i32_0 = arith.constant 0 : i32
    return %c0_i32, %arg1 : i32, i32
  }
  func.func @transform_1(%arg0: i32, %arg1: i32) -> (i32, i32) {
    %c0_i32 = arith.constant 0 : i32
    return %arg1, %arg0 : i32, i32
  }
  func.func @transform_2(%arg0: i32, %arg1: i32) -> (i32, i32) {
    %c0_i32 = arith.constant 0 : i32
    %c0_i32_0 = arith.constant 0 : i32
    return %c0_i32, %arg0 : i32, i32
  }
  func.func @transform_3(%arg0: i32, %arg1: i32) -> (i32, i32) {
    %c0_i32 = arith.constant 0 : i32
    %c0_i32_0 = arith.constant 0 : i32
    %c0_i32_1 = arith.constant 0 : i32
    return %c0_i32, %c0_i32_0 : i32, i32
  }
  func.func @transform_4(%arg0: i32, %arg1: i32) -> (i32, i32) {
    %c0_i32 = arith.constant 0 : i32
    %c0_i32_0 = arith.constant 0 : i32
    %c0_i32_1 = arith.constant 0 : i32
    return %c0_i32, %c0_i32_0 : i32, i32
  }
  func.func @transform_5(%arg0: i32, %arg1: i32) -> (i32, i32) {
    %c0_i32 = arith.constant 0 : i32
    %c0_i32_0 = arith.constant 0 : i32
    %c0_i32_1 = arith.constant 0 : i32
    return %c0_i32, %c0_i32_0 : i32, i32
  }
  func.func @transform_6(%arg0: i32, %arg1: i32) -> (i32, i32) {
    %c0_i32 = arith.constant 0 : i32
    %c0_i32_0 = arith.constant 0 : i32
    return %c0_i32, %arg0 : i32, i32
  }
  func.func @transform_7(%arg0: i32, %arg1: i32) -> (i32, i32) {
    %c0_i32 = arith.constant 0 : i32
    %c0_i32_0 = arith.constant 0 : i32
    %c0_i32_1 = arith.constant 0 : i32
    return %c0_i32, %c0_i32_0 : i32, i32
  }
}

module attributes {stable_mosaic.version = 11 : i64} {
  func.func @_gnn_stack_kernel(%arg0: memref<128x3xbf16, #tpu.memory_space<vmem>>, %arg1: memref<32x3xbf16, #tpu.memory_space<vmem>>, %arg2: memref<128x32xbf16, #tpu.memory_space<vmem>>, %arg3: memref<32x128xbf16, #tpu.memory_space<vmem>>, %arg4: memref<3x32xbf16, #tpu.memory_space<vmem>>, %arg5: memref<1x32xf32, #tpu.memory_space<vmem>>, %arg6: memref<3x32xbf16, #tpu.memory_space<vmem>>, %arg7: memref<32x32xbf16, #tpu.memory_space<vmem>>, %arg8: memref<1x32xf32, #tpu.memory_space<vmem>>, %arg9: memref<3x32xbf16, #tpu.memory_space<vmem>>, %arg10: memref<32x32xbf16, #tpu.memory_space<vmem>>, %arg11: memref<1x32xf32, #tpu.memory_space<vmem>>, %arg12: memref<32x32xbf16, #tpu.memory_space<vmem>>, %arg13: memref<32x32xbf16, #tpu.memory_space<vmem>>, %arg14: memref<1x32xf32, #tpu.memory_space<vmem>>, %arg15: memref<32x32xbf16, #tpu.memory_space<vmem>>, %arg16: memref<32x32xbf16, #tpu.memory_space<vmem>>, %arg17: memref<1x32xf32, #tpu.memory_space<vmem>>, %arg18: memref<32x32xbf16, #tpu.memory_space<vmem>>, %arg19: memref<32x32xbf16, #tpu.memory_space<vmem>>, %arg20: memref<1x32xf32, #tpu.memory_space<vmem>>, %arg21: memref<32x32xbf16, #tpu.memory_space<vmem>>, %arg22: memref<1x32xf32, #tpu.memory_space<vmem>>, %arg23: memref<1x32xf32, #tpu.memory_space<vmem>>, %arg24: memref<1x32xf32, #tpu.memory_space<vmem>>, %arg25: memref<1x32xf32, #tpu.memory_space<vmem>>, %arg26: memref<128x32xbf16, #tpu.memory_space<vmem>>) attributes {dimension_semantics = [], scalar_prefetch = 0 : i64, scratch_operands = 0 : i64, tpu.core_type = #tpu.core_type<tc>} {
    %c0 = arith.constant 0 : index
    %c0_0 = arith.constant 0 : index
    %0 = vector.load %arg0[%c0, %c0_0] : memref<128x3xbf16, #tpu.memory_space<vmem>>, vector<128x3xbf16>
    %c0_1 = arith.constant 0 : index
    %c0_2 = arith.constant 0 : index
    %1 = vector.load %arg1[%c0_1, %c0_2] : memref<32x3xbf16, #tpu.memory_space<vmem>>, vector<32x3xbf16>
    %c0_3 = arith.constant 0 : index
    %c0_4 = arith.constant 0 : index
    %2 = vector.load %arg2[%c0_3, %c0_4] : memref<128x32xbf16, #tpu.memory_space<vmem>>, vector<128x32xbf16>
    %c0_5 = arith.constant 0 : index
    %c0_6 = arith.constant 0 : index
    %3 = vector.load %arg3[%c0_5, %c0_6] : memref<32x128xbf16, #tpu.memory_space<vmem>>, vector<32x128xbf16>
    %c0_7 = arith.constant 0 : index
    %c0_8 = arith.constant 0 : index
    %4 = vector.load %arg4[%c0_7, %c0_8] : memref<3x32xbf16, #tpu.memory_space<vmem>>, vector<3x32xbf16>
    %c0_9 = arith.constant 0 : index
    %c0_10 = arith.constant 0 : index
    %5 = vector.load %arg5[%c0_9, %c0_10] : memref<1x32xf32, #tpu.memory_space<vmem>>, vector<1x32xf32>
    %c0_11 = arith.constant 0 : index
    %c0_12 = arith.constant 0 : index
    %6 = vector.load %arg6[%c0_11, %c0_12] : memref<3x32xbf16, #tpu.memory_space<vmem>>, vector<3x32xbf16>
    %c0_13 = arith.constant 0 : index
    %c0_14 = arith.constant 0 : index
    %7 = vector.load %arg7[%c0_13, %c0_14] : memref<32x32xbf16, #tpu.memory_space<vmem>>, vector<32x32xbf16>
    %c0_15 = arith.constant 0 : index
    %c0_16 = arith.constant 0 : index
    %8 = vector.load %arg8[%c0_15, %c0_16] : memref<1x32xf32, #tpu.memory_space<vmem>>, vector<1x32xf32>
    %c0_17 = arith.constant 0 : index
    %c0_18 = arith.constant 0 : index
    %9 = vector.load %arg9[%c0_17, %c0_18] : memref<3x32xbf16, #tpu.memory_space<vmem>>, vector<3x32xbf16>
    %10 = vector.extract_strided_slice %1 {offsets = [0, 0], sizes = [32, 1], strides = [1, 1]} : vector<32x3xbf16> to vector<32x1xbf16>
    %11 = arith.extf %10 : vector<32x1xbf16> to vector<32x1xf32>
    %12 = vector.extract_strided_slice %4 {offsets = [0, 0], sizes = [1, 32], strides = [1, 1]} : vector<3x32xbf16> to vector<1x32xbf16>
    %13 = arith.extf %12 : vector<1x32xbf16> to vector<1x32xf32>
    %14 = vector.broadcast %11 : vector<32x1xf32> to vector<32x32xf32>
    %15 = vector.broadcast %13 : vector<1x32xf32> to vector<32x32xf32>
    %16 = arith.mulf %14, %15 : vector<32x32xf32>
    %17 = vector.extract_strided_slice %1 {offsets = [0, 1], sizes = [32, 1], strides = [1, 1]} : vector<32x3xbf16> to vector<32x1xbf16>
    %18 = arith.extf %17 : vector<32x1xbf16> to vector<32x1xf32>
    %19 = vector.extract_strided_slice %4 {offsets = [1, 0], sizes = [1, 32], strides = [1, 1]} : vector<3x32xbf16> to vector<1x32xbf16>
    %20 = arith.extf %19 : vector<1x32xbf16> to vector<1x32xf32>
    %21 = vector.broadcast %18 : vector<32x1xf32> to vector<32x32xf32>
    %22 = vector.broadcast %20 : vector<1x32xf32> to vector<32x32xf32>
    %23 = arith.mulf %21, %22 : vector<32x32xf32>
    %24 = arith.addf %16, %23 : vector<32x32xf32>
    %25 = vector.extract_strided_slice %1 {offsets = [0, 2], sizes = [32, 1], strides = [1, 1]} : vector<32x3xbf16> to vector<32x1xbf16>
    %26 = arith.extf %25 : vector<32x1xbf16> to vector<32x1xf32>
    %27 = vector.extract_strided_slice %4 {offsets = [2, 0], sizes = [1, 32], strides = [1, 1]} : vector<3x32xbf16> to vector<1x32xbf16>
    %28 = arith.extf %27 : vector<1x32xbf16> to vector<1x32xf32>
    %29 = vector.broadcast %26 : vector<32x1xf32> to vector<32x32xf32>
    %30 = vector.broadcast %28 : vector<1x32xf32> to vector<32x32xf32>
    %31 = arith.mulf %29, %30 : vector<32x32xf32>
    %32 = arith.addf %24, %31 : vector<32x32xf32>
    %33 = vector.extract_strided_slice %0 {offsets = [0, 0], sizes = [128, 1], strides = [1, 1]} : vector<128x3xbf16> to vector<128x1xbf16>
    %34 = arith.extf %33 : vector<128x1xbf16> to vector<128x1xf32>
    %35 = vector.extract_strided_slice %6 {offsets = [0, 0], sizes = [1, 32], strides = [1, 1]} : vector<3x32xbf16> to vector<1x32xbf16>
    %36 = arith.extf %35 : vector<1x32xbf16> to vector<1x32xf32>
    %37 = vector.broadcast %34 : vector<128x1xf32> to vector<128x32xf32>
    %38 = vector.broadcast %36 : vector<1x32xf32> to vector<128x32xf32>
    %39 = arith.mulf %37, %38 : vector<128x32xf32>
    %40 = vector.extract_strided_slice %0 {offsets = [0, 1], sizes = [128, 1], strides = [1, 1]} : vector<128x3xbf16> to vector<128x1xbf16>
    %41 = arith.extf %40 : vector<128x1xbf16> to vector<128x1xf32>
    %42 = vector.extract_strided_slice %6 {offsets = [1, 0], sizes = [1, 32], strides = [1, 1]} : vector<3x32xbf16> to vector<1x32xbf16>
    %43 = arith.extf %42 : vector<1x32xbf16> to vector<1x32xf32>
    %44 = vector.broadcast %41 : vector<128x1xf32> to vector<128x32xf32>
    %45 = vector.broadcast %43 : vector<1x32xf32> to vector<128x32xf32>
    %46 = arith.mulf %44, %45 : vector<128x32xf32>
    %47 = arith.addf %39, %46 : vector<128x32xf32>
    %48 = vector.extract_strided_slice %0 {offsets = [0, 2], sizes = [128, 1], strides = [1, 1]} : vector<128x3xbf16> to vector<128x1xbf16>
    %49 = arith.extf %48 : vector<128x1xbf16> to vector<128x1xf32>
    %50 = vector.extract_strided_slice %6 {offsets = [2, 0], sizes = [1, 32], strides = [1, 1]} : vector<3x32xbf16> to vector<1x32xbf16>
    %51 = arith.extf %50 : vector<1x32xbf16> to vector<1x32xf32>
    %52 = vector.broadcast %49 : vector<128x1xf32> to vector<128x32xf32>
    %53 = vector.broadcast %51 : vector<1x32xf32> to vector<128x32xf32>
    %54 = arith.mulf %52, %53 : vector<128x32xf32>
    %55 = arith.addf %47, %54 : vector<128x32xf32>
    %56 = arith.truncf %32 : vector<32x32xf32> to vector<32x32xbf16>
    %cst = arith.constant dense<0.000000e+00> : vector<128x32xf32>
    %57 = tpu.matmul %2, %56, %cst {dimension_numbers = #tpu.dot_dimension_numbers<[1], [0], [0], [1], [0, 0, 1, 1], [], []>} : vector<128x32xbf16>, vector<32x32xbf16>, vector<128x32xf32> -> vector<128x32xf32>
    %58 = vector.broadcast %5 : vector<1x32xf32> to vector<128x32xf32>
    %59 = arith.addf %57, %58 : vector<128x32xf32>
    %60 = arith.addf %59, %55 : vector<128x32xf32>
    %cst_19 = arith.constant 0.000000e+00 : f32
    %61 = vector.broadcast %cst_19 : f32 to vector<128x32xf32>
    %62 = arith.maximumf %60, %61 : vector<128x32xf32>
    %63 = arith.truncf %62 : vector<128x32xf32> to vector<128x32xbf16>
    %cst_20 = arith.constant dense<0.000000e+00> : vector<32x32xf32>
    %64 = tpu.matmul %3, %63, %cst_20 {dimension_numbers = #tpu.dot_dimension_numbers<[1], [0], [0], [1], [0, 0, 1, 1], [], []>} : vector<32x128xbf16>, vector<128x32xbf16>, vector<32x32xf32> -> vector<32x32xf32>
    %65 = arith.truncf %64 : vector<32x32xf32> to vector<32x32xbf16>
    %cst_21 = arith.constant dense<0.000000e+00> : vector<32x32xf32>
    %66 = tpu.matmul %65, %7, %cst_21 {dimension_numbers = #tpu.dot_dimension_numbers<[1], [0], [0], [1], [0, 0, 1, 1], [], []>} : vector<32x32xbf16>, vector<32x32xbf16>, vector<32x32xf32> -> vector<32x32xf32>
    %67 = vector.extract_strided_slice %1 {offsets = [0, 0], sizes = [32, 1], strides = [1, 1]} : vector<32x3xbf16> to vector<32x1xbf16>
    %68 = arith.extf %67 : vector<32x1xbf16> to vector<32x1xf32>
    %69 = vector.extract_strided_slice %9 {offsets = [0, 0], sizes = [1, 32], strides = [1, 1]} : vector<3x32xbf16> to vector<1x32xbf16>
    %70 = arith.extf %69 : vector<1x32xbf16> to vector<1x32xf32>
    %71 = vector.broadcast %68 : vector<32x1xf32> to vector<32x32xf32>
    %72 = vector.broadcast %70 : vector<1x32xf32> to vector<32x32xf32>
    %73 = arith.mulf %71, %72 : vector<32x32xf32>
    %74 = vector.extract_strided_slice %1 {offsets = [0, 1], sizes = [32, 1], strides = [1, 1]} : vector<32x3xbf16> to vector<32x1xbf16>
    %75 = arith.extf %74 : vector<32x1xbf16> to vector<32x1xf32>
    %76 = vector.extract_strided_slice %9 {offsets = [1, 0], sizes = [1, 32], strides = [1, 1]} : vector<3x32xbf16> to vector<1x32xbf16>
    %77 = arith.extf %76 : vector<1x32xbf16> to vector<1x32xf32>
    %78 = vector.broadcast %75 : vector<32x1xf32> to vector<32x32xf32>
    %79 = vector.broadcast %77 : vector<1x32xf32> to vector<32x32xf32>
    %80 = arith.mulf %78, %79 : vector<32x32xf32>
    %81 = arith.addf %73, %80 : vector<32x32xf32>
    %82 = vector.extract_strided_slice %1 {offsets = [0, 2], sizes = [32, 1], strides = [1, 1]} : vector<32x3xbf16> to vector<32x1xbf16>
    %83 = arith.extf %82 : vector<32x1xbf16> to vector<32x1xf32>
    %84 = vector.extract_strided_slice %9 {offsets = [2, 0], sizes = [1, 32], strides = [1, 1]} : vector<3x32xbf16> to vector<1x32xbf16>
    %85 = arith.extf %84 : vector<1x32xbf16> to vector<1x32xf32>
    %86 = vector.broadcast %83 : vector<32x1xf32> to vector<32x32xf32>
    %87 = vector.broadcast %85 : vector<1x32xf32> to vector<32x32xf32>
    %88 = arith.mulf %86, %87 : vector<32x32xf32>
    %89 = arith.addf %81, %88 : vector<32x32xf32>
    %90 = vector.broadcast %8 : vector<1x32xf32> to vector<32x32xf32>
    %91 = arith.addf %66, %90 : vector<32x32xf32>
    %92 = arith.addf %91, %89 : vector<32x32xf32>
    %cst_22 = arith.constant 0.000000e+00 : f32
    %93 = vector.broadcast %cst_22 : f32 to vector<32x32xf32>
    %94 = arith.maximumf %92, %93 : vector<32x32xf32>
    %c0_23 = arith.constant 0 : index
    %c0_24 = arith.constant 0 : index
    %95 = vector.load %arg22[%c0_23, %c0_24] : memref<1x32xf32, #tpu.memory_space<vmem>>, vector<1x32xf32>
    %c0_25 = arith.constant 0 : index
    %c0_26 = arith.constant 0 : index
    %96 = vector.load %arg23[%c0_25, %c0_26] : memref<1x32xf32, #tpu.memory_space<vmem>>, vector<1x32xf32>
    %cst_27 = arith.constant dense<0.000000e+00> : vector<128xf32>
    %97 = vector.multi_reduction <add>, %62, %cst_27 [1] : vector<128x32xf32> to vector<128xf32>
    %98 = vector.shape_cast %97 : vector<128xf32> to vector<128x1xf32>
    %cst_28 = arith.constant 3.200000e+01 : f32
    %99 = vector.broadcast %cst_28 : f32 to vector<128x1xf32>
    %100 = arith.divf %98, %99 : vector<128x1xf32>
    %101 = vector.broadcast %100 : vector<128x1xf32> to vector<128x32xf32>
    %102 = arith.subf %62, %101 : vector<128x32xf32>
    %103 = arith.mulf %102, %102 : vector<128x32xf32>
    %cst_29 = arith.constant dense<0.000000e+00> : vector<128xf32>
    %104 = vector.multi_reduction <add>, %103, %cst_29 [1] : vector<128x32xf32> to vector<128xf32>
    %105 = vector.shape_cast %104 : vector<128xf32> to vector<128x1xf32>
    %cst_30 = arith.constant 3.200000e+01 : f32
    %106 = vector.broadcast %cst_30 : f32 to vector<128x1xf32>
    %107 = arith.divf %105, %106 : vector<128x1xf32>
    %cst_31 = arith.constant 9.99999974E-6 : f32
    %108 = vector.broadcast %cst_31 : f32 to vector<128x1xf32>
    %109 = arith.addf %107, %108 : vector<128x1xf32>
    %110 = math.rsqrt %109 : vector<128x1xf32>
    %111 = vector.broadcast %110 : vector<128x1xf32> to vector<128x32xf32>
    %112 = arith.mulf %102, %111 : vector<128x32xf32>
    %113 = vector.broadcast %95 : vector<1x32xf32> to vector<128x32xf32>
    %114 = arith.mulf %112, %113 : vector<128x32xf32>
    %115 = vector.broadcast %96 : vector<1x32xf32> to vector<128x32xf32>
    %116 = arith.addf %114, %115 : vector<128x32xf32>
    %117 = arith.truncf %116 : vector<128x32xf32> to vector<128x32xbf16>
    %cst_32 = arith.constant dense<0.000000e+00> : vector<32xf32>
    %118 = vector.multi_reduction <add>, %94, %cst_32 [1] : vector<32x32xf32> to vector<32xf32>
    %119 = vector.shape_cast %118 : vector<32xf32> to vector<32x1xf32>
    %cst_33 = arith.constant 3.200000e+01 : f32
    %120 = vector.broadcast %cst_33 : f32 to vector<32x1xf32>
    %121 = arith.divf %119, %120 : vector<32x1xf32>
    %122 = vector.broadcast %121 : vector<32x1xf32> to vector<32x32xf32>
    %123 = arith.subf %94, %122 : vector<32x32xf32>
    %124 = arith.mulf %123, %123 : vector<32x32xf32>
    %cst_34 = arith.constant dense<0.000000e+00> : vector<32xf32>
    %125 = vector.multi_reduction <add>, %124, %cst_34 [1] : vector<32x32xf32> to vector<32xf32>
    %126 = vector.shape_cast %125 : vector<32xf32> to vector<32x1xf32>
    %cst_35 = arith.constant 3.200000e+01 : f32
    %127 = vector.broadcast %cst_35 : f32 to vector<32x1xf32>
    %128 = arith.divf %126, %127 : vector<32x1xf32>
    %cst_36 = arith.constant 9.99999974E-6 : f32
    %129 = vector.broadcast %cst_36 : f32 to vector<32x1xf32>
    %130 = arith.addf %128, %129 : vector<32x1xf32>
    %131 = math.rsqrt %130 : vector<32x1xf32>
    %132 = vector.broadcast %131 : vector<32x1xf32> to vector<32x32xf32>
    %133 = arith.mulf %123, %132 : vector<32x32xf32>
    %134 = vector.broadcast %95 : vector<1x32xf32> to vector<32x32xf32>
    %135 = arith.mulf %133, %134 : vector<32x32xf32>
    %136 = vector.broadcast %96 : vector<1x32xf32> to vector<32x32xf32>
    %137 = arith.addf %135, %136 : vector<32x32xf32>
    %138 = arith.truncf %137 : vector<32x32xf32> to vector<32x32xbf16>
    %c0_37 = arith.constant 0 : index
    %c0_38 = arith.constant 0 : index
    %139 = vector.load %arg10[%c0_37, %c0_38] : memref<32x32xbf16, #tpu.memory_space<vmem>>, vector<32x32xbf16>
    %c0_39 = arith.constant 0 : index
    %c0_40 = arith.constant 0 : index
    %140 = vector.load %arg11[%c0_39, %c0_40] : memref<1x32xf32, #tpu.memory_space<vmem>>, vector<1x32xf32>
    %c0_41 = arith.constant 0 : index
    %c0_42 = arith.constant 0 : index
    %141 = vector.load %arg12[%c0_41, %c0_42] : memref<32x32xbf16, #tpu.memory_space<vmem>>, vector<32x32xbf16>
    %c0_43 = arith.constant 0 : index
    %c0_44 = arith.constant 0 : index
    %142 = vector.load %arg13[%c0_43, %c0_44] : memref<32x32xbf16, #tpu.memory_space<vmem>>, vector<32x32xbf16>
    %c0_45 = arith.constant 0 : index
    %c0_46 = arith.constant 0 : index
    %143 = vector.load %arg14[%c0_45, %c0_46] : memref<1x32xf32, #tpu.memory_space<vmem>>, vector<1x32xf32>
    %c0_47 = arith.constant 0 : index
    %c0_48 = arith.constant 0 : index
    %144 = vector.load %arg15[%c0_47, %c0_48] : memref<32x32xbf16, #tpu.memory_space<vmem>>, vector<32x32xbf16>
    %cst_49 = arith.constant dense<0.000000e+00> : vector<32x32xf32>
    %145 = tpu.matmul %138, %139, %cst_49 {dimension_numbers = #tpu.dot_dimension_numbers<[1], [0], [0], [1], [0, 0, 1, 1], [], []>} : vector<32x32xbf16>, vector<32x32xbf16>, vector<32x32xf32> -> vector<32x32xf32>
    %cst_50 = arith.constant dense<0.000000e+00> : vector<128x32xf32>
    %146 = tpu.matmul %117, %141, %cst_50 {dimension_numbers = #tpu.dot_dimension_numbers<[1], [0], [0], [1], [0, 0, 1, 1], [], []>} : vector<128x32xbf16>, vector<32x32xbf16>, vector<128x32xf32> -> vector<128x32xf32>
    %147 = arith.truncf %145 : vector<32x32xf32> to vector<32x32xbf16>
    %cst_51 = arith.constant dense<0.000000e+00> : vector<128x32xf32>
    %148 = tpu.matmul %2, %147, %cst_51 {dimension_numbers = #tpu.dot_dimension_numbers<[1], [0], [0], [1], [0, 0, 1, 1], [], []>} : vector<128x32xbf16>, vector<32x32xbf16>, vector<128x32xf32> -> vector<128x32xf32>
    %149 = vector.broadcast %140 : vector<1x32xf32> to vector<128x32xf32>
    %150 = arith.addf %148, %149 : vector<128x32xf32>
    %151 = arith.addf %150, %146 : vector<128x32xf32>
    %cst_52 = arith.constant 0.000000e+00 : f32
    %152 = vector.broadcast %cst_52 : f32 to vector<128x32xf32>
    %153 = arith.maximumf %151, %152 : vector<128x32xf32>
    %154 = arith.truncf %153 : vector<128x32xf32> to vector<128x32xbf16>
    %cst_53 = arith.constant dense<0.000000e+00> : vector<32x32xf32>
    %155 = tpu.matmul %3, %154, %cst_53 {dimension_numbers = #tpu.dot_dimension_numbers<[1], [0], [0], [1], [0, 0, 1, 1], [], []>} : vector<32x128xbf16>, vector<128x32xbf16>, vector<32x32xf32> -> vector<32x32xf32>
    %156 = arith.truncf %155 : vector<32x32xf32> to vector<32x32xbf16>
    %cst_54 = arith.constant dense<0.000000e+00> : vector<32x32xf32>
    %157 = tpu.matmul %156, %142, %cst_54 {dimension_numbers = #tpu.dot_dimension_numbers<[1], [0], [0], [1], [0, 0, 1, 1], [], []>} : vector<32x32xbf16>, vector<32x32xbf16>, vector<32x32xf32> -> vector<32x32xf32>
    %cst_55 = arith.constant dense<0.000000e+00> : vector<32x32xf32>
    %158 = tpu.matmul %138, %144, %cst_55 {dimension_numbers = #tpu.dot_dimension_numbers<[1], [0], [0], [1], [0, 0, 1, 1], [], []>} : vector<32x32xbf16>, vector<32x32xbf16>, vector<32x32xf32> -> vector<32x32xf32>
    %159 = vector.broadcast %143 : vector<1x32xf32> to vector<32x32xf32>
    %160 = arith.addf %157, %159 : vector<32x32xf32>
    %161 = arith.addf %160, %158 : vector<32x32xf32>
    %cst_56 = arith.constant 0.000000e+00 : f32
    %162 = vector.broadcast %cst_56 : f32 to vector<32x32xf32>
    %163 = arith.maximumf %161, %162 : vector<32x32xf32>
    %c0_57 = arith.constant 0 : index
    %c0_58 = arith.constant 0 : index
    %164 = vector.load %arg24[%c0_57, %c0_58] : memref<1x32xf32, #tpu.memory_space<vmem>>, vector<1x32xf32>
    %c0_59 = arith.constant 0 : index
    %c0_60 = arith.constant 0 : index
    %165 = vector.load %arg25[%c0_59, %c0_60] : memref<1x32xf32, #tpu.memory_space<vmem>>, vector<1x32xf32>
    %cst_61 = arith.constant dense<0.000000e+00> : vector<128xf32>
    %166 = vector.multi_reduction <add>, %153, %cst_61 [1] : vector<128x32xf32> to vector<128xf32>
    %167 = vector.shape_cast %166 : vector<128xf32> to vector<128x1xf32>
    %cst_62 = arith.constant 3.200000e+01 : f32
    %168 = vector.broadcast %cst_62 : f32 to vector<128x1xf32>
    %169 = arith.divf %167, %168 : vector<128x1xf32>
    %170 = vector.broadcast %169 : vector<128x1xf32> to vector<128x32xf32>
    %171 = arith.subf %153, %170 : vector<128x32xf32>
    %172 = arith.mulf %171, %171 : vector<128x32xf32>
    %cst_63 = arith.constant dense<0.000000e+00> : vector<128xf32>
    %173 = vector.multi_reduction <add>, %172, %cst_63 [1] : vector<128x32xf32> to vector<128xf32>
    %174 = vector.shape_cast %173 : vector<128xf32> to vector<128x1xf32>
    %cst_64 = arith.constant 3.200000e+01 : f32
    %175 = vector.broadcast %cst_64 : f32 to vector<128x1xf32>
    %176 = arith.divf %174, %175 : vector<128x1xf32>
    %cst_65 = arith.constant 9.99999974E-6 : f32
    %177 = vector.broadcast %cst_65 : f32 to vector<128x1xf32>
    %178 = arith.addf %176, %177 : vector<128x1xf32>
    %179 = math.rsqrt %178 : vector<128x1xf32>
    %180 = vector.broadcast %179 : vector<128x1xf32> to vector<128x32xf32>
    %181 = arith.mulf %171, %180 : vector<128x32xf32>
    %182 = vector.broadcast %164 : vector<1x32xf32> to vector<128x32xf32>
    %183 = arith.mulf %181, %182 : vector<128x32xf32>
    %184 = vector.broadcast %165 : vector<1x32xf32> to vector<128x32xf32>
    %185 = arith.addf %183, %184 : vector<128x32xf32>
    %186 = arith.truncf %185 : vector<128x32xf32> to vector<128x32xbf16>
    %cst_66 = arith.constant dense<0.000000e+00> : vector<32xf32>
    %187 = vector.multi_reduction <add>, %163, %cst_66 [1] : vector<32x32xf32> to vector<32xf32>
    %188 = vector.shape_cast %187 : vector<32xf32> to vector<32x1xf32>
    %cst_67 = arith.constant 3.200000e+01 : f32
    %189 = vector.broadcast %cst_67 : f32 to vector<32x1xf32>
    %190 = arith.divf %188, %189 : vector<32x1xf32>
    %191 = vector.broadcast %190 : vector<32x1xf32> to vector<32x32xf32>
    %192 = arith.subf %163, %191 : vector<32x32xf32>
    %193 = arith.mulf %192, %192 : vector<32x32xf32>
    %cst_68 = arith.constant dense<0.000000e+00> : vector<32xf32>
    %194 = vector.multi_reduction <add>, %193, %cst_68 [1] : vector<32x32xf32> to vector<32xf32>
    %195 = vector.shape_cast %194 : vector<32xf32> to vector<32x1xf32>
    %cst_69 = arith.constant 3.200000e+01 : f32
    %196 = vector.broadcast %cst_69 : f32 to vector<32x1xf32>
    %197 = arith.divf %195, %196 : vector<32x1xf32>
    %cst_70 = arith.constant 9.99999974E-6 : f32
    %198 = vector.broadcast %cst_70 : f32 to vector<32x1xf32>
    %199 = arith.addf %197, %198 : vector<32x1xf32>
    %200 = math.rsqrt %199 : vector<32x1xf32>
    %201 = vector.broadcast %200 : vector<32x1xf32> to vector<32x32xf32>
    %202 = arith.mulf %192, %201 : vector<32x32xf32>
    %203 = vector.broadcast %164 : vector<1x32xf32> to vector<32x32xf32>
    %204 = arith.mulf %202, %203 : vector<32x32xf32>
    %205 = vector.broadcast %165 : vector<1x32xf32> to vector<32x32xf32>
    %206 = arith.addf %204, %205 : vector<32x32xf32>
    %207 = arith.truncf %206 : vector<32x32xf32> to vector<32x32xbf16>
    %c0_71 = arith.constant 0 : index
    %c0_72 = arith.constant 0 : index
    %208 = vector.load %arg16[%c0_71, %c0_72] : memref<32x32xbf16, #tpu.memory_space<vmem>>, vector<32x32xbf16>
    %c0_73 = arith.constant 0 : index
    %c0_74 = arith.constant 0 : index
    %209 = vector.load %arg17[%c0_73, %c0_74] : memref<1x32xf32, #tpu.memory_space<vmem>>, vector<1x32xf32>
    %c0_75 = arith.constant 0 : index
    %c0_76 = arith.constant 0 : index
    %210 = vector.load %arg18[%c0_75, %c0_76] : memref<32x32xbf16, #tpu.memory_space<vmem>>, vector<32x32xbf16>
    %cst_77 = arith.constant dense<0.000000e+00> : vector<32x32xf32>
    %211 = tpu.matmul %207, %208, %cst_77 {dimension_numbers = #tpu.dot_dimension_numbers<[1], [0], [0], [1], [0, 0, 1, 1], [], []>} : vector<32x32xbf16>, vector<32x32xbf16>, vector<32x32xf32> -> vector<32x32xf32>
    %cst_78 = arith.constant dense<0.000000e+00> : vector<128x32xf32>
    %212 = tpu.matmul %186, %210, %cst_78 {dimension_numbers = #tpu.dot_dimension_numbers<[1], [0], [0], [1], [0, 0, 1, 1], [], []>} : vector<128x32xbf16>, vector<32x32xbf16>, vector<128x32xf32> -> vector<128x32xf32>
    %213 = arith.truncf %211 : vector<32x32xf32> to vector<32x32xbf16>
    %cst_79 = arith.constant dense<0.000000e+00> : vector<128x32xf32>
    %214 = tpu.matmul %2, %213, %cst_79 {dimension_numbers = #tpu.dot_dimension_numbers<[1], [0], [0], [1], [0, 0, 1, 1], [], []>} : vector<128x32xbf16>, vector<32x32xbf16>, vector<128x32xf32> -> vector<128x32xf32>
    %215 = vector.broadcast %209 : vector<1x32xf32> to vector<128x32xf32>
    %216 = arith.addf %214, %215 : vector<128x32xf32>
    %217 = arith.addf %216, %212 : vector<128x32xf32>
    %cst_80 = arith.constant 0.000000e+00 : f32
    %218 = vector.broadcast %cst_80 : f32 to vector<128x32xf32>
    %219 = arith.maximumf %217, %218 : vector<128x32xf32>
    %220 = arith.truncf %219 : vector<128x32xf32> to vector<128x32xbf16>
    %c0_81 = arith.constant 0 : index
    %c0_82 = arith.constant 0 : index
    %221 = vector.load %arg26[%c0_81, %c0_82] : memref<128x32xbf16, #tpu.memory_space<vmem>>, vector<128x32xbf16>
    tpu.vector_store %arg26[%c0_81, %c0_82], %220 {strides = array<i32>} : memref<128x32xbf16, #tpu.memory_space<vmem>>, vector<128x32xbf16>,
    return
  }
}

module attributes {stable_mosaic.version = 11 : i64} {
  func.func @_conv_head_kernel(%arg0: memref<2x32x64xbf16, #tpu.memory_space<vmem>>, %arg1: memref<16x128xbf16, #tpu.memory_space<vmem>>, %arg2: memref<16x1xf32, #tpu.memory_space<vmem>>, %arg3: memref<16x64xbf16, #tpu.memory_space<vmem>>, %arg4: memref<16x1xf32, #tpu.memory_space<vmem>>, %arg5: memref<16x64xbf16, #tpu.memory_space<vmem>>, %arg6: memref<16x1xf32, #tpu.memory_space<vmem>>, %arg7: memref<16x55x32xbf16, #tpu.memory_space<vmem>>, %arg8: memref<1x32xf32, #tpu.memory_space<vmem>>, %arg9: memref<32x2xbf16, #tpu.memory_space<vmem>>, %arg10: memref<1x2xf32, #tpu.memory_space<vmem>>, %arg11: memref<2x2xf32, #tpu.memory_space<vmem>>) attributes {dimension_semantics = [], scalar_prefetch = 0 : i64, scratch_operands = 0 : i64, tpu.core_type = #tpu.core_type<tc>} {
    %c0 = arith.constant 0 : index
    %c0_0 = arith.constant 0 : index
    %c0_1 = arith.constant 0 : index
    %0 = vector.load %arg0[%c0, %c0_0, %c0_1] : memref<2x32x64xbf16, #tpu.memory_space<vmem>>, vector<1x32x64xbf16>
    %1 = vector.shape_cast %0 : vector<1x32x64xbf16> to vector<32x64xbf16>
    %2 = vector.extract_strided_slice %1 {offsets = [0, 0], sizes = [32, 61], strides = [1, 1]} : vector<32x64xbf16> to vector<32x61xbf16>
    %3 = vector.extract_strided_slice %1 {offsets = [0, 1], sizes = [32, 61], strides = [1, 1]} : vector<32x64xbf16> to vector<32x61xbf16>
    %4 = vector.extract_strided_slice %1 {offsets = [0, 2], sizes = [32, 61], strides = [1, 1]} : vector<32x64xbf16> to vector<32x61xbf16>
    %5 = vector.extract_strided_slice %1 {offsets = [0, 3], sizes = [32, 61], strides = [1, 1]} : vector<32x64xbf16> to vector<32x61xbf16>
    %6 = tpu.concatenate %2, %3, %4, %5 in 0 : vector<32x61xbf16>, vector<32x61xbf16>, vector<32x61xbf16>, vector<32x61xbf16> -> vector<128x61xbf16>
    %c0_2 = arith.constant 0 : index
    %c0_3 = arith.constant 0 : index
    %7 = vector.load %arg1[%c0_2, %c0_3] : memref<16x128xbf16, #tpu.memory_space<vmem>>, vector<16x128xbf16>
    %cst = arith.constant dense<0.000000e+00> : vector<16x61xf32>
    %8 = tpu.matmul %7, %6, %cst {dimension_numbers = #tpu.dot_dimension_numbers<[1], [0], [0], [1], [0, 0, 1, 1], [], []>} : vector<16x128xbf16>, vector<128x61xbf16>, vector<16x61xf32> -> vector<16x61xf32>
    %c0_4 = arith.constant 0 : index
    %c0_5 = arith.constant 0 : index
    %9 = vector.load %arg2[%c0_4, %c0_5] : memref<16x1xf32, #tpu.memory_space<vmem>>, vector<16x1xf32>
    %10 = vector.broadcast %9 : vector<16x1xf32> to vector<16x61xf32>
    %11 = arith.addf %8, %10 : vector<16x61xf32>
    %cst_6 = arith.constant 0.000000e+00 : f32
    %12 = vector.broadcast %cst_6 : f32 to vector<16x61xf32>
    %13 = arith.maximumf %11, %12 : vector<16x61xf32>
    %14 = arith.truncf %13 : vector<16x61xf32> to vector<16x61xbf16>
    %15 = vector.extract_strided_slice %14 {offsets = [0, 0], sizes = [16, 58], strides = [1, 1]} : vector<16x61xbf16> to vector<16x58xbf16>
    %16 = vector.extract_strided_slice %14 {offsets = [0, 1], sizes = [16, 58], strides = [1, 1]} : vector<16x61xbf16> to vector<16x58xbf16>
    %17 = vector.extract_strided_slice %14 {offsets = [0, 2], sizes = [16, 58], strides = [1, 1]} : vector<16x61xbf16> to vector<16x58xbf16>
    %18 = vector.extract_strided_slice %14 {offsets = [0, 3], sizes = [16, 58], strides = [1, 1]} : vector<16x61xbf16> to vector<16x58xbf16>
    %19 = tpu.concatenate %15, %16, %17, %18 in 0 : vector<16x58xbf16>, vector<16x58xbf16>, vector<16x58xbf16>, vector<16x58xbf16> -> vector<64x58xbf16>
    %c0_7 = arith.constant 0 : index
    %c0_8 = arith.constant 0 : index
    %20 = vector.load %arg3[%c0_7, %c0_8] : memref<16x64xbf16, #tpu.memory_space<vmem>>, vector<16x64xbf16>
    %cst_9 = arith.constant dense<0.000000e+00> : vector<16x58xf32>
    %21 = tpu.matmul %20, %19, %cst_9 {dimension_numbers = #tpu.dot_dimension_numbers<[1], [0], [0], [1], [0, 0, 1, 1], [], []>} : vector<16x64xbf16>, vector<64x58xbf16>, vector<16x58xf32> -> vector<16x58xf32>
    %c0_10 = arith.constant 0 : index
    %c0_11 = arith.constant 0 : index
    %22 = vector.load %arg4[%c0_10, %c0_11] : memref<16x1xf32, #tpu.memory_space<vmem>>, vector<16x1xf32>
    %23 = vector.broadcast %22 : vector<16x1xf32> to vector<16x58xf32>
    %24 = arith.addf %21, %23 : vector<16x58xf32>
    %cst_12 = arith.constant 0.000000e+00 : f32
    %25 = vector.broadcast %cst_12 : f32 to vector<16x58xf32>
    %26 = arith.maximumf %24, %25 : vector<16x58xf32>
    %27 = arith.truncf %26 : vector<16x58xf32> to vector<16x58xbf16>
    %28 = vector.extract_strided_slice %27 {offsets = [0, 0], sizes = [16, 55], strides = [1, 1]} : vector<16x58xbf16> to vector<16x55xbf16>
    %29 = vector.extract_strided_slice %27 {offsets = [0, 1], sizes = [16, 55], strides = [1, 1]} : vector<16x58xbf16> to vector<16x55xbf16>
    %30 = vector.extract_strided_slice %27 {offsets = [0, 2], sizes = [16, 55], strides = [1, 1]} : vector<16x58xbf16> to vector<16x55xbf16>
    %31 = vector.extract_strided_slice %27 {offsets = [0, 3], sizes = [16, 55], strides = [1, 1]} : vector<16x58xbf16> to vector<16x55xbf16>
    %32 = tpu.concatenate %28, %29, %30, %31 in 0 : vector<16x55xbf16>, vector<16x55xbf16>, vector<16x55xbf16>, vector<16x55xbf16> -> vector<64x55xbf16>
    %c0_13 = arith.constant 0 : index
    %c0_14 = arith.constant 0 : index
    %33 = vector.load %arg5[%c0_13, %c0_14] : memref<16x64xbf16, #tpu.memory_space<vmem>>, vector<16x64xbf16>
    %cst_15 = arith.constant dense<0.000000e+00> : vector<16x55xf32>
    %34 = tpu.matmul %33, %32, %cst_15 {dimension_numbers = #tpu.dot_dimension_numbers<[1], [0], [0], [1], [0, 0, 1, 1], [], []>} : vector<16x64xbf16>, vector<64x55xbf16>, vector<16x55xf32> -> vector<16x55xf32>
    %c0_16 = arith.constant 0 : index
    %c0_17 = arith.constant 0 : index
    %35 = vector.load %arg6[%c0_16, %c0_17] : memref<16x1xf32, #tpu.memory_space<vmem>>, vector<16x1xf32>
    %36 = vector.broadcast %35 : vector<16x1xf32> to vector<16x55xf32>
    %37 = arith.addf %34, %36 : vector<16x55xf32>
    %cst_18 = arith.constant 0.000000e+00 : f32
    %38 = vector.broadcast %cst_18 : f32 to vector<16x55xf32>
    %39 = arith.maximumf %37, %38 : vector<16x55xf32>
    %40 = arith.truncf %39 : vector<16x55xf32> to vector<16x55xbf16>
    %41 = vector.extract_strided_slice %40 {offsets = [0, 0], sizes = [1, 55], strides = [1, 1]} : vector<16x55xbf16> to vector<1x55xbf16>
    %c0_19 = arith.constant 0 : index
    %c0_20 = arith.constant 0 : index
    %c0_21 = arith.constant 0 : index
    %42 = vector.load %arg7[%c0_19, %c0_20, %c0_21] : memref<16x55x32xbf16, #tpu.memory_space<vmem>>, vector<1x55x32xbf16>
    %43 = vector.shape_cast %42 : vector<1x55x32xbf16> to vector<55x32xbf16>
    %cst_22 = arith.constant dense<0.000000e+00> : vector<1x32xf32>
    %44 = tpu.matmul %41, %43, %cst_22 {dimension_numbers = #tpu.dot_dimension_numbers<[1], [0], [0], [1], [0, 0, 1, 1], [], []>} : vector<1x55xbf16>, vector<55x32xbf16>, vector<1x32xf32> -> vector<1x32xf32>
    %45 = vector.extract_strided_slice %40 {offsets = [1, 0], sizes = [1, 55], strides = [1, 1]} : vector<16x55xbf16> to vector<1x55xbf16>
    %c1 = arith.constant 1 : index
    %c0_23 = arith.constant 0 : index
    %c0_24 = arith.constant 0 : index
    %46 = vector.load %arg7[%c1, %c0_23, %c0_24] : memref<16x55x32xbf16, #tpu.memory_space<vmem>>, vector<1x55x32xbf16>
    %47 = vector.shape_cast %46 : vector<1x55x32xbf16> to vector<55x32xbf16>
    %cst_25 = arith.constant dense<0.000000e+00> : vector<1x32xf32>
    %48 = tpu.matmul %45, %47, %cst_25 {dimension_numbers = #tpu.dot_dimension_numbers<[1], [0], [0], [1], [0, 0, 1, 1], [], []>} : vector<1x55xbf16>, vector<55x32xbf16>, vector<1x32xf32> -> vector<1x32xf32>
    %49 = arith.addf %44, %48 : vector<1x32xf32>
    %50 = vector.extract_strided_slice %40 {offsets = [2, 0], sizes = [1, 55], strides = [1, 1]} : vector<16x55xbf16> to vector<1x55xbf16>
    %c2 = arith.constant 2 : index
    %c0_26 = arith.constant 0 : index
    %c0_27 = arith.constant 0 : index
    %51 = vector.load %arg7[%c2, %c0_26, %c0_27] : memref<16x55x32xbf16, #tpu.memory_space<vmem>>, vector<1x55x32xbf16>
    %52 = vector.shape_cast %51 : vector<1x55x32xbf16> to vector<55x32xbf16>
    %cst_28 = arith.constant dense<0.000000e+00> : vector<1x32xf32>
    %53 = tpu.matmul %50, %52, %cst_28 {dimension_numbers = #tpu.dot_dimension_numbers<[1], [0], [0], [1], [0, 0, 1, 1], [], []>} : vector<1x55xbf16>, vector<55x32xbf16>, vector<1x32xf32> -> vector<1x32xf32>
    %54 = arith.addf %49, %53 : vector<1x32xf32>
    %55 = vector.extract_strided_slice %40 {offsets = [3, 0], sizes = [1, 55], strides = [1, 1]} : vector<16x55xbf16> to vector<1x55xbf16>
    %c3 = arith.constant 3 : index
    %c0_29 = arith.constant 0 : index
    %c0_30 = arith.constant 0 : index
    %56 = vector.load %arg7[%c3, %c0_29, %c0_30] : memref<16x55x32xbf16, #tpu.memory_space<vmem>>, vector<1x55x32xbf16>
    %57 = vector.shape_cast %56 : vector<1x55x32xbf16> to vector<55x32xbf16>
    %cst_31 = arith.constant dense<0.000000e+00> : vector<1x32xf32>
    %58 = tpu.matmul %55, %57, %cst_31 {dimension_numbers = #tpu.dot_dimension_numbers<[1], [0], [0], [1], [0, 0, 1, 1], [], []>} : vector<1x55xbf16>, vector<55x32xbf16>, vector<1x32xf32> -> vector<1x32xf32>
    %59 = arith.addf %54, %58 : vector<1x32xf32>
    %60 = vector.extract_strided_slice %40 {offsets = [4, 0], sizes = [1, 55], strides = [1, 1]} : vector<16x55xbf16> to vector<1x55xbf16>
    %c4 = arith.constant 4 : index
    %c0_32 = arith.constant 0 : index
    %c0_33 = arith.constant 0 : index
    %61 = vector.load %arg7[%c4, %c0_32, %c0_33] : memref<16x55x32xbf16, #tpu.memory_space<vmem>>, vector<1x55x32xbf16>
    %62 = vector.shape_cast %61 : vector<1x55x32xbf16> to vector<55x32xbf16>
    %cst_34 = arith.constant dense<0.000000e+00> : vector<1x32xf32>
    %63 = tpu.matmul %60, %62, %cst_34 {dimension_numbers = #tpu.dot_dimension_numbers<[1], [0], [0], [1], [0, 0, 1, 1], [], []>} : vector<1x55xbf16>, vector<55x32xbf16>, vector<1x32xf32> -> vector<1x32xf32>
    %64 = arith.addf %59, %63 : vector<1x32xf32>
    %65 = vector.extract_strided_slice %40 {offsets = [5, 0], sizes = [1, 55], strides = [1, 1]} : vector<16x55xbf16> to vector<1x55xbf16>
    %c5 = arith.constant 5 : index
    %c0_35 = arith.constant 0 : index
    %c0_36 = arith.constant 0 : index
    %66 = vector.load %arg7[%c5, %c0_35, %c0_36] : memref<16x55x32xbf16, #tpu.memory_space<vmem>>, vector<1x55x32xbf16>
    %67 = vector.shape_cast %66 : vector<1x55x32xbf16> to vector<55x32xbf16>
    %cst_37 = arith.constant dense<0.000000e+00> : vector<1x32xf32>
    %68 = tpu.matmul %65, %67, %cst_37 {dimension_numbers = #tpu.dot_dimension_numbers<[1], [0], [0], [1], [0, 0, 1, 1], [], []>} : vector<1x55xbf16>, vector<55x32xbf16>, vector<1x32xf32> -> vector<1x32xf32>
    %69 = arith.addf %64, %68 : vector<1x32xf32>
    %70 = vector.extract_strided_slice %40 {offsets = [6, 0], sizes = [1, 55], strides = [1, 1]} : vector<16x55xbf16> to vector<1x55xbf16>
    %c6 = arith.constant 6 : index
    %c0_38 = arith.constant 0 : index
    %c0_39 = arith.constant 0 : index
    %71 = vector.load %arg7[%c6, %c0_38, %c0_39] : memref<16x55x32xbf16, #tpu.memory_space<vmem>>, vector<1x55x32xbf16>
    %72 = vector.shape_cast %71 : vector<1x55x32xbf16> to vector<55x32xbf16>
    %cst_40 = arith.constant dense<0.000000e+00> : vector<1x32xf32>
    %73 = tpu.matmul %70, %72, %cst_40 {dimension_numbers = #tpu.dot_dimension_numbers<[1], [0], [0], [1], [0, 0, 1, 1], [], []>} : vector<1x55xbf16>, vector<55x32xbf16>, vector<1x32xf32> -> vector<1x32xf32>
    %74 = arith.addf %69, %73 : vector<1x32xf32>
    %75 = vector.extract_strided_slice %40 {offsets = [7, 0], sizes = [1, 55], strides = [1, 1]} : vector<16x55xbf16> to vector<1x55xbf16>
    %c7 = arith.constant 7 : index
    %c0_41 = arith.constant 0 : index
    %c0_42 = arith.constant 0 : index
    %76 = vector.load %arg7[%c7, %c0_41, %c0_42] : memref<16x55x32xbf16, #tpu.memory_space<vmem>>, vector<1x55x32xbf16>
    %77 = vector.shape_cast %76 : vector<1x55x32xbf16> to vector<55x32xbf16>
    %cst_43 = arith.constant dense<0.000000e+00> : vector<1x32xf32>
    %78 = tpu.matmul %75, %77, %cst_43 {dimension_numbers = #tpu.dot_dimension_numbers<[1], [0], [0], [1], [0, 0, 1, 1], [], []>} : vector<1x55xbf16>, vector<55x32xbf16>, vector<1x32xf32> -> vector<1x32xf32>
    %79 = arith.addf %74, %78 : vector<1x32xf32>
    %80 = vector.extract_strided_slice %40 {offsets = [8, 0], sizes = [1, 55], strides = [1, 1]} : vector<16x55xbf16> to vector<1x55xbf16>
    %c8 = arith.constant 8 : index
    %c0_44 = arith.constant 0 : index
    %c0_45 = arith.constant 0 : index
    %81 = vector.load %arg7[%c8, %c0_44, %c0_45] : memref<16x55x32xbf16, #tpu.memory_space<vmem>>, vector<1x55x32xbf16>
    %82 = vector.shape_cast %81 : vector<1x55x32xbf16> to vector<55x32xbf16>
    %cst_46 = arith.constant dense<0.000000e+00> : vector<1x32xf32>
    %83 = tpu.matmul %80, %82, %cst_46 {dimension_numbers = #tpu.dot_dimension_numbers<[1], [0], [0], [1], [0, 0, 1, 1], [], []>} : vector<1x55xbf16>, vector<55x32xbf16>, vector<1x32xf32> -> vector<1x32xf32>
    %84 = arith.addf %79, %83 : vector<1x32xf32>
    %85 = vector.extract_strided_slice %40 {offsets = [9, 0], sizes = [1, 55], strides = [1, 1]} : vector<16x55xbf16> to vector<1x55xbf16>
    %c9 = arith.constant 9 : index
    %c0_47 = arith.constant 0 : index
    %c0_48 = arith.constant 0 : index
    %86 = vector.load %arg7[%c9, %c0_47, %c0_48] : memref<16x55x32xbf16, #tpu.memory_space<vmem>>, vector<1x55x32xbf16>
    %87 = vector.shape_cast %86 : vector<1x55x32xbf16> to vector<55x32xbf16>
    %cst_49 = arith.constant dense<0.000000e+00> : vector<1x32xf32>
    %88 = tpu.matmul %85, %87, %cst_49 {dimension_numbers = #tpu.dot_dimension_numbers<[1], [0], [0], [1], [0, 0, 1, 1], [], []>} : vector<1x55xbf16>, vector<55x32xbf16>, vector<1x32xf32> -> vector<1x32xf32>
    %89 = arith.addf %84, %88 : vector<1x32xf32>
    %90 = vector.extract_strided_slice %40 {offsets = [10, 0], sizes = [1, 55], strides = [1, 1]} : vector<16x55xbf16> to vector<1x55xbf16>
    %c10 = arith.constant 10 : index
    %c0_50 = arith.constant 0 : index
    %c0_51 = arith.constant 0 : index
    %91 = vector.load %arg7[%c10, %c0_50, %c0_51] : memref<16x55x32xbf16, #tpu.memory_space<vmem>>, vector<1x55x32xbf16>
    %92 = vector.shape_cast %91 : vector<1x55x32xbf16> to vector<55x32xbf16>
    %cst_52 = arith.constant dense<0.000000e+00> : vector<1x32xf32>
    %93 = tpu.matmul %90, %92, %cst_52 {dimension_numbers = #tpu.dot_dimension_numbers<[1], [0], [0], [1], [0, 0, 1, 1], [], []>} : vector<1x55xbf16>, vector<55x32xbf16>, vector<1x32xf32> -> vector<1x32xf32>
    %94 = arith.addf %89, %93 : vector<1x32xf32>
    %95 = vector.extract_strided_slice %40 {offsets = [11, 0], sizes = [1, 55], strides = [1, 1]} : vector<16x55xbf16> to vector<1x55xbf16>
    %c11 = arith.constant 11 : index
    %c0_53 = arith.constant 0 : index
    %c0_54 = arith.constant 0 : index
    %96 = vector.load %arg7[%c11, %c0_53, %c0_54] : memref<16x55x32xbf16, #tpu.memory_space<vmem>>, vector<1x55x32xbf16>
    %97 = vector.shape_cast %96 : vector<1x55x32xbf16> to vector<55x32xbf16>
    %cst_55 = arith.constant dense<0.000000e+00> : vector<1x32xf32>
    %98 = tpu.matmul %95, %97, %cst_55 {dimension_numbers = #tpu.dot_dimension_numbers<[1], [0], [0], [1], [0, 0, 1, 1], [], []>} : vector<1x55xbf16>, vector<55x32xbf16>, vector<1x32xf32> -> vector<1x32xf32>
    %99 = arith.addf %94, %98 : vector<1x32xf32>
    %100 = vector.extract_strided_slice %40 {offsets = [12, 0], sizes = [1, 55], strides = [1, 1]} : vector<16x55xbf16> to vector<1x55xbf16>
    %c12 = arith.constant 12 : index
    %c0_56 = arith.constant 0 : index
    %c0_57 = arith.constant 0 : index
    %101 = vector.load %arg7[%c12, %c0_56, %c0_57] : memref<16x55x32xbf16, #tpu.memory_space<vmem>>, vector<1x55x32xbf16>
    %102 = vector.shape_cast %101 : vector<1x55x32xbf16> to vector<55x32xbf16>
    %cst_58 = arith.constant dense<0.000000e+00> : vector<1x32xf32>
    %103 = tpu.matmul %100, %102, %cst_58 {dimension_numbers = #tpu.dot_dimension_numbers<[1], [0], [0], [1], [0, 0, 1, 1], [], []>} : vector<1x55xbf16>, vector<55x32xbf16>, vector<1x32xf32> -> vector<1x32xf32>
    %104 = arith.addf %99, %103 : vector<1x32xf32>
    %105 = vector.extract_strided_slice %40 {offsets = [13, 0], sizes = [1, 55], strides = [1, 1]} : vector<16x55xbf16> to vector<1x55xbf16>
    %c13 = arith.constant 13 : index
    %c0_59 = arith.constant 0 : index
    %c0_60 = arith.constant 0 : index
    %106 = vector.load %arg7[%c13, %c0_59, %c0_60] : memref<16x55x32xbf16, #tpu.memory_space<vmem>>, vector<1x55x32xbf16>
    %107 = vector.shape_cast %106 : vector<1x55x32xbf16> to vector<55x32xbf16>
    %cst_61 = arith.constant dense<0.000000e+00> : vector<1x32xf32>
    %108 = tpu.matmul %105, %107, %cst_61 {dimension_numbers = #tpu.dot_dimension_numbers<[1], [0], [0], [1], [0, 0, 1, 1], [], []>} : vector<1x55xbf16>, vector<55x32xbf16>, vector<1x32xf32> -> vector<1x32xf32>
    %109 = arith.addf %104, %108 : vector<1x32xf32>
    %110 = vector.extract_strided_slice %40 {offsets = [14, 0], sizes = [1, 55], strides = [1, 1]} : vector<16x55xbf16> to vector<1x55xbf16>
    %c14 = arith.constant 14 : index
    %c0_62 = arith.constant 0 : index
    %c0_63 = arith.constant 0 : index
    %111 = vector.load %arg7[%c14, %c0_62, %c0_63] : memref<16x55x32xbf16, #tpu.memory_space<vmem>>, vector<1x55x32xbf16>
    %112 = vector.shape_cast %111 : vector<1x55x32xbf16> to vector<55x32xbf16>
    %cst_64 = arith.constant dense<0.000000e+00> : vector<1x32xf32>
    %113 = tpu.matmul %110, %112, %cst_64 {dimension_numbers = #tpu.dot_dimension_numbers<[1], [0], [0], [1], [0, 0, 1, 1], [], []>} : vector<1x55xbf16>, vector<55x32xbf16>, vector<1x32xf32> -> vector<1x32xf32>
    %114 = arith.addf %109, %113 : vector<1x32xf32>
    %115 = vector.extract_strided_slice %40 {offsets = [15, 0], sizes = [1, 55], strides = [1, 1]} : vector<16x55xbf16> to vector<1x55xbf16>
    %c15 = arith.constant 15 : index
    %c0_65 = arith.constant 0 : index
    %c0_66 = arith.constant 0 : index
    %116 = vector.load %arg7[%c15, %c0_65, %c0_66] : memref<16x55x32xbf16, #tpu.memory_space<vmem>>, vector<1x55x32xbf16>
    %117 = vector.shape_cast %116 : vector<1x55x32xbf16> to vector<55x32xbf16>
    %cst_67 = arith.constant dense<0.000000e+00> : vector<1x32xf32>
    %118 = tpu.matmul %115, %117, %cst_67 {dimension_numbers = #tpu.dot_dimension_numbers<[1], [0], [0], [1], [0, 0, 1, 1], [], []>} : vector<1x55xbf16>, vector<55x32xbf16>, vector<1x32xf32> -> vector<1x32xf32>
    %119 = arith.addf %114, %118 : vector<1x32xf32>
    %c0_68 = arith.constant 0 : index
    %c0_69 = arith.constant 0 : index
    %120 = vector.load %arg8[%c0_68, %c0_69] : memref<1x32xf32, #tpu.memory_space<vmem>>, vector<1x32xf32>
    %121 = arith.addf %119, %120 : vector<1x32xf32>
    %cst_70 = arith.constant 0.000000e+00 : f32
    %122 = vector.broadcast %cst_70 : f32 to vector<1x32xf32>
    %123 = arith.maximumf %121, %122 : vector<1x32xf32>
    %c1_71 = arith.constant 1 : index
    %c0_72 = arith.constant 0 : index
    %c0_73 = arith.constant 0 : index
    %124 = vector.load %arg0[%c1_71, %c0_72, %c0_73] : memref<2x32x64xbf16, #tpu.memory_space<vmem>>, vector<1x32x64xbf16>
    %125 = vector.shape_cast %124 : vector<1x32x64xbf16> to vector<32x64xbf16>
    %126 = vector.extract_strided_slice %125 {offsets = [0, 0], sizes = [32, 61], strides = [1, 1]} : vector<32x64xbf16> to vector<32x61xbf16>
    %127 = vector.extract_strided_slice %125 {offsets = [0, 1], sizes = [32, 61], strides = [1, 1]} : vector<32x64xbf16> to vector<32x61xbf16>
    %128 = vector.extract_strided_slice %125 {offsets = [0, 2], sizes = [32, 61], strides = [1, 1]} : vector<32x64xbf16> to vector<32x61xbf16>
    %129 = vector.extract_strided_slice %125 {offsets = [0, 3], sizes = [32, 61], strides = [1, 1]} : vector<32x64xbf16> to vector<32x61xbf16>
    %130 = tpu.concatenate %126, %127, %128, %129 in 0 : vector<32x61xbf16>, vector<32x61xbf16>, vector<32x61xbf16>, vector<32x61xbf16> -> vector<128x61xbf16>
    %c0_74 = arith.constant 0 : index
    %c0_75 = arith.constant 0 : index
    %131 = vector.load %arg1[%c0_74, %c0_75] : memref<16x128xbf16, #tpu.memory_space<vmem>>, vector<16x128xbf16>
    %cst_76 = arith.constant dense<0.000000e+00> : vector<16x61xf32>
    %132 = tpu.matmul %131, %130, %cst_76 {dimension_numbers = #tpu.dot_dimension_numbers<[1], [0], [0], [1], [0, 0, 1, 1], [], []>} : vector<16x128xbf16>, vector<128x61xbf16>, vector<16x61xf32> -> vector<16x61xf32>
    %c0_77 = arith.constant 0 : index
    %c0_78 = arith.constant 0 : index
    %133 = vector.load %arg2[%c0_77, %c0_78] : memref<16x1xf32, #tpu.memory_space<vmem>>, vector<16x1xf32>
    %134 = vector.broadcast %133 : vector<16x1xf32> to vector<16x61xf32>
    %135 = arith.addf %132, %134 : vector<16x61xf32>
    %cst_79 = arith.constant 0.000000e+00 : f32
    %136 = vector.broadcast %cst_79 : f32 to vector<16x61xf32>
    %137 = arith.maximumf %135, %136 : vector<16x61xf32>
    %138 = arith.truncf %137 : vector<16x61xf32> to vector<16x61xbf16>
    %139 = vector.extract_strided_slice %138 {offsets = [0, 0], sizes = [16, 58], strides = [1, 1]} : vector<16x61xbf16> to vector<16x58xbf16>
    %140 = vector.extract_strided_slice %138 {offsets = [0, 1], sizes = [16, 58], strides = [1, 1]} : vector<16x61xbf16> to vector<16x58xbf16>
    %141 = vector.extract_strided_slice %138 {offsets = [0, 2], sizes = [16, 58], strides = [1, 1]} : vector<16x61xbf16> to vector<16x58xbf16>
    %142 = vector.extract_strided_slice %138 {offsets = [0, 3], sizes = [16, 58], strides = [1, 1]} : vector<16x61xbf16> to vector<16x58xbf16>
    %143 = tpu.concatenate %139, %140, %141, %142 in 0 : vector<16x58xbf16>, vector<16x58xbf16>, vector<16x58xbf16>, vector<16x58xbf16> -> vector<64x58xbf16>
    %c0_80 = arith.constant 0 : index
    %c0_81 = arith.constant 0 : index
    %144 = vector.load %arg3[%c0_80, %c0_81] : memref<16x64xbf16, #tpu.memory_space<vmem>>, vector<16x64xbf16>
    %cst_82 = arith.constant dense<0.000000e+00> : vector<16x58xf32>
    %145 = tpu.matmul %144, %143, %cst_82 {dimension_numbers = #tpu.dot_dimension_numbers<[1], [0], [0], [1], [0, 0, 1, 1], [], []>} : vector<16x64xbf16>, vector<64x58xbf16>, vector<16x58xf32> -> vector<16x58xf32>
    %c0_83 = arith.constant 0 : index
    %c0_84 = arith.constant 0 : index
    %146 = vector.load %arg4[%c0_83, %c0_84] : memref<16x1xf32, #tpu.memory_space<vmem>>, vector<16x1xf32>
    %147 = vector.broadcast %146 : vector<16x1xf32> to vector<16x58xf32>
    %148 = arith.addf %145, %147 : vector<16x58xf32>
    %cst_85 = arith.constant 0.000000e+00 : f32
    %149 = vector.broadcast %cst_85 : f32 to vector<16x58xf32>
    %150 = arith.maximumf %148, %149 : vector<16x58xf32>
    %151 = arith.truncf %150 : vector<16x58xf32> to vector<16x58xbf16>
    %152 = vector.extract_strided_slice %151 {offsets = [0, 0], sizes = [16, 55], strides = [1, 1]} : vector<16x58xbf16> to vector<16x55xbf16>
    %153 = vector.extract_strided_slice %151 {offsets = [0, 1], sizes = [16, 55], strides = [1, 1]} : vector<16x58xbf16> to vector<16x55xbf16>
    %154 = vector.extract_strided_slice %151 {offsets = [0, 2], sizes = [16, 55], strides = [1, 1]} : vector<16x58xbf16> to vector<16x55xbf16>
    %155 = vector.extract_strided_slice %151 {offsets = [0, 3], sizes = [16, 55], strides = [1, 1]} : vector<16x58xbf16> to vector<16x55xbf16>
    %156 = tpu.concatenate %152, %153, %154, %155 in 0 : vector<16x55xbf16>, vector<16x55xbf16>, vector<16x55xbf16>, vector<16x55xbf16> -> vector<64x55xbf16>
    %c0_86 = arith.constant 0 : index
    %c0_87 = arith.constant 0 : index
    %157 = vector.load %arg5[%c0_86, %c0_87] : memref<16x64xbf16, #tpu.memory_space<vmem>>, vector<16x64xbf16>
    %cst_88 = arith.constant dense<0.000000e+00> : vector<16x55xf32>
    %158 = tpu.matmul %157, %156, %cst_88 {dimension_numbers = #tpu.dot_dimension_numbers<[1], [0], [0], [1], [0, 0, 1, 1], [], []>} : vector<16x64xbf16>, vector<64x55xbf16>, vector<16x55xf32> -> vector<16x55xf32>
    %c0_89 = arith.constant 0 : index
    %c0_90 = arith.constant 0 : index
    %159 = vector.load %arg6[%c0_89, %c0_90] : memref<16x1xf32, #tpu.memory_space<vmem>>, vector<16x1xf32>
    %160 = vector.broadcast %159 : vector<16x1xf32> to vector<16x55xf32>
    %161 = arith.addf %158, %160 : vector<16x55xf32>
    %cst_91 = arith.constant 0.000000e+00 : f32
    %162 = vector.broadcast %cst_91 : f32 to vector<16x55xf32>
    %163 = arith.maximumf %161, %162 : vector<16x55xf32>
    %164 = arith.truncf %163 : vector<16x55xf32> to vector<16x55xbf16>
    %165 = vector.extract_strided_slice %164 {offsets = [0, 0], sizes = [1, 55], strides = [1, 1]} : vector<16x55xbf16> to vector<1x55xbf16>
    %c0_92 = arith.constant 0 : index
    %c0_93 = arith.constant 0 : index
    %c0_94 = arith.constant 0 : index
    %166 = vector.load %arg7[%c0_92, %c0_93, %c0_94] : memref<16x55x32xbf16, #tpu.memory_space<vmem>>, vector<1x55x32xbf16>
    %167 = vector.shape_cast %166 : vector<1x55x32xbf16> to vector<55x32xbf16>
    %cst_95 = arith.constant dense<0.000000e+00> : vector<1x32xf32>
    %168 = tpu.matmul %165, %167, %cst_95 {dimension_numbers = #tpu.dot_dimension_numbers<[1], [0], [0], [1], [0, 0, 1, 1], [], []>} : vector<1x55xbf16>, vector<55x32xbf16>, vector<1x32xf32> -> vector<1x32xf32>
    %169 = vector.extract_strided_slice %164 {offsets = [1, 0], sizes = [1, 55], strides = [1, 1]} : vector<16x55xbf16> to vector<1x55xbf16>
    %c1_96 = arith.constant 1 : index
    %c0_97 = arith.constant 0 : index
    %c0_98 = arith.constant 0 : index
    %170 = vector.load %arg7[%c1_96, %c0_97, %c0_98] : memref<16x55x32xbf16, #tpu.memory_space<vmem>>, vector<1x55x32xbf16>
    %171 = vector.shape_cast %170 : vector<1x55x32xbf16> to vector<55x32xbf16>
    %cst_99 = arith.constant dense<0.000000e+00> : vector<1x32xf32>
    %172 = tpu.matmul %169, %171, %cst_99 {dimension_numbers = #tpu.dot_dimension_numbers<[1], [0], [0], [1], [0, 0, 1, 1], [], []>} : vector<1x55xbf16>, vector<55x32xbf16>, vector<1x32xf32> -> vector<1x32xf32>
    %173 = arith.addf %168, %172 : vector<1x32xf32>
    %174 = vector.extract_strided_slice %164 {offsets = [2, 0], sizes = [1, 55], strides = [1, 1]} : vector<16x55xbf16> to vector<1x55xbf16>
    %c2_100 = arith.constant 2 : index
    %c0_101 = arith.constant 0 : index
    %c0_102 = arith.constant 0 : index
    %175 = vector.load %arg7[%c2_100, %c0_101, %c0_102] : memref<16x55x32xbf16, #tpu.memory_space<vmem>>, vector<1x55x32xbf16>
    %176 = vector.shape_cast %175 : vector<1x55x32xbf16> to vector<55x32xbf16>
    %cst_103 = arith.constant dense<0.000000e+00> : vector<1x32xf32>
    %177 = tpu.matmul %174, %176, %cst_103 {dimension_numbers = #tpu.dot_dimension_numbers<[1], [0], [0], [1], [0, 0, 1, 1], [], []>} : vector<1x55xbf16>, vector<55x32xbf16>, vector<1x32xf32> -> vector<1x32xf32>
    %178 = arith.addf %173, %177 : vector<1x32xf32>
    %179 = vector.extract_strided_slice %164 {offsets = [3, 0], sizes = [1, 55], strides = [1, 1]} : vector<16x55xbf16> to vector<1x55xbf16>
    %c3_104 = arith.constant 3 : index
    %c0_105 = arith.constant 0 : index
    %c0_106 = arith.constant 0 : index
    %180 = vector.load %arg7[%c3_104, %c0_105, %c0_106] : memref<16x55x32xbf16, #tpu.memory_space<vmem>>, vector<1x55x32xbf16>
    %181 = vector.shape_cast %180 : vector<1x55x32xbf16> to vector<55x32xbf16>
    %cst_107 = arith.constant dense<0.000000e+00> : vector<1x32xf32>
    %182 = tpu.matmul %179, %181, %cst_107 {dimension_numbers = #tpu.dot_dimension_numbers<[1], [0], [0], [1], [0, 0, 1, 1], [], []>} : vector<1x55xbf16>, vector<55x32xbf16>, vector<1x32xf32> -> vector<1x32xf32>
    %183 = arith.addf %178, %182 : vector<1x32xf32>
    %184 = vector.extract_strided_slice %164 {offsets = [4, 0], sizes = [1, 55], strides = [1, 1]} : vector<16x55xbf16> to vector<1x55xbf16>
    %c4_108 = arith.constant 4 : index
    %c0_109 = arith.constant 0 : index
    %c0_110 = arith.constant 0 : index
    %185 = vector.load %arg7[%c4_108, %c0_109, %c0_110] : memref<16x55x32xbf16, #tpu.memory_space<vmem>>, vector<1x55x32xbf16>
    %186 = vector.shape_cast %185 : vector<1x55x32xbf16> to vector<55x32xbf16>
    %cst_111 = arith.constant dense<0.000000e+00> : vector<1x32xf32>
    %187 = tpu.matmul %184, %186, %cst_111 {dimension_numbers = #tpu.dot_dimension_numbers<[1], [0], [0], [1], [0, 0, 1, 1], [], []>} : vector<1x55xbf16>, vector<55x32xbf16>, vector<1x32xf32> -> vector<1x32xf32>
    %188 = arith.addf %183, %187 : vector<1x32xf32>
    %189 = vector.extract_strided_slice %164 {offsets = [5, 0], sizes = [1, 55], strides = [1, 1]} : vector<16x55xbf16> to vector<1x55xbf16>
    %c5_112 = arith.constant 5 : index
    %c0_113 = arith.constant 0 : index
    %c0_114 = arith.constant 0 : index
    %190 = vector.load %arg7[%c5_112, %c0_113, %c0_114] : memref<16x55x32xbf16, #tpu.memory_space<vmem>>, vector<1x55x32xbf16>
    %191 = vector.shape_cast %190 : vector<1x55x32xbf16> to vector<55x32xbf16>
    %cst_115 = arith.constant dense<0.000000e+00> : vector<1x32xf32>
    %192 = tpu.matmul %189, %191, %cst_115 {dimension_numbers = #tpu.dot_dimension_numbers<[1], [0], [0], [1], [0, 0, 1, 1], [], []>} : vector<1x55xbf16>, vector<55x32xbf16>, vector<1x32xf32> -> vector<1x32xf32>
    %193 = arith.addf %188, %192 : vector<1x32xf32>
    %194 = vector.extract_strided_slice %164 {offsets = [6, 0], sizes = [1, 55], strides = [1, 1]} : vector<16x55xbf16> to vector<1x55xbf16>
    %c6_116 = arith.constant 6 : index
    %c0_117 = arith.constant 0 : index
    %c0_118 = arith.constant 0 : index
    %195 = vector.load %arg7[%c6_116, %c0_117, %c0_118] : memref<16x55x32xbf16, #tpu.memory_space<vmem>>, vector<1x55x32xbf16>
    %196 = vector.shape_cast %195 : vector<1x55x32xbf16> to vector<55x32xbf16>
    %cst_119 = arith.constant dense<0.000000e+00> : vector<1x32xf32>
    %197 = tpu.matmul %194, %196, %cst_119 {dimension_numbers = #tpu.dot_dimension_numbers<[1], [0], [0], [1], [0, 0, 1, 1], [], []>} : vector<1x55xbf16>, vector<55x32xbf16>, vector<1x32xf32> -> vector<1x32xf32>
    %198 = arith.addf %193, %197 : vector<1x32xf32>
    %199 = vector.extract_strided_slice %164 {offsets = [7, 0], sizes = [1, 55], strides = [1, 1]} : vector<16x55xbf16> to vector<1x55xbf16>
    %c7_120 = arith.constant 7 : index
    %c0_121 = arith.constant 0 : index
    %c0_122 = arith.constant 0 : index
    %200 = vector.load %arg7[%c7_120, %c0_121, %c0_122] : memref<16x55x32xbf16, #tpu.memory_space<vmem>>, vector<1x55x32xbf16>
    %201 = vector.shape_cast %200 : vector<1x55x32xbf16> to vector<55x32xbf16>
    %cst_123 = arith.constant dense<0.000000e+00> : vector<1x32xf32>
    %202 = tpu.matmul %199, %201, %cst_123 {dimension_numbers = #tpu.dot_dimension_numbers<[1], [0], [0], [1], [0, 0, 1, 1], [], []>} : vector<1x55xbf16>, vector<55x32xbf16>, vector<1x32xf32> -> vector<1x32xf32>
    %203 = arith.addf %198, %202 : vector<1x32xf32>
    %204 = vector.extract_strided_slice %164 {offsets = [8, 0], sizes = [1, 55], strides = [1, 1]} : vector<16x55xbf16> to vector<1x55xbf16>
    %c8_124 = arith.constant 8 : index
    %c0_125 = arith.constant 0 : index
    %c0_126 = arith.constant 0 : index
    %205 = vector.load %arg7[%c8_124, %c0_125, %c0_126] : memref<16x55x32xbf16, #tpu.memory_space<vmem>>, vector<1x55x32xbf16>
    %206 = vector.shape_cast %205 : vector<1x55x32xbf16> to vector<55x32xbf16>
    %cst_127 = arith.constant dense<0.000000e+00> : vector<1x32xf32>
    %207 = tpu.matmul %204, %206, %cst_127 {dimension_numbers = #tpu.dot_dimension_numbers<[1], [0], [0], [1], [0, 0, 1, 1], [], []>} : vector<1x55xbf16>, vector<55x32xbf16>, vector<1x32xf32> -> vector<1x32xf32>
    %208 = arith.addf %203, %207 : vector<1x32xf32>
    %209 = vector.extract_strided_slice %164 {offsets = [9, 0], sizes = [1, 55], strides = [1, 1]} : vector<16x55xbf16> to vector<1x55xbf16>
    %c9_128 = arith.constant 9 : index
    %c0_129 = arith.constant 0 : index
    %c0_130 = arith.constant 0 : index
    %210 = vector.load %arg7[%c9_128, %c0_129, %c0_130] : memref<16x55x32xbf16, #tpu.memory_space<vmem>>, vector<1x55x32xbf16>
    %211 = vector.shape_cast %210 : vector<1x55x32xbf16> to vector<55x32xbf16>
    %cst_131 = arith.constant dense<0.000000e+00> : vector<1x32xf32>
    %212 = tpu.matmul %209, %211, %cst_131 {dimension_numbers = #tpu.dot_dimension_numbers<[1], [0], [0], [1], [0, 0, 1, 1], [], []>} : vector<1x55xbf16>, vector<55x32xbf16>, vector<1x32xf32> -> vector<1x32xf32>
    %213 = arith.addf %208, %212 : vector<1x32xf32>
    %214 = vector.extract_strided_slice %164 {offsets = [10, 0], sizes = [1, 55], strides = [1, 1]} : vector<16x55xbf16> to vector<1x55xbf16>
    %c10_132 = arith.constant 10 : index
    %c0_133 = arith.constant 0 : index
    %c0_134 = arith.constant 0 : index
    %215 = vector.load %arg7[%c10_132, %c0_133, %c0_134] : memref<16x55x32xbf16, #tpu.memory_space<vmem>>, vector<1x55x32xbf16>
    %216 = vector.shape_cast %215 : vector<1x55x32xbf16> to vector<55x32xbf16>
    %cst_135 = arith.constant dense<0.000000e+00> : vector<1x32xf32>
    %217 = tpu.matmul %214, %216, %cst_135 {dimension_numbers = #tpu.dot_dimension_numbers<[1], [0], [0], [1], [0, 0, 1, 1], [], []>} : vector<1x55xbf16>, vector<55x32xbf16>, vector<1x32xf32> -> vector<1x32xf32>
    %218 = arith.addf %213, %217 : vector<1x32xf32>
    %219 = vector.extract_strided_slice %164 {offsets = [11, 0], sizes = [1, 55], strides = [1, 1]} : vector<16x55xbf16> to vector<1x55xbf16>
    %c11_136 = arith.constant 11 : index
    %c0_137 = arith.constant 0 : index
    %c0_138 = arith.constant 0 : index
    %220 = vector.load %arg7[%c11_136, %c0_137, %c0_138] : memref<16x55x32xbf16, #tpu.memory_space<vmem>>, vector<1x55x32xbf16>
    %221 = vector.shape_cast %220 : vector<1x55x32xbf16> to vector<55x32xbf16>
    %cst_139 = arith.constant dense<0.000000e+00> : vector<1x32xf32>
    %222 = tpu.matmul %219, %221, %cst_139 {dimension_numbers = #tpu.dot_dimension_numbers<[1], [0], [0], [1], [0, 0, 1, 1], [], []>} : vector<1x55xbf16>, vector<55x32xbf16>, vector<1x32xf32> -> vector<1x32xf32>
    %223 = arith.addf %218, %222 : vector<1x32xf32>
    %224 = vector.extract_strided_slice %164 {offsets = [12, 0], sizes = [1, 55], strides = [1, 1]} : vector<16x55xbf16> to vector<1x55xbf16>
    %c12_140 = arith.constant 12 : index
    %c0_141 = arith.constant 0 : index
    %c0_142 = arith.constant 0 : index
    %225 = vector.load %arg7[%c12_140, %c0_141, %c0_142] : memref<16x55x32xbf16, #tpu.memory_space<vmem>>, vector<1x55x32xbf16>
    %226 = vector.shape_cast %225 : vector<1x55x32xbf16> to vector<55x32xbf16>
    %cst_143 = arith.constant dense<0.000000e+00> : vector<1x32xf32>
    %227 = tpu.matmul %224, %226, %cst_143 {dimension_numbers = #tpu.dot_dimension_numbers<[1], [0], [0], [1], [0, 0, 1, 1], [], []>} : vector<1x55xbf16>, vector<55x32xbf16>, vector<1x32xf32> -> vector<1x32xf32>
    %228 = arith.addf %223, %227 : vector<1x32xf32>
    %229 = vector.extract_strided_slice %164 {offsets = [13, 0], sizes = [1, 55], strides = [1, 1]} : vector<16x55xbf16> to vector<1x55xbf16>
    %c13_144 = arith.constant 13 : index
    %c0_145 = arith.constant 0 : index
    %c0_146 = arith.constant 0 : index
    %230 = vector.load %arg7[%c13_144, %c0_145, %c0_146] : memref<16x55x32xbf16, #tpu.memory_space<vmem>>, vector<1x55x32xbf16>
    %231 = vector.shape_cast %230 : vector<1x55x32xbf16> to vector<55x32xbf16>
    %cst_147 = arith.constant dense<0.000000e+00> : vector<1x32xf32>
    %232 = tpu.matmul %229, %231, %cst_147 {dimension_numbers = #tpu.dot_dimension_numbers<[1], [0], [0], [1], [0, 0, 1, 1], [], []>} : vector<1x55xbf16>, vector<55x32xbf16>, vector<1x32xf32> -> vector<1x32xf32>
    %233 = arith.addf %228, %232 : vector<1x32xf32>
    %234 = vector.extract_strided_slice %164 {offsets = [14, 0], sizes = [1, 55], strides = [1, 1]} : vector<16x55xbf16> to vector<1x55xbf16>
    %c14_148 = arith.constant 14 : index
    %c0_149 = arith.constant 0 : index
    %c0_150 = arith.constant 0 : index
    %235 = vector.load %arg7[%c14_148, %c0_149, %c0_150] : memref<16x55x32xbf16, #tpu.memory_space<vmem>>, vector<1x55x32xbf16>
    %236 = vector.shape_cast %235 : vector<1x55x32xbf16> to vector<55x32xbf16>
    %cst_151 = arith.constant dense<0.000000e+00> : vector<1x32xf32>
    %237 = tpu.matmul %234, %236, %cst_151 {dimension_numbers = #tpu.dot_dimension_numbers<[1], [0], [0], [1], [0, 0, 1, 1], [], []>} : vector<1x55xbf16>, vector<55x32xbf16>, vector<1x32xf32> -> vector<1x32xf32>
    %238 = arith.addf %233, %237 : vector<1x32xf32>
    %239 = vector.extract_strided_slice %164 {offsets = [15, 0], sizes = [1, 55], strides = [1, 1]} : vector<16x55xbf16> to vector<1x55xbf16>
    %c15_152 = arith.constant 15 : index
    %c0_153 = arith.constant 0 : index
    %c0_154 = arith.constant 0 : index
    %240 = vector.load %arg7[%c15_152, %c0_153, %c0_154] : memref<16x55x32xbf16, #tpu.memory_space<vmem>>, vector<1x55x32xbf16>
    %241 = vector.shape_cast %240 : vector<1x55x32xbf16> to vector<55x32xbf16>
    %cst_155 = arith.constant dense<0.000000e+00> : vector<1x32xf32>
    %242 = tpu.matmul %239, %241, %cst_155 {dimension_numbers = #tpu.dot_dimension_numbers<[1], [0], [0], [1], [0, 0, 1, 1], [], []>} : vector<1x55xbf16>, vector<55x32xbf16>, vector<1x32xf32> -> vector<1x32xf32>
    %243 = arith.addf %238, %242 : vector<1x32xf32>
    %c0_156 = arith.constant 0 : index
    %c0_157 = arith.constant 0 : index
    %244 = vector.load %arg8[%c0_156, %c0_157] : memref<1x32xf32, #tpu.memory_space<vmem>>, vector<1x32xf32>
    %245 = arith.addf %243, %244 : vector<1x32xf32>
    %cst_158 = arith.constant 0.000000e+00 : f32
    %246 = vector.broadcast %cst_158 : f32 to vector<1x32xf32>
    %247 = arith.maximumf %245, %246 : vector<1x32xf32>
    %248 = tpu.concatenate %123, %247 in 0 : vector<1x32xf32>, vector<1x32xf32> -> vector<2x32xf32>
    %249 = arith.truncf %248 : vector<2x32xf32> to vector<2x32xbf16>
    %c0_159 = arith.constant 0 : index
    %c0_160 = arith.constant 0 : index
    %250 = vector.load %arg9[%c0_159, %c0_160] : memref<32x2xbf16, #tpu.memory_space<vmem>>, vector<32x2xbf16>
    %cst_161 = arith.constant dense<0.000000e+00> : vector<2x2xf32>
    %251 = tpu.matmul %249, %250, %cst_161 {dimension_numbers = #tpu.dot_dimension_numbers<[1], [0], [0], [1], [0, 0, 1, 1], [], []>} : vector<2x32xbf16>, vector<32x2xbf16>, vector<2x2xf32> -> vector<2x2xf32>
    %c0_162 = arith.constant 0 : index
    %c0_163 = arith.constant 0 : index
    %252 = vector.load %arg10[%c0_162, %c0_163] : memref<1x2xf32, #tpu.memory_space<vmem>>, vector<1x2xf32>
    %253 = vector.broadcast %252 : vector<1x2xf32> to vector<2x2xf32>
    %254 = arith.addf %251, %253 : vector<2x2xf32>
    %cst_164 = arith.constant dense<0xFF800000> : vector<2xf32>
    %255 = vector.multi_reduction <maximumf>, %254, %cst_164 [1] : vector<2x2xf32> to vector<2xf32>
    %256 = vector.shape_cast %255 : vector<2xf32> to vector<2x1xf32>
    %257 = vector.broadcast %256 : vector<2x1xf32> to vector<2x2xf32>
    %258 = arith.subf %254, %257 : vector<2x2xf32>
    %259 = math.exp %258 : vector<2x2xf32>
    %cst_165 = arith.constant dense<0.000000e+00> : vector<2xf32>
    %260 = vector.multi_reduction <add>, %259, %cst_165 [1] : vector<2x2xf32> to vector<2xf32>
    %261 = vector.shape_cast %260 : vector<2xf32> to vector<2x1xf32>
    %262 = vector.broadcast %261 : vector<2x1xf32> to vector<2x2xf32>
    %263 = arith.divf %259, %262 : vector<2x2xf32>
    %c0_166 = arith.constant 0 : index
    %c0_167 = arith.constant 0 : index
    %264 = vector.load %arg11[%c0_166, %c0_167] : memref<2x2xf32, #tpu.memory_space<vmem>>, vector<2x2xf32>
    tpu.vector_store %arg11[%c0_166, %c0_167], %263 {strides = array<i32>} : memref<2x2xf32, #tpu.memory_space<vmem>>, vector<2x2xf32>,
    return
  }
}

</mosaic_0001>

<bundles_post_ra>
// kernel: gnn_forward.3
= control target key start
LH: loop header
LB: loop body
LE: loop exit
PB: predicated region body
PF: predicated region fallthrough
CT: control target
= control target key end

     0   :  { %v469_v1 = vmov 0.0   ;;  %vm470_vm0 = vmmov 0   ;;  %vm30_vm1 = vcmask 1041408   ;;  %vm31_vm2 = vcmask 519170   ;;  %s614_s1 = inlined_call_operand.vmem [shape: bf16[192,192], index: 1, kind: input, shape index: {}]   ;;  %s615_s0 = inlined_call_operand.vmem [shape: f32[2,192], index: 0, kind: input, shape index: {}]   ;;  %s616_s4 = inlined_call_operand.vmem [shape: bf16[16,48], index: 4, kind: input, shape index: {}]   ;;  %s617_s3 = inlined_call_operand.vmem [shape: f32[2,16], index: 3, kind: input, shape index: {}]   ;;  %s618_s5 = inlined_call_operand.vmem [shape: f32[1,48], index: 5, kind: input, shape index: {}]   ;;  %s619_s7 = inlined_call_operand.vmem [shape: bf16[2,48], index: 7, kind: output, shape index: {1}]   ;;  %s620_s2 = inlined_call_operand.vmem [shape: f32[1,192], index: 2, kind: input, shape index: {}]   ;;  %s621_s6 = inlined_call_operand.vmem [shape: bf16[2,192], index: 6, kind: output, shape index: {0}]  }
   0x1   :  { %v432_v0 = vld [vmem:[%s614_s1 + $0x4] ss:$8 sps:$4 sm:$0xff]   ;;  %422 = vmatprep.subr.bf16.mxu1 %v469_v1  ;;  %v434_v2 = vld [vmem:[%s614_s1] ss:$8 sps:$4 sm:$0xff]   ;;  %424 = vmatprep.mubr.msk.bf16.mxu1 %vm470_vm0, %v469_v1  ;;  %v435_v3 = vld [vmem:[%s614_s1 + $0x14] ss:$8 sps:$4 sm:$0xff]   ;;  %v244_v42 = vlaneseq }
   0x2   :  { %197 = vmatprep.subr.bf16.mxu0 %v432_v0  ;;  %v437_v4 = vld [vmem:[%s614_s1 + $0x10] ss:$8 sps:$4 sm:$0xff]   ;;  %v438_v5 = vld [vmem:[%s614_s1 + $0x24] ss:$8 sps:$4 sm:$0xff]   ;;  %v440_v6 = vld [vmem:[%s614_s1 + $0x20] ss:$8 sps:$4 sm:$0xff]  }
   0x3   :  { %198 = vmatpush1.bf16.msra.mxu0 %v434_v2  ;;  %v441_v7 = vld [vmem:[%s614_s1 + $0x34] ss:$8 sps:$4 sm:$0xff]   ;;  %v443_v8 = vld [vmem:[%s614_s1 + $0x30] ss:$8 sps:$4 sm:$0xff]   ;;  %v444_v9 = vld [vmem:[%s614_s1 + $0x44] ss:$8 sps:$4 sm:$0xff]  }
   0x4   :  { %199 = vmatprep.subr.bf16.mxu0 %v435_v3  ;;  %v446_v10 = vld [vmem:[%s614_s1 + $0x40] ss:$8 sps:$4 sm:$0xff]   ;;  %v447_v11 = vld [vmem:[%s614_s1 + $0x54] ss:$8 sps:$4 sm:$0xff]   ;;  %vm549_vm3 = vmor %vm31_vm2, %vm30_vm1  ;;  %vm193_vm4 = vcmask 523264   ;;  %vm335_vm5 = vcmask 130048  }
   0x5   :  { %v390_v12 = vld.sshfl [vmem:[%s615_s0] sm:$0x33 pattern:$0x76325410]  ;;  %33 = vst.msk [vmem:[#allocation2] sm:$0xf] %vm549_vm3, %v469_v1 }
   0x6   :  { %v44_v14 = vcombine.high %v390_v12, %v390_v12  ;;  %v468_v15 = vld [vmem:[%s616_s4] sm:$0xff]   ;;  %v449_v18 = vld [vmem:[%s614_s1 + $0x50] ss:$8 sps:$4 sm:$0xff]   ;;  %v453_v22 = vld [vmem:[%s614_s1 + $0x74] ss:$8 sps:$4 sm:$0xff]   ;;  %v47_v32 = vpack.c.bf16 %v390_v12, %v390_v12  ;;  %vm380_vm6 = vcmask 385024  }
   0x7   :  { %200 = vmatpush1.bf16.msra.mxu0 %v437_v4  ;;  %v318_v16 = vld [vmem:[%s617_s3] sm:$0x3]  ;;  %423 = vmatpush3.bf16.msra.mxu1 %v468_v15  ;;  %v450_v20 = vld [vmem:[%s614_s1 + $0x64] ss:$8 sps:$4 sm:$0xff]   ;;  %v455_v23 = vld [vmem:[%s614_s1 + $0x70] ss:$8 sps:$4 sm:$0xff]  }
   0x8   :  { %201 = vmatprep.subr.bf16.mxu0 %v438_v5  ;;  %v319_v17 = vpack.c.bf16 %v318_v16, %v318_v16  ;;  %v48_v19 = vpack.c.bf16 %v44_v14, %v44_v14  ;;  %v452_v21 = vld [vmem:[%s614_s1 + $0x60] ss:$8 sps:$4 sm:$0xff]   ;;  %v456_v24 = vld [vmem:[%s614_s1 + $0x84] ss:$8 sps:$4 sm:$0xff]   ;;  %v459_v26 = vld [vmem:[%s614_s1 + $0x94] ss:$8 sps:$4 sm:$0xff]  }
   0x9   :  { %v458_v25 = vld [vmem:[%s614_s1 + $0x80] ss:$8 sps:$4 sm:$0xff]   ;;  %v461_v27 = vld [vmem:[%s614_s1 + $0x90] ss:$8 sps:$4 sm:$0xff]   ;;  %v462_v28 = vld [vmem:[%s614_s1 + $0xa4] ss:$8 sps:$4 sm:$0xff]  }
   0xa   :  { %415 = vmatprep.mubr.msk.bf16.mxu0 %vm193_vm4, %v48_v19  ;;  %425 = vmatmul.mubr.msk.bf16.vlgmr.msra.gmra.mrb[0].mxu1 %vm335_vm5, %v319_v17  ;;  %v464_v29 = vld [vmem:[%s614_s1 + $0xa0] ss:$8 sps:$4 sm:$0xff]   ;;  %v465_v30 = vld [vmem:[%s614_s1 + $0xb4] ss:$8 sps:$4 sm:$0xff]   ;;  %v467_v31 = vld [vmem:[%s614_s1 + $0xb0] ss:$8 sps:$4 sm:$0xff]  }
   0xb   :  { %202 = vmatpush1.bf16.msra.mxu0 %v440_v6  ;;  %v417_v33 = vld [vmem:[%s618_s5] ss:$0 sm:$0xff]  ;;  %v471_v40 = vmov 1983009808   ;;  %v245_v44 = vshrl.u32 %v244_v42, 7  ;;  %vm309_vm7 = vcmask 1040384  }
   0xc   :  { %203 = vmatprep.subr.bf16.mxu0 %v441_v7  ;;  %v242_v41 = vunpack.c.l.s4 %v471_v40  ;;  %v258_v50 = vld [vmem:[%s620_s2] sm:$0x3]  ;;  %v472_v61 = vmov 1966171168   ;;  %vm310_vm8 = vcmask 517121  }
   0xd   :  { %v262_v47 = vsub.s32 0, %v245_v44  ;;  %v266_v48 = vsub.s32 1, %v245_v44  ;;  %v34_v53 = vld [vmem:[#allocation2] sm:$0xf]  ;;  %v295_v62 = vunpack.c.l.s4 %v472_v61  ;;  %vm311_vm9 = vmor %vm310_vm8, %vm309_vm7 }
   0xe   :  { %v243_v43 = vunpack.c.0.s8 %v242_v41 }
   0xf   :  { %204 = vmatpush1.bf16.msra.mxu0 %v443_v8  ;;  %v263_v56 = vrot.slane %v258_v50, %v262_v47  ;;  %v267_v57 = vrot.slane %v258_v50, %v266_v48  ;;  %v296_v1 = vunpack.c.0.s8 %v295_v62 }
  0x10   :  { %205 = vmatprep.subr.bf16.mxu0 %v444_v9  ;;  %v246_v46 = vsub.s32 %v243_v43, %v245_v44 }
  0x11   :  { %v268_v59 = vcombine.low %v263_v56, %v267_v57  ;;  %v299_v4 = vsub.s32 %v296_v1, %v245_v44 }
  0x13   :  { %206 = vmatpush1.bf16.msra.mxu0 %v446_v10  ;;  %v275_v60 = vrot.slane %v268_v59, %v246_v46 }
  0x14   :  { %207 = vmatprep.subr.bf16.mxu0 %v447_v11 }
  0x17   :  { %208 = vmatpush1.bf16.msra.mxu0 %v449_v18 }
  0x18   :  { %209 = vmatprep.subr.bf16.mxu0 %v450_v20 }
  0x1b   :  { %210 = vmatpush1.bf16.msra.mxu0 %v452_v21 }
  0x1c   :  { %211 = vmatprep.subr.bf16.mxu0 %v453_v22 }
  0x1f   :  { %212 = vmatpush1.bf16.msra.mxu0 %v455_v23 }
  0x20   :  { %213 = vmatprep.subr.bf16.mxu0 %v456_v24 }
  0x23   :  { %214 = vmatpush1.bf16.msra.mxu0 %v458_v25 }
  0x24   :  { %215 = vmatprep.subr.bf16.mxu0 %v459_v26 }
  0x27   :  { %216 = vmatpush1.bf16.msra.mxu0 %v461_v27 }
  0x28   :  { %217 = vmatprep.subr.bf16.mxu0 %v462_v28 }
  0x2b   :  { %218 = vmatpush1.bf16.msra.mxu0 %v464_v29 }
  0x2c   :  { %219 = vmatprep.subr.bf16.mxu0 %v465_v30 }
  0x2f   :  { %220 = vmatpush1.bf16.msra.mxu0 %v467_v31 }
  0x32   :  { %230 = vmatmul.mubr.bf16.vlgmr.msra.gmra.mrb[0].mxu0 %v47_v32 }
  0xdd   :  { %v373_v34 = vpop.f32.mrb[0].mxu1 }
  0xde   :  { %v374_v35 = vadd.f32 %v417_v33, %v373_v34  ;;  %v426_v36 = vpop.f32.mrb[1].mxu1 }
  0xdf   :  { %v376_v37 = vpop.f32.mrb[2].mxu1 }
  0xe0   :  { %v379_v38 = vpack.c.bf16 %v374_v35, %v374_v35  ;;  %v427_v39 = vpop.f32.mrb[3].mxu1 }
  0xe2   :  { %381 = vst.msk [vmem:[%s619_s7] sm:$0x1] %vm380_vm6, %v379_v38 }
 0x105   :  { %v231_v45 = vpop.f32.mrb[0].mxu0 }
 0x106   :  { %v233_v49 = vpop.f32.mrb[1].mxu0 }
 0x107   :  { %v240_v51 = vcombine.low %v231_v45, %v233_v49  ;;  %v235_v52 = vpop.f32.mrb[2].mxu0 }
 0x108   :  { %v236_v54 = vpop.f32.mrb[3].mxu0 }
 0x109   :  { %v247_v55 = vrot.slane %v240_v51, %v246_v46 }
 0x10b   :  { %v249_v58 = vadd.f32 %v247_v55, %v34_v53 }
 0x10d   :  { %253 = vst.msk [vmem:[#allocation2] sm:$0xf] %vm549_vm3, %v249_v58 }
 0x114   :  { %v257_v63 = vld [vmem:[#allocation2] sm:$0xf] }
 0x115   :  { %v277_v0 = vadd.f32 %v275_v60, %v257_v63 }
 0x117   :  { %v285_v2 = vrot.slane %v277_v0, %v246_v46 }
 0x119   :  { %v286_v3 = vcombine.high %v285_v2, %v285_v2 }
 0x11b   :  { %v416_v5 = vpack.c.bf16 %v286_v3, %v285_v2 }
 0x11d   :  { %v300_v6 = vrot.slane %v416_v5, %v299_v4 }
 0x11f   :  { %v307_v7 = vrot.slane %v300_v6, %v299_v4 }
 0x121   :  { %312 = vst.msk [vmem:[%s621_s6] sm:$0x3] %vm311_vm9, %v307_v7 }

// kernel: gnn_forward.4
= control target key start
LH: loop header
LB: loop body
LE: loop exit
PB: predicated region body
PF: predicated region fallthrough
CT: control target
= control target key end

     0   :  { %v3358_v0 = vmov 2   ;;  %v3359_v1 = vmov 0   ;;  %v3360_v11 = vmov 1   ;;  %vm587_vm0 = vcmask 261120   ;;  %s4533_s1 = inlined_call_operand.vmem [shape: bf16[32,3], index: 1, kind: input, shape index: {}]   ;;  %s4534_s19 = inlined_call_operand.vmem [shape: bf16[32,32], index: 19, kind: input, shape index: {}]   ;;  %s4535_s20 = inlined_call_operand.vmem [shape: f32[1,32], index: 20, kind: input, shape index: {}]   ;;  %s4536_s21 = inlined_call_operand.vmem [shape: bf16[32,32], index: 21, kind: input, shape index: {}]   ;;  %s4537_s0 = inlined_call_operand.vmem [shape: bf16[128,3], index: 0, kind: input, shape index: {}]   ;;  %s4538_s2 = inlined_call_operand.vmem [shape: bf16[128,32], index: 2, kind: input, shape index: {}]   ;;  %s4539_s9 = inlined_call_operand.vmem [shape: bf16[3,32], index: 9, kind: input, shape index: {}]   ;;  %s4540_s4 = inlined_call_operand.vmem [shape: bf16[3,32], index: 4, kind: input, shape index: {}]   ;;  %s4541_s6 = inlined_call_operand.vmem [shape: bf16[3,32], index: 6, kind: input, shape index: {}]   ;;  %s4542_s3 = inlined_call_operand.vmem [shape: bf16[32,128], index: 3, kind: input, shape index: {}]   ;;  %s4543_s7 = inlined_call_operand.vmem [shape: bf16[32,32], index: 7, kind: input, shape index: {}]   ;;  %s4544_s5 = inlined_call_operand.vmem [shape: f32[1,32], index: 5, kind: input, shape index: {}]   ;;  %s4545_s8 = inlined_call_operand.vmem [shape: f32[1,32], index: 8, kind: input, shape index: {}]   ;;  %s4546_s10 = inlined_call_operand.vmem [shape: bf16[32,32], index: 10, kind: input, shape index: {}]   ;;  %s4547_s22 = inlined_call_operand.vmem [shape: f32[1,32], index: 22, kind: input, shape index: {}]   ;;  %s4548_s23 = inlined_call_operand.vmem [shape: f32[1,32], index: 23, kind: input, shape index: {}]   ;;  %s4549_s12 = inlined_call_operand.vmem [shape: bf16[32,32], index: 12, kind: input, shape index: {}]   ;;  %s4550_s15 = inlined_call_operand.vmem [shape: bf16[32,32], index: 15, kind: input, shape index: {}]   ;;  %s4551_s13 = inlined_call_operand.vmem [shape: bf16[32,32], index: 13, kind: input, shape index: {}]   ;;  %s4552_s11 = inlined_call_operand.vmem [shape: f32[1,32], index: 11, kind: input, shape index: {}]   ;;  %s4553_s14 = inlined_call_operand.vmem [shape: f32[1,32], index: 14, kind: input, shape index: {}]   ;;  %s4554_s16 = inlined_call_operand.vmem [shape: bf16[32,32], index: 16, kind: input, shape index: {}]   ;;  %s4555_s24 = inlined_call_operand.vmem [shape: f32[1,32], index: 24, kind: input, shape index: {}]   ;;  %s4556_s25 = inlined_call_operand.vmem [shape: f32[1,32], index: 25, kind: input, shape index: {}]   ;;  %s4557_s18 = inlined_call_operand.vmem [shape: bf16[32,32], index: 18, kind: input, shape index: {}]   ;;  %s4558_s17 = inlined_call_operand.vmem [shape: f32[1,32], index: 17, kind: input, shape index: {}]   ;;  %s4559_s26 = inlined_call_operand.vmem [shape: bf16[128,32], index: 26, kind: output, shape index: {}]  }
   0x1   :  { %4565 = sst [smem:[#allocation2_spill]] %s4533_s1  ;;  %3082 = vset.pattern.permute.xlu1 %v3358_v0  ;;  %3070 = vset.pattern.permute.xlu0 %v3359_v1  ;;  %v158_v44 = vlaneseq  ;;  %vm2541_vm1 = vcmask 257024  }
   0x2   :  { %4566 = sst [smem:[#allocation3_spill]] %s4537_s0  ;;  %s4573_s21 = sld [smem:[#allocation2_spill]] }
   0x3   :  { %4567 = sst [smem:[#allocation4_spill]] %s4538_s2  ;;  %s4574_s1 = sld [smem:[#allocation3_spill]]  ;;  %v159_v45 = vshrl.u32 %v158_v44, 7 }
   0x4   :  { %4568 = sst [smem:[#allocation5_spill]] %s4539_s9  ;;  %s4575_s2 = sld [smem:[#allocation4_spill]] }
   0x5   :  { %4569 = sst [smem:[#allocation6_spill]] %s4540_s4  ;;  %s4576_s9 = sld [smem:[#allocation5_spill]]  ;;  %v3559_v47 = vsub.s32 2, %v159_v45  ;;  %v160_v49 = vsub.s32 0, %v159_v45  ;;  %v3565_v56 = vsub.s32 1, %v159_v45 }
   0x6   :  { %4570 = sst [smem:[#allocation7_spill]] %s4541_s6  ;;  %s4577_s27 = sld [smem:[#allocation6_spill]] }
   0x7   :  { %4571 = sst [smem:[#allocation8_spill]] %s4542_s3  ;;  %s4578_s6 = sld [smem:[#allocation7_spill]] }
   0x8   :  { %4572 = sst [smem:[#allocation9_spill]] %s4543_s7  ;;  %v2710_v2 = vld [vmem:[%s4573_s21] sm:$0xff]   ;;  %v2724_v3 = vld [vmem:[%s4573_s21 + $0x8] sm:$0xff]   ;;  %s4579_s3 = sld [smem:[#allocation8_spill]] }
   0x9   :  { %v2711_v4 = vunpack.c.l.bf16 %v2710_v2  ;;  %v2712_v5 = vunpack.c.h.bf16 %v2710_v2  ;;  %v2715_v6 = vunpack.c.l.bf16 %v2724_v3  ;;  %v2716_v7 = vunpack.c.h.bf16 %v2724_v3  ;;  %v2678_v10 = vld [vmem:[%s4574_s1] sm:$0xff]   ;;  %v2717_v16 = vld [vmem:[%s4574_s1 + $0x8] sm:$0xff]   ;;  %v2718_v17 = vld [vmem:[%s4574_s1 + $0x10] sm:$0xff]   ;;  %s4580_s7 = sld [smem:[#allocation9_spill]] }
   0xa   :  { %v2679_v12 = vunpack.c.l.bf16 %v2678_v10  ;;  %v2680_v13 = vunpack.c.h.bf16 %v2678_v10  ;;  %v3246_v15 = vld [vmem:[%s4575_s2] sm:$0xff]   ;;  %v2683_v18 = vunpack.c.l.bf16 %v2717_v16  ;;  %v2684_v19 = vunpack.c.h.bf16 %v2717_v16  ;;  %v2719_v24 = vld [vmem:[%s4574_s1 + $0x18] sm:$0xff]   ;;  %v2721_v32 = vld [vmem:[%s4574_s1 + $0x28] sm:$0xff]  }
   0xb   :  { %v3083_v8 = vpack.i.bf16 %v2712_v5, %v2711_v4  ;;  %v3089_v9 = vpack.i.bf16 %v2716_v7, %v2715_v6  ;;  %2819 = vmatprep.mubr.msk.bf16.mxu0 %vm587_vm0, %v3246_v15  ;;  %v2687_v21 = vunpack.c.l.bf16 %v2718_v17  ;;  %v2688_v22 = vunpack.c.h.bf16 %v2718_v17  ;;  %v2720_v27 = vld [vmem:[%s4574_s1 + $0x20] sm:$0xff]   ;;  %v2722_v36 = vld [vmem:[%s4574_s1 + $0x30] sm:$0xff]   ;;  %v2723_v39 = vld [vmem:[%s4574_s1 + $0x38] sm:$0xff]  }
   0xc   :  { %v3118_v14 = vpack.i.bf16 %v2680_v13, %v2679_v12  ;;  %v3124_v20 = vpack.i.bf16 %v2684_v19, %v2683_v18  ;;  %v2691_v25 = vunpack.c.l.bf16 %v2719_v24  ;;  %v2692_v26 = vunpack.c.h.bf16 %v2719_v24  ;;  %v132_v46 = vld [vmem:[%s4576_s9] sm:$0x3] }
   0xd   :  { %3084 = vperm.xlu1 %3082, %v3083_v8   ;;  %3072 = vperm.xlu0 %3070, %v3083_v8   ;;  %v3147_v23 = vpack.i.bf16 %v2688_v22, %v2687_v21  ;;  %v2695_v29 = vunpack.c.l.bf16 %v2720_v27  ;;  %v2696_v30 = vunpack.c.h.bf16 %v2720_v27  ;;  %v2699_v33 = vunpack.c.l.bf16 %v2721_v32  ;;  %v124_v50 = vld [vmem:[%s4577_s27] sm:$0x3] }
   0xe   :  { %v3159_v28 = vpack.i.bf16 %v2692_v26, %v2691_v25  ;;  %v2700_v34 = vunpack.c.h.bf16 %v2721_v32  ;;  %v2703_v37 = vunpack.c.l.bf16 %v2722_v36  ;;  %v2704_v38 = vunpack.c.h.bf16 %v2722_v36 }
   0xf   :  { %v3176_v31 = vpack.i.bf16 %v2696_v30, %v2695_v29  ;;  %v2707_v41 = vunpack.c.l.bf16 %v2723_v39  ;;  %v2708_v42 = vunpack.c.h.bf16 %v2723_v39  ;;  %v812_v48 = vunpack.c.l.bf16 %v132_v46 }
  0x10   :  { %v3205_v35 = vpack.i.bf16 %v2700_v34, %v2699_v33  ;;  %v3217_v40 = vpack.i.bf16 %v2704_v38, %v2703_v37  ;;  %v137_v54 = vunpack.c.l.bf16 %v124_v50 }
  0x11   :  { %3088 = vset.pattern.permute.xlu1 %v3359_v1  ;;  %3076 = vset.pattern.permute.xlu0 %v3360_v11  ;;  %v3234_v43 = vpack.i.bf16 %v2708_v42, %v2707_v41  ;;  %v836_v51 = vrot.slane %v812_v48, %v3559_v47  ;;  %v816_v52 = vrot.slane %v812_v48, %v160_v49 }
  0x12   :  { %3090 = vperm.xlu1 %3088, %v3089_v9   ;;  %3078 = vperm.xlu0 %3076, %v3083_v8   ;;  %v185_v4 = vrot.slane %v137_v54, %v3565_v56  ;;  %v824_v5 = vrot.slane %v812_v48, %v3565_v56  ;;  %v213_v7 = vrot.slane %v137_v54, %v3559_v47 }
  0x16   :  { %3094 = vset.pattern.permute.xlu1 %v3360_v11  ;;  %3100 = vset.pattern.permute.xlu0 %v3358_v0 }
  0x17   :  { %3096 = vperm.xlu1 %3094, %v3089_v9   ;;  %3102 = vperm.xlu0 %3100, %v3089_v9  }
  0x1b   :  { %3106 = vset.pattern.permute.xlu1 %v3359_v1  ;;  %3119 = vperm.xlu0 %3100, %v3118_v14  }
  0x1c   :  { %3108 = vperm.xlu1 %3106, %v3118_v14  }
  0x1f   :  { %3129 = vset.pattern.permute.xlu0 %v3360_v11 }
  0x20   :  { %3112 = vset.pattern.permute.xlu1 %v3360_v11  ;;  %3131 = vperm.xlu0 %3129, %v3124_v20  }
  0x21   :  { %3114 = vperm.xlu1 %3112, %v3118_v14  }
  0x24   :  { %3148 = vperm.xlu0 %3129, %v3147_v23  }
  0x25   :  { %3123 = vset.pattern.permute.xlu1 %v3359_v1 }
  0x26   :  { %3125 = vperm.xlu1 %3123, %v3124_v20  }
  0x28   :  { %3158 = vset.pattern.permute.xlu0 %v3359_v1 }
  0x29   :  { %3160 = vperm.xlu0 %3158, %v3159_v28  }
  0x2a   :  { %3135 = vset.pattern.permute.xlu1 %v3358_v0 }
  0x2b   :  { %3137 = vperm.xlu1 %3135, %v3124_v20  }
  0x2d   :  { %3177 = vperm.xlu0 %3158, %v3176_v31  }
  0x2f   :  { %3141 = vset.pattern.permute.xlu1 %v3359_v1 }
  0x30   :  { %3143 = vperm.xlu1 %3141, %v3147_v23  }
  0x31   :  { %3187 = vset.pattern.permute.xlu0 %v3358_v0 }
  0x32   :  { %3189 = vperm.xlu0 %3187, %v3176_v31  }
  0x34   :  { %3152 = vset.pattern.permute.xlu1 %v3358_v0 }
  0x35   :  { %3154 = vperm.xlu1 %3152, %v3147_v23  }
  0x36   :  { %3206 = vperm.xlu0 %3187, %v3205_v35  }
  0x39   :  { %3164 = vset.pattern.permute.xlu1 %v3360_v11 }
  0x3a   :  { %3166 = vperm.xlu1 %3164, %v3159_v28   ;;  %3216 = vset.pattern.permute.xlu0 %v3360_v11 }
  0x3b   :  { %3218 = vperm.xlu0 %3216, %v3217_v40  }
  0x3e   :  { %3170 = vset.pattern.permute.xlu1 %v3358_v0 }
  0x3f   :  { %3172 = vperm.xlu1 %3170, %v3159_v28   ;;  %3235 = vperm.xlu0 %3216, %v3234_v43  }
  0x43   :  { %3181 = vset.pattern.permute.xlu1 %v3360_v11  ;;  %3245 = vset.pattern.permute.xlu0 %v3358_v0 }
  0x44   :  { %3183 = vperm.xlu1 %3181, %v3176_v31  }
  0x48   :  { %3193 = vset.pattern.permute.xlu1 %v3359_v1 }
  0x49   :  { %3195 = vperm.xlu1 %3193, %v3205_v35  }
  0x4d   :  { %3199 = vset.pattern.permute.xlu1 %v3360_v11 }
  0x4e   :  { %3201 = vperm.xlu1 %3199, %v3205_v35  }
  0x52   :  { %3210 = vset.pattern.permute.xlu1 %v3359_v1 }
  0x53   :  { %3212 = vperm.xlu1 %3210, %v3217_v40  }
  0x57   :  { %3222 = vset.pattern.permute.xlu1 %v3358_v0 }
  0x58   :  { %3224 = vperm.xlu1 %3222, %v3217_v40  }
  0x5c   :  { %3228 = vset.pattern.permute.xlu1 %v3359_v1  ;;  %v161_v1 = vrot.slane %v137_v54, %v160_v49 }
  0x5d   :  { %3230 = vperm.xlu1 %3228, %v3234_v43  }
  0x61   :  { %3239 = vset.pattern.permute.xlu1 %v3358_v0  ;;  %v126_v0 = vld [vmem:[%s4578_s6] sm:$0x3] }
  0x62   :  { %3241 = vperm.xlu1 %3239, %v3234_v43   ;;  %v238_v12 = vunpack.c.l.bf16 %v126_v0 }
  0x64   :  { %v3575_v46 = vrot.slane %v238_v12, %v160_v49 }
  0x8c   :  { %v3085_v53 = vpop.permute.xlu1 %3084  ;;  %v3073_v55 = vpop.permute.xlu0 %3072 }
  0x8d   :  { %v3087_v57 = vunpack.i.h.bf16 %v3085_v53  ;;  %v3086_v58 = vunpack.i.l.bf16 %v3085_v53  ;;  %v3075_v59 = vunpack.i.h.bf16 %v3073_v55  ;;  %v3074_v60 = vunpack.i.l.bf16 %v3073_v55 }
  0x8f   :  { %v3567_v61 = vmul.f32 %v3087_v57, %v836_v51  ;;  %v837_v62 = vmul.f32 %v3086_v58, %v836_v51  ;;  %v818_v63 = vmul.f32 %v3075_v59, %v816_v52  ;;  %v817_v2 = vmul.f32 %v3074_v60, %v816_v52 }
  0x90   :  { %v163_v13 = vmul.f32 %v3075_v59, %v161_v1  ;;  %v162_v14 = vmul.f32 %v3074_v60, %v161_v1  ;;  %v214_v25 = vmul.f32 %v3086_v58, %v213_v7  ;;  %v215_v26 = vmul.f32 %v3087_v57, %v213_v7 }
  0x91   :  { %v3091_v3 = vpop.permute.xlu1 %3090  ;;  %v3079_v6 = vpop.permute.xlu0 %3078  ;;  %v3578_v58 = vrot.slane %v238_v12, %v3559_v47  ;;  %v3581_v59 = vrot.slane %v238_v12, %v3565_v56  ;;  %v3248_v12 = vld [vmem:[%s4575_s2 + $0x10] sm:$0xff]  }
  0x92   :  { %v3093_v8 = vunpack.i.h.bf16 %v3091_v3  ;;  %v3092_v9 = vunpack.i.l.bf16 %v3091_v3  ;;  %v3081_v10 = vunpack.i.h.bf16 %v3079_v6  ;;  %v3080_v11 = vunpack.i.l.bf16 %v3079_v6 }
  0x94   :  { %v820_v15 = vmul.f32 %v3093_v8, %v816_v52  ;;  %v819_v16 = vmul.f32 %v3092_v9, %v816_v52  ;;  %v187_v17 = vmul.f32 %v3081_v10, %v185_v4  ;;  %v826_v18 = vmul.f32 %v3081_v10, %v824_v5 }
  0x95   :  { %v186_v19 = vmul.f32 %v3080_v11, %v185_v4  ;;  %v825_v20 = vmul.f32 %v3080_v11, %v824_v5  ;;  %v165_v21 = vmul.f32 %v3093_v8, %v161_v1  ;;  %v164_v22 = vmul.f32 %v3092_v9, %v161_v1  ;;  %v3247_v9 = vld [vmem:[%s4575_s2 + $0x8] sm:$0xff]  }
  0x96   :  { %v3097_v23 = vpop.permute.xlu1 %3096  ;;  %v3103_v24 = vpop.permute.xlu0 %3102  ;;  %v191_v32 = vadd.f32 %v187_v17, %v163_v13  ;;  %v830_v34 = vadd.f32 %v826_v18, %v818_v63  ;;  %v3249_v17 = vld [vmem:[%s4575_s2 + $0x18] sm:$0xff]   ;;  %v3250_v18 = vld [vmem:[%s4575_s2 + $0x20] sm:$0xff]  }
  0x97   :  { %v3099_v27 = vunpack.i.h.bf16 %v3097_v23  ;;  %v3098_v28 = vunpack.i.l.bf16 %v3097_v23  ;;  %v3105_v29 = vunpack.i.h.bf16 %v3103_v24  ;;  %v3104_v30 = vunpack.i.l.bf16 %v3103_v24 }
  0x98   :  { %v190_v31 = vadd.f32 %v186_v19, %v162_v14  ;;  %v829_v33 = vadd.f32 %v825_v20, %v817_v2  ;;  %v219_v50 = vadd.f32 %v215_v26, %v191_v32  ;;  %v3586_v1 = vadd.f32 %v3567_v61, %v830_v34  ;;  %v3251_v19 = vld [vmem:[%s4575_s2 + $0x28] sm:$0xff]   ;;  %v3252_v20 = vld [vmem:[%s4575_s2 + $0x30] sm:$0xff]  }
  0x99   :  { %v189_v35 = vmul.f32 %v3099_v27, %v185_v4  ;;  %v828_v36 = vmul.f32 %v3099_v27, %v824_v5  ;;  %v188_v37 = vmul.f32 %v3098_v28, %v185_v4  ;;  %v827_v38 = vmul.f32 %v3098_v28, %v824_v5 }
  0x9a   :  { %v217_v39 = vmul.f32 %v3105_v29, %v213_v7  ;;  %v840_v40 = vmul.f32 %v3105_v29, %v836_v51  ;;  %v216_v41 = vmul.f32 %v3104_v30, %v213_v7  ;;  %v839_v42 = vmul.f32 %v3104_v30, %v836_v51  ;;  %v3120_v53 = vpop.permute.xlu0 %3119 }
  0x9b   :  { %v192_v43 = vadd.f32 %v188_v37, %v164_v22  ;;  %v193_v44 = vadd.f32 %v189_v35, %v165_v21  ;;  %v3109_v45 = vpop.permute.xlu1 %3108  ;;  %v218_v48 = vadd.f32 %v214_v25, %v190_v31  ;;  %v831_v51 = vadd.f32 %v827_v38, %v819_v16  ;;  %v3253_v21 = vld [vmem:[%s4575_s2 + $0x38] sm:$0xff]  }
  0x9c   :  { %v3111_v52 = vunpack.i.h.bf16 %v3109_v45  ;;  %v3110_v54 = vunpack.i.l.bf16 %v3109_v45  ;;  %v3583_v0 = vadd.f32 %v837_v62, %v829_v33  ;;  %v832_v49 = vadd.f32 %v828_v36, %v820_v15 }
  0x9d   :  { %v220_v55 = vadd.f32 %v216_v41, %v192_v43  ;;  %v221_v57 = vadd.f32 %v217_v39, %v193_v44  ;;  %v539_v60 = vpack.c.bf16 %v219_v50, %v218_v48  ;;  %v3122_v2 = vunpack.i.h.bf16 %v3120_v53 }
  0x9e   :  { %v3121_v3 = vunpack.i.l.bf16 %v3120_v53  ;;  %v324_v4 = vmul.f32 %v3111_v52, %v3575_v46  ;;  %v3589_v47 = vadd.f32 %v839_v42, %v831_v51  ;;  %v323_v56 = vmul.f32 %v3110_v54, %v3575_v46 }
  0x9f   :  { %v540_v63 = vpack.c.bf16 %v221_v57, %v220_v55  ;;  %2815 = vmatprep.subr.bf16.mxu0 %v539_v60  ;;  %v3592_v8 = vadd.f32 %v840_v40, %v832_v49  ;;  %v508_v10 = vmul.f32 %v3122_v2, %v3578_v58  ;;  %v3132_v23 = vpop.permute.xlu0 %3131 }
  0xa0   :  { %v3115_v5 = vpop.permute.xlu1 %3114  ;;  %2816 = vmatpush3.bf16.msra.mxu0 %v539_v60  ;;  %v507_v11 = vmul.f32 %v3121_v3, %v3578_v58  ;;  %v3134_v26 = vunpack.i.h.bf16 %v3132_v23  ;;  %v3133_v27 = vunpack.i.l.bf16 %v3132_v23 }
  0xa1   :  { %v3117_v6 = vunpack.i.h.bf16 %v3115_v5  ;;  %v3116_v7 = vunpack.i.l.bf16 %v3115_v5  ;;  %2817 = vmatprep.subr.bf16.mxu0 %v540_v63 }
  0xa2   :  { %v410_v30 = vmul.f32 %v3134_v26, %v3581_v59  ;;  %v409_v31 = vmul.f32 %v3133_v27, %v3581_v59 }
  0xa3   :  { %v408_v62 = vmul.f32 %v3117_v6, %v3581_v59  ;;  %v407_v61 = vmul.f32 %v3116_v7, %v3581_v59  ;;  %v3149_v32 = vpop.permute.xlu0 %3148 }
  0xa4   :  { %2818 = vmatpush3.bf16.msra.mxu0 %v540_v63  ;;  %v3151_v37 = vunpack.i.h.bf16 %v3149_v32  ;;  %v3150_v38 = vunpack.i.l.bf16 %v3149_v32 }
  0xa5   :  { %v423_v13 = vadd.f32 %v407_v61, %v323_v56  ;;  %v424_v14 = vadd.f32 %v408_v62, %v324_v4  ;;  %v3126_v22 = vpop.permute.xlu1 %3125 }
  0xa6   :  { %v3128_v24 = vunpack.i.h.bf16 %v3126_v22  ;;  %v3127_v25 = vunpack.i.l.bf16 %v3126_v22  ;;  %v412_v44 = vmul.f32 %v3151_v37, %v3581_v59  ;;  %v411_v45 = vmul.f32 %v3150_v38, %v3581_v59 }
  0xa7   :  { %v3604_v15 = vadd.f32 %v507_v11, %v423_v13  ;;  %v3606_v16 = vadd.f32 %v508_v10, %v424_v14  ;;  %2820 = vmatmul.mubr.msk.bf16.vlgmr.msra.gmra.mrb[0].mxu0 %vm587_vm0, %v3247_v9 }
  0xa8   :  { %2823 = vmatprep.mubr.msk.bf16.mxu0 %vm587_vm0, %v3248_v12  ;;  %v326_v28 = vmul.f32 %v3128_v24, %v3575_v46  ;;  %v325_v29 = vmul.f32 %v3127_v25, %v3575_v46  ;;  %v3161_v52 = vpop.permute.xlu0 %3160 }
  0xa9   :  { %v3163_v57 = vunpack.i.h.bf16 %v3161_v52  ;;  %v3162_v60 = vunpack.i.l.bf16 %v3161_v52 }
  0xaa   :  { %v425_v33 = vadd.f32 %v409_v31, %v325_v29  ;;  %v426_v34 = vadd.f32 %v410_v30, %v326_v28  ;;  %v3138_v35 = vpop.permute.xlu1 %3137 }
  0xab   :  { %v3139_v36 = vunpack.i.l.bf16 %v3138_v35  ;;  %v330_v2 = vmul.f32 %v3163_v57, %v3575_v46  ;;  %v329_v3 = vmul.f32 %v3162_v60, %v3575_v46  ;;  %v3140_v4 = vunpack.i.h.bf16 %v3138_v35 }
  0xac   :  { %v3178_v9 = vpop.permute.xlu0 %3177 }
  0xad   :  { %v509_v39 = vmul.f32 %v3139_v36, %v3578_v58  ;;  %v510_v61 = vmul.f32 %v3140_v4, %v3578_v58  ;;  %v3180_v10 = vunpack.i.h.bf16 %v3178_v9  ;;  %v3179_v11 = vunpack.i.l.bf16 %v3178_v9 }
  0xaf   :  { %2824 = vmatmul.mubr.msk.bf16.gmra.mrb[4].mxu0 %vm587_vm0, %v3249_v17  ;;  %v3144_v40 = vpop.permute.xlu1 %3143  ;;  %v3635_v41 = vadd.f32 %v509_v39, %v425_v33  ;;  %v3646_v13 = vadd.f32 %v510_v61, %v426_v34 }
  0xb0   :  { %2827 = vmatprep.mubr.msk.bf16.mxu0 %vm587_vm0, %v3250_v18  ;;  %v3146_v42 = vunpack.i.h.bf16 %v3144_v40  ;;  %v3145_v43 = vunpack.i.l.bf16 %v3144_v40  ;;  %v332_v18 = vmul.f32 %v3180_v10, %v3575_v46 }
  0xb1   :  { %v3190_v34 = vpop.permute.xlu0 %3189 }
  0xb2   :  { %v328_v48 = vmul.f32 %v3146_v42, %v3575_v46  ;;  %v327_v50 = vmul.f32 %v3145_v43, %v3575_v46  ;;  %v3192_v38 = vunpack.i.h.bf16 %v3190_v34  ;;  %v3191_v39 = vunpack.i.l.bf16 %v3190_v34 }
  0xb4   :  { %v427_v53 = vadd.f32 %v411_v45, %v327_v50  ;;  %v428_v54 = vadd.f32 %v412_v44, %v328_v48  ;;  %v3155_v55 = vpop.permute.xlu1 %3154  ;;  %v516_v43 = vmul.f32 %v3192_v38, %v3578_v58  ;;  %v515_v44 = vmul.f32 %v3191_v39, %v3578_v58 }
  0xb7   :  { %2828 = vmatmul.mubr.msk.bf16.gmra.mrb[8].mxu0 %vm587_vm0, %v3251_v19  ;;  %v331_v19 = vmul.f32 %v3179_v11, %v3575_v46 }
  0xb8   :  { %2831 = vmatprep.mubr.msk.bf16.mxu0 %vm587_vm0, %v3252_v20  ;;  %v3157_v20 = vunpack.i.h.bf16 %v3155_v55 }
  0xb9   :  { %v3167_v51 = vpop.permute.xlu1 %3166 }
  0xba   :  { %v3169_v63 = vunpack.i.h.bf16 %v3167_v51  ;;  %v3168_v49 = vunpack.i.l.bf16 %v3167_v51  ;;  %v512_v26 = vmul.f32 %v3157_v20, %v3578_v58 }
  0xbc   :  { %v414_v5 = vmul.f32 %v3169_v63, %v3581_v59  ;;  %v413_v56 = vmul.f32 %v3168_v49, %v3581_v59  ;;  %v3656_v29 = vadd.f32 %v512_v26, %v428_v54  ;;  %v3207_v54 = vpop.permute.xlu0 %3206 }
  0xbd   :  { %v3209_v63 = vunpack.i.h.bf16 %v3207_v54  ;;  %v3208_v49 = vunpack.i.l.bf16 %v3207_v54 }
  0xbe   :  { %v429_v6 = vadd.f32 %v413_v56, %v329_v3  ;;  %v430_v7 = vadd.f32 %v414_v5, %v330_v2  ;;  %v3173_v62 = vpop.permute.xlu1 %3172 }
  0xbf   :  { %2832 = vmatmul.mubr.msk.bf16.gmra.mrb[12].mxu0 %vm587_vm0, %v3253_v21  ;;  %v3156_v21 = vunpack.i.l.bf16 %v3155_v55  ;;  %v3175_v30 = vunpack.i.h.bf16 %v3173_v62  ;;  %v3174_v31 = vunpack.i.l.bf16 %v3173_v62  ;;  %v518_v4 = vmul.f32 %v3209_v63, %v3578_v58 }
  0xc0   :  { %v517_v5 = vmul.f32 %v3208_v49, %v3578_v58  ;;  %v3219_v9 = vpop.permute.xlu0 %3218 }
  0xc1   :  { %v511_v27 = vmul.f32 %v3156_v21, %v3578_v58  ;;  %v514_v32 = vmul.f32 %v3175_v30, %v3578_v58  ;;  %v513_v33 = vmul.f32 %v3174_v31, %v3578_v58  ;;  %v3221_v11 = vunpack.i.h.bf16 %v3219_v9 }
  0xc3   :  { %v3184_v12 = vpop.permute.xlu1 %3183  ;;  %v3654_v28 = vadd.f32 %v511_v27, %v427_v53  ;;  %v3660_v35 = vadd.f32 %v513_v33, %v429_v6  ;;  %v3662_v36 = vadd.f32 %v514_v32, %v430_v7 }
  0xc4   :  { %v3186_v14 = vunpack.i.h.bf16 %v3184_v12  ;;  %v3185_v17 = vunpack.i.l.bf16 %v3184_v12  ;;  %v3220_v12 = vunpack.i.l.bf16 %v3219_v9  ;;  %v3236_v27 = vpop.permute.xlu0 %3235 }
  0xc5   :  { %v3237_v31 = vunpack.i.l.bf16 %v3236_v27  ;;  %v3238_v39 = vunpack.i.h.bf16 %v3236_v27 }
  0xc6   :  { %v416_v22 = vmul.f32 %v3186_v14, %v3581_v59  ;;  %v415_v23 = vmul.f32 %v3185_v17, %v3581_v59 }
  0xc8   :  { %v431_v24 = vadd.f32 %v415_v23, %v331_v19  ;;  %v432_v25 = vadd.f32 %v416_v22, %v332_v18  ;;  %v3196_v37 = vpop.permute.xlu1 %3195  ;;  %v420_v18 = vmul.f32 %v3221_v11, %v3581_v59  ;;  %v419_v19 = vmul.f32 %v3220_v12, %v3581_v59 }
  0xc9   :  { %v3198_v40 = vunpack.i.h.bf16 %v3196_v37  ;;  %v3197_v42 = vunpack.i.l.bf16 %v3196_v37 }
  0xca   :  { %v3668_v55 = vadd.f32 %v515_v44, %v431_v24  ;;  %v3670_v57 = vadd.f32 %v516_v43, %v432_v25  ;;  %v422_v44 = vmul.f32 %v3238_v39, %v3581_v59 }
  0xcb   :  { %v334_v48 = vmul.f32 %v3198_v40, %v3575_v46  ;;  %v333_v50 = vmul.f32 %v3197_v42, %v3575_v46  ;;  %v421_v40 = vmul.f32 %v3237_v31, %v3581_v59 }
  0xcd   :  { %v3202_v45 = vpop.permute.xlu1 %3201 }
  0xce   :  { %v3204_v52 = vunpack.i.h.bf16 %v3202_v45  ;;  %v3203_v53 = vunpack.i.l.bf16 %v3202_v45 }
  0xd0   :  { %v418_v60 = vmul.f32 %v3204_v52, %v3581_v59  ;;  %v417_v51 = vmul.f32 %v3203_v53, %v3581_v59 }
  0xd2   :  { %v433_v2 = vadd.f32 %v417_v51, %v333_v50  ;;  %v434_v3 = vadd.f32 %v418_v60, %v334_v48  ;;  %v3213_v56 = vpop.permute.xlu1 %3212  ;;  %v3254_v51 = vld [vmem:[%s4579_s3] sm:$0xff]  }
  0xd3   :  { %v3215_v62 = vunpack.i.h.bf16 %v3213_v56  ;;  %v3214_v61 = vunpack.i.l.bf16 %v3213_v56  ;;  %2851 = vmatprep.mubr.bf16.mxu0 %v3254_v51  ;;  %2927 = vmatprep.mubr.bf16.mxu1 %v3254_v51 }
  0xd4   :  { %v3676_v6 = vadd.f32 %v517_v5, %v433_v2  ;;  %v3678_v7 = vadd.f32 %v518_v4, %v434_v3 }
  0xd5   :  { %v336_v14 = vmul.f32 %v3215_v62, %v3575_v46  ;;  %v335_v17 = vmul.f32 %v3214_v61, %v3575_v46 }
  0xd7   :  { %v3225_v10 = vpop.permute.xlu1 %3224  ;;  %v435_v23 = vadd.f32 %v419_v19, %v335_v17  ;;  %v436_v24 = vadd.f32 %v420_v18, %v336_v14 }
  0xd8   :  { %v3227_v20 = vunpack.i.h.bf16 %v3225_v10  ;;  %v3226_v21 = vunpack.i.l.bf16 %v3225_v10 }
  0xda   :  { %v520_v25 = vmul.f32 %v3227_v20, %v3578_v58  ;;  %v519_v26 = vmul.f32 %v3226_v21, %v3578_v58 }
  0xdc   :  { %v3231_v22 = vpop.permute.xlu1 %3230  ;;  %v3686_v32 = vadd.f32 %v519_v26, %v435_v23  ;;  %v3688_v33 = vadd.f32 %v520_v25, %v436_v24 }
  0xdd   :  { %v3232_v30 = vunpack.i.l.bf16 %v3231_v22  ;;  %v3233_v34 = vunpack.i.h.bf16 %v3231_v22 }
  0xdf   :  { %v337_v38 = vmul.f32 %v3232_v30, %v3575_v46  ;;  %v338_v43 = vmul.f32 %v3233_v34, %v3575_v46  ;;  %v3706_v46 = vld [vmem:[%s4544_s5] ss:$0 sm:$0xff] }
  0xe1   :  { %v3242_v37 = vpop.permute.xlu1 %3241  ;;  %v437_v45 = vadd.f32 %v421_v40, %v337_v38  ;;  %v438_v52 = vadd.f32 %v422_v44, %v338_v43 }
  0xe2   :  { %v3243_v42 = vunpack.i.l.bf16 %v3242_v37  ;;  %v3244_v48 = vunpack.i.h.bf16 %v3242_v37 }
  0xe4   :  { %v521_v50 = vmul.f32 %v3243_v42, %v3578_v58  ;;  %v522_v53 = vmul.f32 %v3244_v48, %v3578_v58 }
  0xe6   :  { %v3696_v54 = vadd.f32 %v521_v50, %v437_v45  ;;  %v3698_v60 = vadd.f32 %v522_v53, %v438_v52 }
 0x17a   :  { %v2821_v59 = vpop.f32.mrb[0].mxu0 }
 0x17b   :  { %v655_v63 = vadd.f32 %v2821_v59, %v3706_v46  ;;  %v646_v49 = vpop.f32.mrb[1].mxu0 }
 0x17c   :  { %v647_v58 = vadd.f32 %v3706_v46, %v646_v49  ;;  %v2822_v2 = vpop.f32.mrb[2].mxu0 }
 0x17d   :  { %v711_v3 = vadd.f32 %v655_v63, %v3635_v41  ;;  %v658_v4 = vadd.f32 %v2822_v2, %v3706_v46  ;;  %v649_v5 = vpop.f32.mrb[3].mxu0 }
 0x17e   :  { %v709_v56 = vadd.f32 %v647_v58, %v3604_v15  ;;  %v650_v62 = vadd.f32 %v3706_v46, %v649_v5 }
 0x17f   :  { %v712_v61 = vadd.f32 %v658_v4, %v3646_v13  ;;  %v3723_v18 = vmax.f32 %v711_v3, 0.0 }
 0x180   :  { %v710_v9 = vadd.f32 %v650_v62, %v3606_v16  ;;  %v3716_v10 = vmax.f32 %v709_v56, 0.0 }
 0x181   :  { %v3718_v11 = vmax.f32 %v712_v61, 0.0 }
 0x182   :  { %v3720_v12 = vmax.f32 %v710_v9, 0.0  ;;  %v2825_v14 = vpop.f32.mrb[4].mxu0 }
 0x183   :  { %v671_v41 = vadd.f32 %v2825_v14, %v3706_v46  ;;  %v662_v17 = vpop.f32.mrb[5].mxu0  ;;  %v742_v24 = vpack.c.bf16 %v3718_v11, %v3723_v18 }
 0x184   :  { %v663_v15 = vadd.f32 %v3706_v46, %v662_v17  ;;  %v2826_v19 = vpop.f32.mrb[6].mxu0  ;;  %v741_v13 = vpack.c.bf16 %v3720_v12, %v3716_v10  ;;  %v3257_v17 = vld [vmem:[%s4580_s7 + $0x8] sm:$0xff]  }
 0x185   :  { %v715_v16 = vadd.f32 %v671_v41, %v3660_v35  ;;  %v674_v20 = vadd.f32 %v2826_v19, %v3706_v46  ;;  %v665_v21 = vpop.f32.mrb[7].mxu0  ;;  %v3794_v41 = vld [vmem:[%s4579_s3 + $0x8] sm:$0xff]  }
 0x186   :  { %v713_v22 = vadd.f32 %v663_v15, %v3654_v28  ;;  %v666_v23 = vadd.f32 %v3706_v46, %v665_v21  ;;  %2835 = vmatprep.subr.bf16.mxu0 %v741_v13 }
 0x187   :  { %v716_v25 = vadd.f32 %v674_v20, %v3662_v36  ;;  %2836 = vmatpush3.bf16.msra.mxu0 %v741_v13  ;;  %v3743_v37 = vmax.f32 %v715_v16, 0.0 }
 0x188   :  { %v714_v26 = vadd.f32 %v666_v23, %v3656_v29  ;;  %2837 = vmatprep.subr.bf16.mxu0 %v742_v24  ;;  %v3736_v27 = vmax.f32 %v713_v22, 0.0  ;;  %v2581_v22 = vld [vmem:[%s4545_s8] ss:$0 sm:$0xff] }
 0x189   :  { %v3738_v35 = vmax.f32 %v716_v25, 0.0 }
 0x18a   :  { %v3740_v30 = vmax.f32 %v714_v26, 0.0  ;;  %v2829_v31 = vpop.f32.mrb[8].mxu0 }
 0x18b   :  { %v687_v28 = vadd.f32 %v2829_v31, %v3706_v46  ;;  %v678_v34 = vpop.f32.mrb[9].mxu0  ;;  %2838 = vmatpush3.bf16.msra.mxu0 %v742_v24  ;;  %v744_v45 = vpack.c.bf16 %v3738_v35, %v3743_v37 }
 0x18c   :  { %v679_v38 = vadd.f32 %v3706_v46, %v678_v34  ;;  %v2830_v36 = vpop.f32.mrb[10].mxu0  ;;  %v743_v29 = vpack.c.bf16 %v3740_v30, %v3736_v27 }
 0x18d   :  { %v719_v39 = vadd.f32 %v687_v28, %v3676_v6  ;;  %v690_v40 = vadd.f32 %v2830_v36, %v3706_v46  ;;  %v681_v42 = vpop.f32.mrb[11].mxu0 }
 0x18e   :  { %v717_v43 = vadd.f32 %v679_v38, %v3668_v55  ;;  %v682_v44 = vadd.f32 %v3706_v46, %v681_v42  ;;  %2839 = vmatprep.subr.bf16.mxu0 %v743_v29 }
 0x18f   :  { %v720_v48 = vadd.f32 %v690_v40, %v3678_v7  ;;  %2840 = vmatpush3.bf16.msra.mxu0 %v743_v29  ;;  %v3763_v63 = vmax.f32 %v719_v39, 0.0 }
 0x190   :  { %v718_v50 = vadd.f32 %v682_v44, %v3670_v57  ;;  %2841 = vmatprep.subr.bf16.mxu0 %v744_v45  ;;  %v3756_v52 = vmax.f32 %v717_v43, 0.0 }
 0x191   :  { %v3758_v6 = vmax.f32 %v720_v48, 0.0 }
 0x192   :  { %v3760_v53 = vmax.f32 %v718_v50, 0.0  ;;  %v2833_v51 = vpop.f32.mrb[12].mxu0 }
 0x193   :  { %v703_v55 = vadd.f32 %v2833_v51, %v3706_v46  ;;  %v694_v59 = vpop.f32.mrb[13].mxu0  ;;  %2842 = vmatpush3.bf16.msra.mxu0 %v744_v45  ;;  %v746_v56 = vpack.c.bf16 %v3758_v6, %v3763_v63 }
 0x194   :  { %v695_v49 = vadd.f32 %v3706_v46, %v694_v59  ;;  %v2834_v7 = vpop.f32.mrb[14].mxu0  ;;  %v745_v57 = vpack.c.bf16 %v3760_v53, %v3756_v52 }
 0x195   :  { %v723_v58 = vadd.f32 %v703_v55, %v3696_v54  ;;  %v706_v2 = vadd.f32 %v2834_v7, %v3706_v46  ;;  %v697_v3 = vpop.f32.mrb[15].mxu0 }
 0x196   :  { %v721_v4 = vadd.f32 %v695_v49, %v3686_v32  ;;  %v698_v5 = vadd.f32 %v3706_v46, %v697_v3  ;;  %2843 = vmatprep.subr.bf16.mxu0 %v745_v57 }
 0x197   :  { %v724_v62 = vadd.f32 %v706_v2, %v3698_v60  ;;  %2844 = vmatpush3.bf16.msra.mxu0 %v745_v57  ;;  %v3782_v32 = vmax.f32 %v723_v58, 0.0 }
 0x198   :  { %v722_v61 = vadd.f32 %v698_v5, %v3688_v33  ;;  %2845 = vmatprep.subr.bf16.mxu0 %v746_v56  ;;  %v3776_v9 = vmax.f32 %v721_v4, 0.0  ;;  %v3256_v33 = vld [vmem:[%s4580_s7] sm:$0xff]  }
 0x199   :  { %v3778_v54 = vmax.f32 %v724_v62, 0.0 }
 0x19a   :  { %v3780_v14 = vmax.f32 %v722_v61, 0.0 }
 0x19b   :  { %2846 = vmatpush3.bf16.msra.mxu0 %v746_v56  ;;  %v748_v60 = vpack.c.bf16 %v3778_v54, %v3782_v32 }
 0x19c   :  { %v747_v46 = vpack.c.bf16 %v3780_v14, %v3776_v9 }
 0x19e   :  { %2847 = vmatprep.subr.bf16.mxu0 %v747_v46 }
 0x19f   :  { %2848 = vmatpush3.bf16.msra.mxu0 %v747_v46 }
 0x1a0   :  { %2849 = vmatprep.subr.bf16.mxu0 %v748_v60 }
 0x1a3   :  { %2850 = vmatpush3.bf16.msra.mxu0 %v748_v60 }
 0x1a4   :  { %2855 = vmatprep.subr.bf16.mxu0 %v3256_v33 }
 0x1a6   :  { %2852 = vmatmul.mubr.bf16.vlgmr.msra.gmra.mrb[16].mxu0 %v3794_v41 }
 0x1a7   :  { %2856 = vmatpush3.bf16.msra.mxu0 %v3256_v33 }
 0x1a8   :  { %2857 = vmatprep.subr.bf16.mxu0 %v3257_v17 }
 0x1ab   :  { %2858 = vmatpush3.bf16.msra.mxu0 %v3257_v17  ;;  %v928_v17 = vsel %vm587_vm0, %v3716_v10, 0.0 }
 0x279   :  { %v2853_v15 = vpop.f32.mrb[16].mxu0 }
 0x27a   :  { %v795_v19 = vpop.f32.mrb[17].mxu0 }
 0x27b   :  { %v2854_v13 = vpop.f32.mrb[18].mxu0 }
 0x27c   :  { %v811_v16 = vpack.c.bf16 %v2854_v13, %v2853_v15  ;;  %v798_v20 = vpop.f32.mrb[19].mxu0  ;;  %v931_v13 = vsel %vm587_vm0, %v3720_v12, 0.0 }
 0x27d   :  { %v810_v21 = vpack.c.bf16 %v798_v20, %v795_v19  ;;  %v934_v19 = vsel %vm587_vm0, %v3723_v18, 0.0  ;;  %v937_v20 = vsel %vm587_vm0, %v3718_v11, 0.0 }
 0x27f   :  { %2859 = vmatprep.mubr.msk.bf16.mxu0 %vm587_vm0, %v810_v21  ;;  %v946_v21 = vsel %vm587_vm0, %v3743_v37, 0.0 }
 0x280   :  { %2860 = vmatmul.mubr.msk.bf16.vlgmr.msra.gmra.mrb[20].mxu0 %vm587_vm0, %v811_v16  ;;  %v940_v16 = vsel %vm587_vm0, %v3736_v27, 0.0 }
 0x353   :  { %v2861_v23 = vpop.f32.mrb[20].mxu0 }
 0x354   :  { %v912_v24 = vadd.f32 %v2861_v23, %v2581_v22  ;;  %v903_v25 = vpop.f32.mrb[21].mxu0  ;;  %v952_v23 = vsel %vm587_vm0, %v3756_v52, 0.0 }
 0x355   :  { %v904_v26 = vadd.f32 %v2581_v22, %v903_v25  ;;  %v2862_v31 = vpop.f32.mrb[22].mxu0  ;;  %v958_v25 = vsel %vm587_vm0, %v3763_v63, 0.0 }
 0x356   :  { %v920_v28 = vadd.f32 %v912_v24, %v3589_v47  ;;  %v915_v34 = vadd.f32 %v2862_v31, %v2581_v22  ;;  %v906_v38 = vpop.f32.mrb[23].mxu0  ;;  %v949_v24 = vsel %vm587_vm0, %v3738_v35, 0.0  ;;  %v964_v31 = vsel %vm587_vm0, %v3776_v9, 0.0 }
 0x357   :  { %v918_v36 = vadd.f32 %v904_v26, %v3583_v0  ;;  %v907_v29 = vadd.f32 %v2581_v22, %v906_v38  ;;  %v943_v22 = vsel %vm587_vm0, %v3740_v30, 0.0  ;;  %v955_v26 = vsel %vm587_vm0, %v3760_v53, 0.0 }
 0x358   :  { %v921_v39 = vadd.f32 %v915_v34, %v3592_v8  ;;  %v924_v45 = vmax.f32 %v920_v28, 0.0  ;;  %v961_v28 = vsel %vm587_vm0, %v3758_v6, 0.0  ;;  %v970_v34 = vsel %vm587_vm0, %v3782_v32, 0.0 }
 0x359   :  { %v919_v40 = vadd.f32 %v907_v29, %v3586_v1  ;;  %v922_v42 = vmax.f32 %v918_v36, 0.0  ;;  %v967_v38 = vsel %vm587_vm0, %v3780_v14, 0.0  ;;  %v973_v36 = vsel %vm587_vm0, %v3778_v54, 0.0  ;;  %v3258_v29 = vld [vmem:[%s4546_s10] sm:$0xff]  }
 0x35a   :  { %v1195_v47 = vsel %vm587_vm0, %v924_v45, 0.0  ;;  %v925_v50 = vmax.f32 %v921_v39, 0.0  ;;  %v3259_v39 = vld [vmem:[%s4546_s10 + $0x8] sm:$0xff]   ;;  %2863 = vmatprep.subr.bf16.mxu0 %v3258_v29 }
 0x35b   :  { %v1189_v43 = vsel %vm587_vm0, %v922_v42, 0.0  ;;  %v923_v44 = vmax.f32 %v919_v40, 0.0  ;;  %2864 = vmatpush3.bf16.msra.mxu0 %v3258_v29 }
 0x35c   :  { %1190 = vadd.xlane.f32.xlu0 %v1189_v43  ;;  %v1198_v0 = vsel %vm587_vm0, %v925_v50, 0.0  ;;  %2865 = vmatprep.subr.bf16.mxu0 %v3259_v39 }
 0x35d   :  { %v1192_v48 = vsel %vm587_vm0, %v923_v44, 0.0 }
 0x35e   :  { %1193 = vadd.xlane.f32.xlu1 %v1192_v48 }
 0x35f   :  { %2866 = vmatpush3.bf16.msra.mxu0 %v3259_v39 }
 0x360   :  { %1196 = vadd.xlane.f32.xlu0 %v1195_v47 }
 0x364   :  { %1199 = vadd.xlane.f32.xlu0 %v1198_v0 }
 0x3e9   :  { %v1191_v51 = vpop.xlane.xlu0 %1190 }
 0x3ea   :  { %v1201_v8 = vmul.f32 0.03125, %v1191_v51 }
 0x3eb   :  { %v1194_v55 = vpop.xlane.xlu1 %1193 }
 0x3ec   :  { %v3813_v1 = vsub.f32 %v922_v42, %v1201_v8  ;;  %v1202_v59 = vmul.f32 0.03125, %v1194_v55 }
 0x3ed   :  { %v1197_v49 = vpop.xlane.xlu0 %1196 }
 0x3ee   :  { %v3815_v7 = vsub.f32 %v923_v44, %v1202_v59  ;;  %v1203_v57 = vmul.f32 0.03125, %v1197_v49  ;;  %v1209_v58 = vmul.f32 %v3813_v1, %v3813_v1 }
 0x3f0   :  { %v3819_v2 = vsub.f32 %v924_v45, %v1203_v57  ;;  %v1213_v3 = vsel %vm587_vm0, %v1209_v58, 0.0  ;;  %v1210_v4 = vmul.f32 %v3815_v7, %v3815_v7 }
 0x3f1   :  { %1214 = vadd.xlane.f32.xlu1 %v1213_v3  ;;  %v1200_v5 = vpop.xlane.xlu0 %1199 }
 0x3f2   :  { %v1204_v56 = vmul.f32 0.03125, %v1200_v5  ;;  %v1216_v62 = vsel %vm587_vm0, %v1210_v4, 0.0  ;;  %v1211_v61 = vmul.f32 %v3819_v2, %v3819_v2 }
 0x3f3   :  { %1217 = vadd.xlane.f32.xlu0 %v1216_v62 }
 0x3f4   :  { %v3827_v46 = vsub.f32 %v925_v50, %v1204_v56  ;;  %v1219_v60 = vsel %vm587_vm0, %v1211_v61, 0.0  ;;  %v3879_v61 = vld [vmem:[%s4547_s22] ss:$0 sm:$0xff] }
 0x3f5   :  { %1220 = vadd.xlane.f32.xlu1 %v1219_v60 }
 0x3f6   :  { %v1212_v33 = vmul.f32 %v3827_v46, %v3827_v46 }
 0x3f8   :  { %v1222_v15 = vsel %vm587_vm0, %v1212_v33, 0.0 }
 0x3f9   :  { %929 = vadd.xlane.f32.xlu1 %v928_v17  ;;  %1223 = vadd.xlane.f32.xlu0 %v1222_v15 }
 0x3fd   :  { %935 = vadd.xlane.f32.xlu1 %v934_v19  ;;  %932 = vadd.xlane.f32.xlu0 %v931_v13 }
 0x401   :  { %941 = vadd.xlane.f32.xlu1 %v940_v16  ;;  %938 = vadd.xlane.f32.xlu0 %v937_v20 }
 0x405   :  { %947 = vadd.xlane.f32.xlu1 %v946_v21  ;;  %944 = vadd.xlane.f32.xlu0 %v943_v22 }
 0x409   :  { %953 = vadd.xlane.f32.xlu1 %v952_v23  ;;  %950 = vadd.xlane.f32.xlu0 %v949_v24 }
 0x40d   :  { %959 = vadd.xlane.f32.xlu1 %v958_v25  ;;  %956 = vadd.xlane.f32.xlu0 %v955_v26 }
 0x411   :  { %965 = vadd.xlane.f32.xlu1 %v964_v31  ;;  %962 = vadd.xlane.f32.xlu0 %v961_v28  ;;  %v3906_v31 = vld [vmem:[%s4548_s23] ss:$0 sm:$0xff] }
 0x415   :  { %971 = vadd.xlane.f32.xlu1 %v970_v34  ;;  %968 = vadd.xlane.f32.xlu0 %v967_v38 }
 0x419   :  { %974 = vadd.xlane.f32.xlu0 %v973_v36 }
 0x47e   :  { %v1215_v40 = vpop.xlane.xlu1 %1214 }
 0x47f   :  { %v1225_v42 = vmul.f32 0.03125, %v1215_v40 }
 0x480   :  { %v1218_v43 = vpop.xlane.xlu0 %1217 }
 0x481   :  { %v1229_v44 = vadd.f32 1e-05, %v1225_v42  ;;  %v1226_v45 = vmul.f32 0.03125, %v1218_v43 }
 0x482   :  { %v1221_v48 = vpop.xlane.xlu1 %1220 }
 0x483   :  { %3270 = vrsqrt.f32 %v1229_v44  ;;  %v1230_v47 = vadd.f32 1e-05, %v1226_v45  ;;  %v1227_v50 = vmul.f32 0.03125, %v1221_v48 }
 0x485   :  { %3272 = vrsqrt.f32 %v1230_v47  ;;  %v1231_v0 = vadd.f32 1e-05, %v1227_v50 }
 0x486   :  { %v930_v51 = vpop.xlane.xlu1 %929  ;;  %v1224_v8 = vpop.xlane.xlu0 %1223 }
 0x487   :  { %3274 = vrsqrt.f32 %v1231_v0  ;;  %v977_v55 = vmul.f32 0.03125, %v930_v51  ;;  %v1228_v59 = vmul.f32 0.03125, %v1224_v8 }
 0x489   :  { %v3872_v49 = vsub.f32 %v3716_v10, %v977_v55  ;;  %v1232_v57 = vadd.f32 1e-05, %v1228_v59 }
 0x48a   :  { %v936_v58 = vpop.xlane.xlu1 %935  ;;  %v933_v3 = vpop.xlane.xlu0 %932 }
 0x48b   :  { %3276 = vrsqrt.f32 %v1232_v57  ;;  %v979_v4 = vmul.f32 0.03125, %v936_v58  ;;  %v978_v5 = vmul.f32 0.03125, %v933_v3  ;;  %v1009_v56 = vmul.f32 %v3872_v49, %v3872_v49 }
 0x48d   :  { %v3271_v62 = vpop.eup %3270  ;;  %v3882_v60 = vsub.f32 %v3723_v18, %v979_v4  ;;  %v3885_v10 = vsub.f32 %v3720_v12, %v978_v5  ;;  %v1025_v33 = vsel %vm587_vm0, %v1009_v56, 0.0 }
 0x48e   :  { %v1237_v17 = vmul.f32 %v3271_v62, %v3813_v1  ;;  %1026 = vadd.xlane.f32.xlu1 %v1025_v33  ;;  %v942_v15 = vpop.xlane.xlu1 %941  ;;  %v939_v19 = vpop.xlane.xlu0 %938 }
 0x48f   :  { %v3273_v13 = vpop.eup %3272  ;;  %v981_v16 = vmul.f32 0.03125, %v942_v15  ;;  %v980_v20 = vmul.f32 0.03125, %v939_v19  ;;  %v1011_v21 = vmul.f32 %v3882_v60, %v3882_v60  ;;  %v1010_v18 = vmul.f32 %v3885_v10, %v3885_v10 }
 0x490   :  { %v1238_v22 = vmul.f32 %v3273_v13, %v3815_v7  ;;  %v1241_v12 = vmul.f32 %v3879_v61, %v1237_v17 }
 0x491   :  { %v3275_v23 = vpop.eup %3274  ;;  %v3896_v24 = vsub.f32 %v3736_v27, %v981_v16  ;;  %v3899_v1 = vsub.f32 %v3718_v11, %v980_v20  ;;  %v1031_v25 = vsel %vm587_vm0, %v1011_v21, 0.0  ;;  %v1028_v26 = vsel %vm587_vm0, %v1010_v18, 0.0 }
 0x492   :  { %v1239_v7 = vmul.f32 %v3275_v23, %v3819_v2  ;;  %1032 = vadd.xlane.f32.xlu1 %v1031_v25  ;;  %v948_v28 = vpop.xlane.xlu1 %947  ;;  %1029 = vadd.xlane.f32.xlu0 %v1028_v26  ;;  %v945_v34 = vpop.xlane.xlu0 %944  ;;  %v1242_v27 = vmul.f32 %v3879_v61, %v1238_v22  ;;  %v1245_v39 = vadd.f32 %v3906_v31, %v1241_v12 }
 0x493   :  { %v983_v38 = vmul.f32 0.03125, %v948_v28  ;;  %v982_v11 = vmul.f32 0.03125, %v945_v34  ;;  %v1013_v36 = vmul.f32 %v3896_v24, %v3896_v24  ;;  %v1012_v29 = vmul.f32 %v3899_v1, %v3899_v1 }
 0x494   :  { %v1246_v40 = vadd.f32 %v3906_v31, %v1242_v27  ;;  %v1243_v48 = vmul.f32 %v3879_v61, %v1239_v7 }
 0x495   :  { %v3277_v42 = vpop.eup %3276  ;;  %v3917_v2 = vsub.f32 %v3743_v37, %v983_v38  ;;  %v3920_v43 = vsub.f32 %v3740_v30, %v982_v11  ;;  %v1037_v44 = vsel %vm587_vm0, %v1013_v36, 0.0  ;;  %v1034_v45 = vsel %vm587_vm0, %v1012_v29, 0.0 }
 0x496   :  { %v1240_v47 = vmul.f32 %v3277_v42, %v3827_v46  ;;  %1038 = vadd.xlane.f32.xlu1 %v1037_v44  ;;  %v954_v50 = vpop.xlane.xlu1 %953  ;;  %1035 = vadd.xlane.f32.xlu0 %v1034_v45  ;;  %v951_v0 = vpop.xlane.xlu0 %950  ;;  %v3926_v51 = vpack.c.bf16 %v1246_v40, %v1245_v39  ;;  %v1247_v56 = vadd.f32 %v3906_v31, %v1243_v48 }
 0x497   :  { %v985_v8 = vmul.f32 0.03125, %v954_v50  ;;  %v984_v37 = vmul.f32 0.03125, %v951_v0  ;;  %v1015_v30 = vmul.f32 %v3917_v2, %v3917_v2  ;;  %v1014_v55 = vmul.f32 %v3920_v43, %v3920_v43  ;;  %v3260_v0 = vld [vmem:[%s4549_s12] sm:$0xff]  }
 0x498   :  { %v1244_v59 = vmul.f32 %v3879_v61, %v1240_v47  ;;  %2867 = vmatprep.mubr.msk.bf16.mxu0 %vm587_vm0, %v3926_v51  ;;  %2871 = vmatprep.subr.bf16.mxu0 %v3260_v0 }
 0x499   :  { %v3936_v46 = vsub.f32 %v3756_v52, %v985_v8  ;;  %v3939_v57 = vsub.f32 %v3738_v35, %v984_v37  ;;  %v1043_v58 = vsel %vm587_vm0, %v1015_v30, 0.0  ;;  %v1040_v3 = vsel %vm587_vm0, %v1014_v55, 0.0 }
 0x49a   :  { %1044 = vadd.xlane.f32.xlu1 %v1043_v58  ;;  %v960_v4 = vpop.xlane.xlu1 %959  ;;  %1041 = vadd.xlane.f32.xlu0 %v1040_v3  ;;  %v957_v5 = vpop.xlane.xlu0 %956  ;;  %v1248_v62 = vadd.f32 %v3906_v31, %v1244_v59 }
 0x49b   :  { %v987_v33 = vmul.f32 0.03125, %v960_v4  ;;  %v986_v17 = vmul.f32 0.03125, %v957_v5  ;;  %v1017_v52 = vmul.f32 %v3936_v46, %v3936_v46  ;;  %v1016_v35 = vmul.f32 %v3939_v57, %v3939_v57 }
 0x49c   :  { %v3949_v15 = vpack.c.bf16 %v1248_v62, %v1247_v56 }
 0x49d   :  { %v3952_v19 = vsub.f32 %v3763_v63, %v987_v33  ;;  %v3955_v13 = vsub.f32 %v3760_v53, %v986_v17  ;;  %v1049_v16 = vsel %vm587_vm0, %v1017_v52, 0.0  ;;  %v1046_v20 = vsel %vm587_vm0, %v1016_v35, 0.0 }
 0x49e   :  { %1050 = vadd.xlane.f32.xlu1 %v1049_v16  ;;  %v966_v21 = vpop.xlane.xlu1 %965  ;;  %2868 = vmatmul.mubr.msk.bf16.vlgmr.msra.gmra.mrb[24].mxu0 %vm587_vm0, %v3949_v15  ;;  %v963_v18 = vpop.xlane.xlu0 %962 }
 0x49f   :  { %v989_v22 = vmul.f32 0.03125, %v966_v21  ;;  %1047 = vadd.xlane.f32.xlu0 %v1046_v20  ;;  %v988_v12 = vmul.f32 0.03125, %v963_v18  ;;  %v1019_v63 = vmul.f32 %v3952_v19, %v3952_v19  ;;  %v1018_v53 = vmul.f32 %v3955_v13, %v3955_v13  ;;  %2872 = vmatpush3.bf16.msra.mxu0 %v3260_v0 }
 0x4a1   :  { %v3966_v23 = vsub.f32 %v3776_v9, %v989_v22  ;;  %v3969_v25 = vsub.f32 %v3758_v6, %v988_v12  ;;  %v1055_v26 = vsel %vm587_vm0, %v1019_v63, 0.0  ;;  %v1052_v7 = vsel %vm587_vm0, %v1018_v53, 0.0 }
 0x4a2   :  { %1056 = vadd.xlane.f32.xlu1 %v1055_v26  ;;  %v972_v28 = vpop.xlane.xlu1 %971  ;;  %v969_v34 = vpop.xlane.xlu0 %968 }
 0x4a3   :  { %v991_v27 = vmul.f32 0.03125, %v972_v28  ;;  %1053 = vadd.xlane.f32.xlu0 %v1052_v7  ;;  %v990_v38 = vmul.f32 0.03125, %v969_v34  ;;  %v1021_v11 = vmul.f32 %v3966_v23, %v3966_v23  ;;  %v1020_v9 = vmul.f32 %v3969_v25, %v3969_v25 }
 0x4a5   :  { %v3978_v36 = vsub.f32 %v3782_v32, %v991_v27  ;;  %v3981_v6 = vsub.f32 %v3780_v14, %v990_v38  ;;  %v1061_v29 = vsel %vm587_vm0, %v1021_v11, 0.0  ;;  %v1058_v39 = vsel %vm587_vm0, %v1020_v9, 0.0 }
 0x4a6   :  { %1062 = vadd.xlane.f32.xlu1 %v1061_v29  ;;  %v975_v40 = vpop.xlane.xlu0 %974 }
 0x4a7   :  { %1059 = vadd.xlane.f32.xlu0 %v1058_v39  ;;  %v992_v42 = vmul.f32 0.03125, %v975_v40  ;;  %v1023_v44 = vmul.f32 %v3978_v36, %v3978_v36  ;;  %v1022_v45 = vmul.f32 %v3981_v6, %v3981_v6 }
 0x4a9   :  { %v3990_v32 = vsub.f32 %v3778_v54, %v992_v42  ;;  %v1067_v14 = vsel %vm587_vm0, %v1023_v44, 0.0  ;;  %v1064_v48 = vsel %vm587_vm0, %v1022_v45, 0.0  ;;  %v3261_v54 = vld [vmem:[%s4549_s12 + $0x8] sm:$0xff]  }
 0x4aa   :  { %1068 = vadd.xlane.f32.xlu1 %v1067_v14  ;;  %2873 = vmatprep.subr.bf16.mxu0 %v3261_v54 }
 0x4ab   :  { %1065 = vadd.xlane.f32.xlu0 %v1064_v48  ;;  %v1024_v47 = vmul.f32 %v3990_v32, %v3990_v32  ;;  %2874 = vmatpush3.bf16.msra.mxu0 %v3261_v54 }
 0x4ad   :  { %v1070_v50 = vsel %vm587_vm0, %v1024_v47, 0.0 }
 0x4af   :  { %1071 = vadd.xlane.f32.xlu0 %v1070_v50 }
 0x51b   :  { %v1027_v8 = vpop.xlane.xlu1 %1026 }
 0x51c   :  { %v1073_v37 = vmul.f32 0.03125, %v1027_v8 }
 0x51e   :  { %v1089_v30 = vadd.f32 1e-05, %v1073_v37 }
 0x51f   :  { %v1033_v55 = vpop.xlane.xlu1 %1032  ;;  %v1030_v59 = vpop.xlane.xlu0 %1029 }
 0x520   :  { %3278 = vrsqrt.f32 %v1089_v30  ;;  %v1075_v58 = vmul.f32 0.03125, %v1033_v55  ;;  %v1074_v3 = vmul.f32 0.03125, %v1030_v59 }
 0x522   :  { %v1091_v4 = vadd.f32 1e-05, %v1075_v58  ;;  %v1090_v5 = vadd.f32 1e-05, %v1074_v3 }
 0x523   :  { %v1039_v56 = vpop.xlane.xlu1 %1038  ;;  %v1036_v62 = vpop.xlane.xlu0 %1035 }
 0x524   :  { %3280 = vrsqrt.f32 %v1091_v4  ;;  %v1077_v33 = vmul.f32 0.03125, %v1039_v56  ;;  %v1076_v17 = vmul.f32 0.03125, %v1036_v62 }
 0x525   :  { %3282 = vrsqrt.f32 %v1090_v5 }
 0x526   :  { %v1093_v52 = vadd.f32 1e-05, %v1077_v33  ;;  %v1092_v35 = vadd.f32 1e-05, %v1076_v17 }
 0x527   :  { %v1045_v16 = vpop.xlane.xlu1 %1044  ;;  %v1042_v20 = vpop.xlane.xlu0 %1041 }
 0x528   :  { %3284 = vrsqrt.f32 %v1093_v52  ;;  %v1079_v21 = vmul.f32 0.03125, %v1045_v16  ;;  %v1078_v18 = vmul.f32 0.03125, %v1042_v20 }
 0x529   :  { %3286 = vrsqrt.f32 %v1092_v35 }
 0x52a   :  { %v3279_v22 = vpop.eup %3278  ;;  %v1095_v12 = vadd.f32 1e-05, %v1079_v21  ;;  %v1094_v63 = vadd.f32 1e-05, %v1078_v18 }
 0x52b   :  { %v1121_v53 = vmul.f32 %v3279_v22, %v3872_v49  ;;  %v1051_v26 = vpop.xlane.xlu1 %1050 }
 0x52c   :  { %3288 = vrsqrt.f32 %v1095_v12  ;;  %v1081_v7 = vmul.f32 0.03125, %v1051_v26  ;;  %v1048_v28 = vpop.xlane.xlu0 %1047 }
 0x52d   :  { %3290 = vrsqrt.f32 %v1094_v63  ;;  %v1080_v34 = vmul.f32 0.03125, %v1048_v28  ;;  %v1143_v40 = vmul.f32 %v3879_v61, %v1121_v53 }
 0x52e   :  { %v3281_v27 = vpop.eup %3280  ;;  %v1097_v38 = vadd.f32 1e-05, %v1081_v7 }
 0x52f   :  { %v3283_v11 = vpop.eup %3282  ;;  %v1123_v9 = vmul.f32 %v3281_v27, %v3882_v60  ;;  %v1096_v29 = vadd.f32 1e-05, %v1080_v34  ;;  %v1057_v39 = vpop.xlane.xlu1 %1056  ;;  %v1165_v37 = vadd.f32 %v3906_v31, %v1143_v40 }
 0x530   :  { %v1122_v42 = vmul.f32 %v3283_v11, %v3885_v10  ;;  %3292 = vrsqrt.f32 %v1097_v38  ;;  %v1083_v44 = vmul.f32 0.03125, %v1057_v39  ;;  %v1054_v49 = vpop.xlane.xlu0 %1053 }
 0x531   :  { %3294 = vrsqrt.f32 %v1096_v29  ;;  %v1082_v45 = vmul.f32 0.03125, %v1054_v49  ;;  %v1145_v0 = vmul.f32 %v3879_v61, %v1123_v9 }
 0x532   :  { %v3285_v14 = vpop.eup %3284  ;;  %v1099_v48 = vadd.f32 1e-05, %v1083_v44  ;;  %v1144_v47 = vmul.f32 %v3879_v61, %v1122_v42 }
 0x533   :  { %v3287_v50 = vpop.eup %3286  ;;  %v1125_v60 = vmul.f32 %v3285_v14, %v3896_v24  ;;  %v1098_v54 = vadd.f32 1e-05, %v1082_v45  ;;  %v1063_v8 = vpop.xlane.xlu1 %1062  ;;  %v1167_v52 = vadd.f32 %v3906_v31, %v1145_v0 }
 0x534   :  { %v1124_v10 = vmul.f32 %v3287_v50, %v3899_v1  ;;  %3296 = vrsqrt.f32 %v1099_v48  ;;  %v1085_v30 = vmul.f32 0.03125, %v1063_v8  ;;  %v1060_v55 = vpop.xlane.xlu0 %1059  ;;  %v1166_v59 = vadd.f32 %v3906_v31, %v1144_v47 }
 0x535   :  { %3298 = vrsqrt.f32 %v1098_v54  ;;  %v1084_v58 = vmul.f32 0.03125, %v1060_v55  ;;  %v1147_v1 = vmul.f32 %v3879_v61, %v1125_v60 }
 0x536   :  { %v3289_v3 = vpop.eup %3288  ;;  %v1146_v4 = vmul.f32 %v3879_v61, %v1124_v10  ;;  %v1101_v5 = vadd.f32 1e-05, %v1085_v30  ;;  %v1181_v56 = vpack.c.bf16 %v1166_v59, %v1165_v37 }
 0x537   :  { %v3291_v62 = vpop.eup %3290  ;;  %v1127_v24 = vmul.f32 %v3289_v3, %v3917_v2  ;;  %v1100_v33 = vadd.f32 1e-05, %v1084_v58  ;;  %v1069_v17 = vpop.xlane.xlu1 %1068  ;;  %v1169_v7 = vadd.f32 %v3906_v31, %v1147_v1 }
 0x538   :  { %v1126_v35 = vmul.f32 %v3291_v62, %v3920_v43  ;;  %3300 = vrsqrt.f32 %v1101_v5  ;;  %v1087_v16 = vmul.f32 0.03125, %v1069_v17  ;;  %2875 = vmatprep.mubr.msk.bf16.mxu0 %vm587_vm0, %v1181_v56  ;;  %v1066_v20 = vpop.xlane.xlu0 %1065  ;;  %v1168_v21 = vadd.f32 %v3906_v31, %v1146_v4 }
 0x539   :  { %3302 = vrsqrt.f32 %v1100_v33  ;;  %v1086_v18 = vmul.f32 0.03125, %v1066_v20  ;;  %v1149_v43 = vmul.f32 %v3879_v61, %v1127_v24 }
 0x53a   :  { %v3293_v22 = vpop.eup %3292  ;;  %v1103_v12 = vadd.f32 1e-05, %v1087_v16  ;;  %v1182_v2 = vpack.c.bf16 %v1168_v21, %v1167_v52  ;;  %v1148_v63 = vmul.f32 %v3879_v61, %v1126_v35 }
 0x53b   :  { %v3295_v53 = vpop.eup %3294  ;;  %v1102_v26 = vadd.f32 1e-05, %v1086_v18  ;;  %v1129_v28 = vmul.f32 %v3293_v22, %v3936_v46  ;;  %v4076_v22 = vld [vmem:[%s4575_s2 + $0x10] sm:$0xff]  }
 0x53c   :  { %v1128_v34 = vmul.f32 %v3295_v53, %v3939_v57  ;;  %3304 = vrsqrt.f32 %v1103_v12  ;;  %2876 = vmatmul.mubr.msk.bf16.vlgmr.msra.gmra.mrb[28].mxu0 %vm587_vm0, %v1182_v2  ;;  %v1072_v27 = vpop.xlane.xlu0 %1071  ;;  %v1170_v38 = vadd.f32 %v3906_v31, %v1148_v63  ;;  %v1171_v57 = vadd.f32 %v3906_v31, %v1149_v43  ;;  %v4083_v12 = vld [vmem:[%s4575_s2 + $0x18] sm:$0xff]   ;;  %v4090_v2 = vld [vmem:[%s4575_s2 + $0x20] sm:$0xff]   ;;  %v4097_v63 = vld [vmem:[%s4575_s2 + $0x28] sm:$0xff]  }
 0x53d   :  { %3306 = vrsqrt.f32 %v1102_v26  ;;  %v1088_v11 = vmul.f32 0.03125, %v1072_v27  ;;  %v1151_v45 = vmul.f32 %v3879_v61, %v1129_v28  ;;  %v4104_v53 = vld [vmem:[%s4575_s2 + $0x30] sm:$0xff]   ;;  %v4111_v26 = vld [vmem:[%s4575_s2 + $0x38] sm:$0xff]  }
 0x53e   :  { %v3297_v9 = vpop.eup %3296  ;;  %v1183_v29 = vpack.c.bf16 %v1170_v38, %v1169_v7  ;;  %v1150_v39 = vmul.f32 %v3879_v61, %v1128_v34  ;;  %v2602_v7 = vld [vmem:[%s4552_s11] ss:$0 sm:$0xff] }
 0x53f   :  { %v3299_v40 = vpop.eup %3298  ;;  %v1131_v42 = vmul.f32 %v3297_v9, %v3952_v19  ;;  %v1104_v44 = vadd.f32 1e-05, %v1088_v11  ;;  %v1173_v60 = vadd.f32 %v3906_v31, %v1151_v45 }
 0x540   :  { %v1130_v46 = vmul.f32 %v3299_v40, %v3955_v13  ;;  %2879 = vmatprep.mubr.msk.bf16.mxu0 %vm587_vm0, %v1183_v29  ;;  %v1172_v49 = vadd.f32 %v3906_v31, %v1150_v39 }
 0x541   :  { %3308 = vrsqrt.f32 %v1104_v44  ;;  %v1153_v0 = vmul.f32 %v3879_v61, %v1131_v42 }
 0x542   :  { %v3301_v14 = vpop.eup %3300  ;;  %v1184_v48 = vpack.c.bf16 %v1172_v49, %v1171_v57  ;;  %v1152_v47 = vmul.f32 %v3879_v61, %v1130_v46 }
 0x543   :  { %v3303_v50 = vpop.eup %3302  ;;  %v1133_v19 = vmul.f32 %v3301_v14, %v3966_v23  ;;  %v1175_v55 = vadd.f32 %v3906_v31, %v1153_v0 }
 0x544   :  { %v1132_v13 = vmul.f32 %v3303_v50, %v3969_v25  ;;  %2880 = vmatmul.mubr.msk.bf16.gmra.mrb[32].mxu0 %vm587_vm0, %v1184_v48  ;;  %v1174_v54 = vadd.f32 %v3906_v31, %v1152_v47 }
 0x545   :  { %v1155_v25 = vmul.f32 %v3879_v61, %v1133_v19 }
 0x546   :  { %v3305_v8 = vpop.eup %3304  ;;  %v1185_v37 = vpack.c.bf16 %v1174_v54, %v1173_v60  ;;  %v1154_v10 = vmul.f32 %v3879_v61, %v1132_v13 }
 0x547   :  { %v3307_v30 = vpop.eup %3306  ;;  %v1135_v59 = vmul.f32 %v3305_v8, %v3978_v36  ;;  %v1177_v62 = vadd.f32 %v3906_v31, %v1155_v25 }
 0x548   :  { %v1134_v58 = vmul.f32 %v3307_v30, %v3981_v6  ;;  %2883 = vmatprep.mubr.msk.bf16.mxu0 %vm587_vm0, %v1185_v37  ;;  %v1176_v23 = vadd.f32 %v3906_v31, %v1154_v10 }
 0x549   :  { %v1157_v6 = vmul.f32 %v3879_v61, %v1135_v59 }
 0x54a   :  { %v1186_v3 = vpack.c.bf16 %v1176_v23, %v1175_v55  ;;  %v1156_v4 = vmul.f32 %v3879_v61, %v1134_v58 }
 0x54b   :  { %v3309_v5 = vpop.eup %3308  ;;  %v1179_v17 = vadd.f32 %v3906_v31, %v1157_v6 }
 0x54c   :  { %v1136_v56 = vmul.f32 %v3309_v5, %v3990_v32  ;;  %2884 = vmatmul.mubr.msk.bf16.gmra.mrb[36].mxu0 %vm587_vm0, %v1186_v3  ;;  %v1178_v36 = vadd.f32 %v3906_v31, %v1156_v4  ;;  %v4062_v32 = vld [vmem:[%s4575_s2] sm:$0xff]  }
 0x54e   :  { %v1187_v24 = vpack.c.bf16 %v1178_v36, %v1177_v62  ;;  %v1158_v33 = vmul.f32 %v3879_v61, %v1136_v56 }
 0x550   :  { %2887 = vmatprep.mubr.msk.bf16.mxu0 %vm587_vm0, %v1187_v24  ;;  %v1180_v52 = vadd.f32 %v3906_v31, %v1158_v33  ;;  %v4069_v31 = vld [vmem:[%s4575_s2 + $0x8] sm:$0xff]  }
 0x552   :  { %v1188_v1 = vpack.c.bf16 %v1180_v52, %v1179_v17 }
 0x554   :  { %2888 = vmatmul.mubr.msk.bf16.gmra.mrb[40].mxu0 %vm587_vm0, %v1188_v1 }
 0x555   :  { %2895 = vmatprep.mubr.msk.bf16.mxu0 %vm587_vm0, %v4062_v32 }
 0x571   :  { %v2869_v35 = vpop.f32.mrb[24].mxu0 }
 0x572   :  { %v1321_v16 = vpop.f32.mrb[25].mxu0 }
 0x573   :  { %v2870_v61 = vpop.f32.mrb[26].mxu0 }
 0x574   :  { %v1470_v20 = vpack.c.bf16 %v2870_v61, %v2869_v35  ;;  %v1324_v21 = vpop.f32.mrb[27].mxu0 }
 0x575   :  { %v1469_v18 = vpack.c.bf16 %v1324_v21, %v1321_v16 }
 0x577   :  { %2891 = vmatprep.subr.bf16.mxu0 %v1469_v18 }
 0x578   :  { %2892 = vmatpush3.bf16.msra.mxu0 %v1469_v18 }
 0x579   :  { %2893 = vmatprep.subr.bf16.mxu0 %v1470_v20 }
 0x57c   :  { %2894 = vmatpush3.bf16.msra.mxu0 %v1470_v20 }
 0x57f   :  { %2896 = vmatmul.mubr.msk.bf16.vlgmr.msra.gmra.mrb[28].mxu0 %vm587_vm0, %v4069_v31 }
 0x580   :  { %2899 = vmatprep.mubr.msk.bf16.mxu0 %vm587_vm0, %v4076_v22 }
 0x587   :  { %2900 = vmatmul.mubr.msk.bf16.gmra.mrb[32].mxu0 %vm587_vm0, %v4083_v12 }
 0x588   :  { %2903 = vmatprep.mubr.msk.bf16.mxu0 %vm587_vm0, %v4090_v2 }
 0x58f   :  { %2904 = vmatmul.mubr.msk.bf16.gmra.mrb[36].mxu0 %vm587_vm0, %v4097_v63 }
 0x590   :  { %2907 = vmatprep.mubr.msk.bf16.mxu0 %vm587_vm0, %v4104_v53 }
 0x597   :  { %2908 = vmatmul.mubr.msk.bf16.gmra.mrb[40].mxu0 %vm587_vm0, %v4111_v26 }
 0x652   :  { %v2897_v43 = vpop.f32.mrb[28].mxu0 }
 0x653   :  { %v1511_v28 = vpop.f32.mrb[29].mxu0  ;;  %v1520_v9 = vadd.f32 %v2897_v43, %v2602_v7 }
 0x654   :  { %v1512_v34 = vadd.f32 %v2602_v7, %v1511_v28  ;;  %v2898_v27 = vpop.f32.mrb[30].mxu0 }
 0x655   :  { %v1523_v38 = vadd.f32 %v2898_v27, %v2602_v7  ;;  %v1514_v11 = vpop.f32.mrb[31].mxu0  ;;  %v4124_v44 = vmax.f32 %v1520_v9, 0.0  ;;  %v3265_v9 = vld [vmem:[%s4551_s13 + $0x8] sm:$0xff]  }
 0x656   :  { %v1515_v29 = vadd.f32 %v2602_v7, %v1514_v11  ;;  %v4118_v39 = vmax.f32 %v1512_v34, 0.0  ;;  %v3264_v11 = vld [vmem:[%s4551_s13] sm:$0xff]  }
 0x657   :  { %v4120_v40 = vmax.f32 %v1523_v38, 0.0  ;;  %v3263_v38 = vld [vmem:[%s4550_s15 + $0x8] sm:$0xff]  }
 0x658   :  { %v4122_v42 = vmax.f32 %v1515_v29, 0.0 }
 0x659   :  { %v1607_v48 = vpack.c.bf16 %v4120_v40, %v4124_v44 }
 0x65a   :  { %v2901_v46 = vpop.f32.mrb[32].mxu0  ;;  %v1606_v57 = vpack.c.bf16 %v4122_v42, %v4118_v39 }
 0x65b   :  { %v1527_v49 = vpop.f32.mrb[33].mxu0  ;;  %v1536_v0 = vadd.f32 %v2901_v46, %v2602_v7 }
 0x65c   :  { %v1528_v45 = vadd.f32 %v2602_v7, %v1527_v49  ;;  %v2902_v14 = vpop.f32.mrb[34].mxu0  ;;  %2911 = vmatprep.subr.bf16.mxu1 %v1606_v57 }
 0x65d   :  { %v1539_v47 = vadd.f32 %v2902_v14, %v2602_v7  ;;  %v1530_v50 = vpop.f32.mrb[35].mxu0  ;;  %2912 = vmatpush3.bf16.msra.mxu1 %v1606_v57  ;;  %v4136_v8 = vmax.f32 %v1536_v0, 0.0 }
 0x65e   :  { %v1531_v19 = vadd.f32 %v2602_v7, %v1530_v50  ;;  %2913 = vmatprep.subr.bf16.mxu1 %v1607_v48  ;;  %v4130_v13 = vmax.f32 %v1528_v45, 0.0 }
 0x65f   :  { %v4132_v60 = vmax.f32 %v1539_v47, 0.0 }
 0x660   :  { %v4134_v54 = vmax.f32 %v1531_v19, 0.0 }
 0x661   :  { %2914 = vmatpush3.bf16.msra.mxu1 %v1607_v48  ;;  %v1609_v58 = vpack.c.bf16 %v4132_v60, %v4136_v8 }
 0x662   :  { %v2905_v37 = vpop.f32.mrb[36].mxu0  ;;  %v1608_v10 = vpack.c.bf16 %v4134_v54, %v4130_v13 }
 0x663   :  { %v1543_v30 = vpop.f32.mrb[37].mxu0  ;;  %v1552_v3 = vadd.f32 %v2905_v37, %v2602_v7 }
 0x664   :  { %v1544_v55 = vadd.f32 %v2602_v7, %v1543_v30  ;;  %v2906_v59 = vpop.f32.mrb[38].mxu0  ;;  %2915 = vmatprep.subr.bf16.mxu1 %v1608_v10 }
 0x665   :  { %v1555_v23 = vadd.f32 %v2906_v59, %v2602_v7  ;;  %v1546_v25 = vpop.f32.mrb[39].mxu0  ;;  %2916 = vmatpush3.bf16.msra.mxu1 %v1608_v10  ;;  %v4148_v36 = vmax.f32 %v1552_v3, 0.0 }
 0x666   :  { %v1547_v4 = vadd.f32 %v2602_v7, %v1546_v25  ;;  %2917 = vmatprep.subr.bf16.mxu1 %v1609_v58  ;;  %v4142_v5 = vmax.f32 %v1544_v55, 0.0 }
 0x667   :  { %v4144_v56 = vmax.f32 %v1555_v23, 0.0 }
 0x668   :  { %v4146_v62 = vmax.f32 %v1547_v4, 0.0 }
 0x669   :  { %2918 = vmatpush3.bf16.msra.mxu1 %v1609_v58  ;;  %v1611_v1 = vpack.c.bf16 %v4144_v56, %v4148_v36 }
 0x66a   :  { %v2909_v6 = vpop.f32.mrb[40].mxu0  ;;  %v1610_v24 = vpack.c.bf16 %v4146_v62, %v4142_v5 }
 0x66b   :  { %v1559_v33 = vpop.f32.mrb[41].mxu0  ;;  %v1568_v61 = vadd.f32 %v2909_v6, %v2602_v7 }
 0x66c   :  { %v1560_v17 = vadd.f32 %v2602_v7, %v1559_v33  ;;  %v2910_v52 = vpop.f32.mrb[42].mxu0  ;;  %2919 = vmatprep.subr.bf16.mxu1 %v1610_v24 }
 0x66d   :  { %v1571_v35 = vadd.f32 %v2910_v52, %v2602_v7  ;;  %v1562_v16 = vpop.f32.mrb[43].mxu0  ;;  %2920 = vmatpush3.bf16.msra.mxu1 %v1610_v24  ;;  %v4160_v28 = vmax.f32 %v1568_v61, 0.0 }
 0x66e   :  { %v1563_v20 = vadd.f32 %v2602_v7, %v1562_v16  ;;  %2921 = vmatprep.subr.bf16.mxu1 %v1611_v1  ;;  %v4154_v21 = vmax.f32 %v1560_v17, 0.0  ;;  %v3262_v7 = vld [vmem:[%s4550_s15] sm:$0xff]  }
 0x66f   :  { %v4156_v18 = vmax.f32 %v1571_v35, 0.0 }
 0x670   :  { %v4158_v43 = vmax.f32 %v1563_v20, 0.0 }
 0x671   :  { %2922 = vmatpush3.bf16.msra.mxu1 %v1611_v1  ;;  %v1613_v27 = vpack.c.bf16 %v4156_v18, %v4160_v28 }
 0x672   :  { %v1612_v34 = vpack.c.bf16 %v4158_v43, %v4154_v21 }
 0x674   :  { %2923 = vmatprep.subr.bf16.mxu1 %v1612_v34 }
 0x675   :  { %2924 = vmatpush3.bf16.msra.mxu1 %v1612_v34 }
 0x676   :  { %2925 = vmatprep.subr.bf16.mxu1 %v1613_v27 }
 0x679   :  { %2926 = vmatpush3.bf16.msra.mxu1 %v1613_v27 }
 0x67a   :  { %2931 = vmatprep.subr.bf16.mxu1 %v3262_v7 }
 0x67c   :  { %2928 = vmatmul.mubr.bf16.vlgmr.msra.gmra.mrb[0].mxu1 %v3794_v41 }
 0x67d   :  { %2932 = vmatpush3.bf16.msra.mxu1 %v3262_v7  ;;  %2935 = vmatprep.mubr.msk.bf16.mxu1 %vm587_vm0, %v3926_v51 }
 0x67e   :  { %2933 = vmatprep.subr.bf16.mxu1 %v3263_v38 }
 0x681   :  { %2934 = vmatpush3.bf16.msra.mxu1 %v3263_v38 }
 0x682   :  { %2939 = vmatprep.subr.bf16.mxu1 %v3264_v11 }
 0x684   :  { %2936 = vmatmul.mubr.msk.bf16.vlgmr.msra.gmra.mrb[4].mxu1 %vm587_vm0, %v3949_v15  ;;  %v2615_v15 = vld [vmem:[%s4553_s14] ss:$0 sm:$0xff] }
 0x685   :  { %2940 = vmatpush3.bf16.msra.mxu1 %v3264_v11 }
 0x686   :  { %2941 = vmatprep.subr.bf16.mxu1 %v3265_v9 }
 0x689   :  { %2942 = vmatpush3.bf16.msra.mxu1 %v3265_v9 }
 0x74f   :  { %v2929_v41 = vpop.f32.mrb[0].mxu1 }
 0x750   :  { %v1648_v29 = vpop.f32.mrb[1].mxu1 }
 0x751   :  { %v2930_v51 = vpop.f32.mrb[2].mxu1 }
 0x752   :  { %v1664_v46 = vpack.c.bf16 %v2930_v51, %v2929_v41  ;;  %v1651_v57 = vpop.f32.mrb[3].mxu1 }
 0x753   :  { %v1663_v49 = vpack.c.bf16 %v1651_v57, %v1648_v29  ;;  %v1812_v57 = vsel %vm587_vm0, %v4122_v42, 0.0 }
 0x755   :  { %2943 = vmatprep.mubr.msk.bf16.mxu1 %vm587_vm0, %v1663_v49  ;;  %v1815_v49 = vsel %vm587_vm0, %v4124_v44, 0.0 }
 0x756   :  { %2944 = vmatmul.mubr.msk.bf16.vlgmr.msra.gmra.mrb[4].mxu1 %vm587_vm0, %v1664_v46  ;;  %v1809_v46 = vsel %vm587_vm0, %v4118_v39, 0.0 }
 0x829   :  { %v2945_v45 = vpop.f32.mrb[4].mxu1 }
 0x82a   :  { %v1784_v14 = vpop.f32.mrb[5].mxu1  ;;  %v1793_v48 = vadd.f32 %v2945_v45, %v2615_v15  ;;  %v1821_v45 = vsel %vm587_vm0, %v4130_v13, 0.0 }
 0x82b   :  { %v1785_v47 = vadd.f32 %v2615_v15, %v1784_v14  ;;  %v2946_v50 = vpop.f32.mrb[6].mxu1  ;;  %v1824_v14 = vsel %vm587_vm0, %v4134_v54, 0.0 }
 0x82c   :  { %v1787_v0 = vpop.f32.mrb[7].mxu1  ;;  %v1796_v37 = vadd.f32 %v2946_v50, %v2615_v15  ;;  %v1805_v30 = vmax.f32 %v1793_v48, 0.0  ;;  %v1827_v48 = vsel %vm587_vm0, %v4136_v8, 0.0  ;;  %v1833_v50 = vsel %vm587_vm0, %v4142_v5, 0.0 }
 0x82d   :  { %v1803_v19 = vmax.f32 %v1785_v47, 0.0  ;;  %v1788_v10 = vadd.f32 %v2615_v15, %v1787_v0  ;;  %v1818_v15 = vsel %vm587_vm0, %v4120_v40, 0.0  ;;  %v1830_v47 = vsel %vm587_vm0, %v4132_v60, 0.0 }
 0x82e   :  { %v1806_v58 = vmax.f32 %v1796_v37, 0.0  ;;  %v2075_v25 = vsel %vm587_vm0, %v1805_v30, 0.0  ;;  %v1836_v0 = vsel %vm587_vm0, %v4146_v62, 0.0  ;;  %v1842_v37 = vsel %vm587_vm0, %v4144_v56, 0.0 }
 0x82f   :  { %v1804_v55 = vmax.f32 %v1788_v10, 0.0  ;;  %v2069_v59 = vsel %vm587_vm0, %v1803_v19, 0.0  ;;  %v1845_v10 = vsel %vm587_vm0, %v4154_v21, 0.0 }
 0x830   :  { %2070 = vadd.xlane.f32.xlu1 %v2069_v59  ;;  %v2078_v3 = vsel %vm587_vm0, %v1806_v58, 0.0  ;;  %v1854_v59 = vsel %vm587_vm0, %v4156_v18, 0.0 }
 0x831   :  { %v2072_v23 = vsel %vm587_vm0, %v1804_v55, 0.0 }
 0x832   :  { %2073 = vadd.xlane.f32.xlu0 %v2072_v23  ;;  %v3267_v23 = vld [vmem:[%s4554_s16 + $0x8] sm:$0xff]  }
 0x834   :  { %2076 = vadd.xlane.f32.xlu1 %v2075_v25 }
 0x836   :  { %2079 = vadd.xlane.f32.xlu0 %v2078_v3 }
 0x8bd   :  { %v2071_v4 = vpop.xlane.xlu1 %2070 }
 0x8be   :  { %v2081_v6 = vmul.f32 0.03125, %v2071_v4 }
 0x8bf   :  { %v2074_v24 = vpop.xlane.xlu0 %2073 }
 0x8c0   :  { %v4192_v33 = vsub.f32 %v1803_v19, %v2081_v6  ;;  %v2082_v17 = vmul.f32 0.03125, %v2074_v24  ;;  %v1839_v19 = vsel %vm587_vm0, %v4148_v36, 0.0 }
 0x8c1   :  { %v2077_v52 = vpop.xlane.xlu1 %2076 }
 0x8c2   :  { %v4194_v1 = vsub.f32 %v1804_v55, %v2082_v17  ;;  %v2083_v35 = vmul.f32 0.03125, %v2077_v52  ;;  %v2089_v16 = vmul.f32 %v4192_v33, %v4192_v33  ;;  %v1851_v55 = vsel %vm587_vm0, %v4160_v28, 0.0 }
 0x8c3   :  { %v2080_v61 = vpop.xlane.xlu0 %2079 }
 0x8c4   :  { %v4198_v20 = vsub.f32 %v1805_v30, %v2083_v35  ;;  %v2084_v34 = vmul.f32 0.03125, %v2080_v61  ;;  %v2093_v27 = vsel %vm587_vm0, %v2089_v16, 0.0  ;;  %v2090_v7 = vmul.f32 %v4194_v1, %v4194_v1 }
 0x8c5   :  { %2094 = vadd.xlane.f32.xlu1 %v2093_v27  ;;  %v1848_v30 = vsel %vm587_vm0, %v4158_v43, 0.0 }
 0x8c6   :  { %v4203_v38 = vsub.f32 %v1806_v58, %v2084_v34  ;;  %v2096_v11 = vsel %vm587_vm0, %v2090_v7, 0.0  ;;  %v2091_v9 = vmul.f32 %v4198_v20, %v4198_v20  ;;  %v3266_v58 = vld [vmem:[%s4554_s16] sm:$0xff]  }
 0x8c7   :  { %2097 = vadd.xlane.f32.xlu0 %v2096_v11  ;;  %2947 = vmatprep.subr.bf16.mxu1 %v3266_v58 }
 0x8c8   :  { %v2099_v41 = vsel %vm587_vm0, %v2091_v9, 0.0  ;;  %v2092_v29 = vmul.f32 %v4203_v38, %v4203_v38  ;;  %2948 = vmatpush3.bf16.msra.mxu1 %v3266_v58 }
 0x8c9   :  { %2100 = vadd.xlane.f32.xlu1 %v2099_v41  ;;  %2949 = vmatprep.subr.bf16.mxu1 %v3267_v23 }
 0x8ca   :  { %v2102_v51 = vsel %vm587_vm0, %v2092_v29, 0.0 }
 0x8cb   :  { %2103 = vadd.xlane.f32.xlu0 %v2102_v51 }
 0x8cc   :  { %2950 = vmatpush3.bf16.msra.mxu1 %v3267_v23 }
 0x8cd   :  { %1810 = vadd.xlane.f32.xlu1 %v1809_v46 }
 0x8cf   :  { %1813 = vadd.xlane.f32.xlu0 %v1812_v57 }
 0x8d1   :  { %1816 = vadd.xlane.f32.xlu1 %v1815_v49 }
 0x8d3   :  { %1819 = vadd.xlane.f32.xlu0 %v1818_v15 }
 0x8d5   :  { %1822 = vadd.xlane.f32.xlu1 %v1821_v45 }
 0x8d7   :  { %1825 = vadd.xlane.f32.xlu0 %v1824_v14  ;;  %v4261_v14 = vld [vmem:[%s4555_s24] ss:$0 sm:$0xff] }
 0x8d9   :  { %1828 = vadd.xlane.f32.xlu1 %v1827_v48 }
 0x8db   :  { %1831 = vadd.xlane.f32.xlu0 %v1830_v47 }
 0x8dd   :  { %1834 = vadd.xlane.f32.xlu1 %v1833_v50 }
 0x8df   :  { %1837 = vadd.xlane.f32.xlu0 %v1836_v0 }
 0x8e1   :  { %1840 = vadd.xlane.f32.xlu1 %v1839_v19 }
 0x8e3   :  { %1843 = vadd.xlane.f32.xlu0 %v1842_v37 }
 0x8e5   :  { %1846 = vadd.xlane.f32.xlu1 %v1845_v10 }
 0x8e7   :  { %1849 = vadd.xlane.f32.xlu0 %v1848_v30 }
 0x8e9   :  { %1852 = vadd.xlane.f32.xlu1 %v1851_v55 }
 0x8eb   :  { %1855 = vadd.xlane.f32.xlu0 %v1854_v59 }
 0x952   :  { %v2095_v25 = vpop.xlane.xlu1 %2094 }
 0x953   :  { %v2105_v3 = vmul.f32 0.03125, %v2095_v25 }
 0x954   :  { %v2098_v4 = vpop.xlane.xlu0 %2097 }
 0x955   :  { %v2109_v6 = vadd.f32 1e-05, %v2105_v3  ;;  %v2106_v24 = vmul.f32 0.03125, %v2098_v4  ;;  %v4287_v4 = vld [vmem:[%s4556_s25] ss:$0 sm:$0xff] }
 0x956   :  { %v2101_v17 = vpop.xlane.xlu1 %2100 }
 0x957   :  { %3310 = vrsqrt.f32 %v2109_v6  ;;  %v2110_v52 = vadd.f32 1e-05, %v2106_v24  ;;  %v2107_v35 = vmul.f32 0.03125, %v2101_v17 }
 0x958   :  { %v2104_v16 = vpop.xlane.xlu0 %2103 }
 0x959   :  { %3312 = vrsqrt.f32 %v2110_v52  ;;  %v2111_v61 = vadd.f32 1e-05, %v2107_v35  ;;  %v2108_v34 = vmul.f32 0.03125, %v2104_v16 }
 0x95a   :  { %v1811_v27 = vpop.xlane.xlu1 %1810 }
 0x95b   :  { %3314 = vrsqrt.f32 %v2111_v61  ;;  %v2112_v7 = vadd.f32 1e-05, %v2108_v34  ;;  %v1857_v11 = vmul.f32 0.03125, %v1811_v27 }
 0x95c   :  { %v1814_v9 = vpop.xlane.xlu0 %1813 }
 0x95d   :  { %3316 = vrsqrt.f32 %v2112_v7  ;;  %v4251_v41 = vsub.f32 %v4118_v39, %v1857_v11  ;;  %v1858_v29 = vmul.f32 0.03125, %v1814_v9 }
 0x95e   :  { %v1817_v51 = vpop.xlane.xlu1 %1816 }
 0x95f   :  { %v4254_v46 = vsub.f32 %v4122_v42, %v1858_v29  ;;  %v1859_v57 = vmul.f32 0.03125, %v1817_v51  ;;  %v1889_v49 = vmul.f32 %v4251_v41, %v4251_v41 }
 0x960   :  { %v1820_v15 = vpop.xlane.xlu0 %1819 }
 0x961   :  { %v3311_v45 = vpop.eup %3310  ;;  %v4264_v48 = vsub.f32 %v4124_v44, %v1859_v57  ;;  %v1860_v39 = vmul.f32 0.03125, %v1820_v15  ;;  %v1905_v47 = vsel %vm587_vm0, %v1889_v49, 0.0  ;;  %v1890_v42 = vmul.f32 %v4254_v46, %v4254_v46 }
 0x962   :  { %v2117_v50 = vmul.f32 %v3311_v45, %v4192_v33  ;;  %1906 = vadd.xlane.f32.xlu1 %v1905_v47  ;;  %v1823_v0 = vpop.xlane.xlu1 %1822 }
 0x963   :  { %v3313_v19 = vpop.eup %3312  ;;  %v4271_v37 = vsub.f32 %v4120_v40, %v1860_v39  ;;  %v1861_v10 = vmul.f32 0.03125, %v1823_v0  ;;  %v1908_v30 = vsel %vm587_vm0, %v1890_v42, 0.0  ;;  %v1891_v44 = vmul.f32 %v4264_v48, %v4264_v48 }
 0x964   :  { %v2118_v55 = vmul.f32 %v3313_v19, %v4194_v1  ;;  %1909 = vadd.xlane.f32.xlu0 %v1908_v30  ;;  %v1826_v59 = vpop.xlane.xlu0 %1825  ;;  %v2121_v58 = vmul.f32 %v4261_v14, %v2117_v50 }
 0x965   :  { %v3315_v23 = vpop.eup %3314  ;;  %v4279_v33 = vsub.f32 %v4130_v13, %v1861_v10  ;;  %v1862_v25 = vmul.f32 0.03125, %v1826_v59  ;;  %v1911_v40 = vsel %vm587_vm0, %v1891_v44, 0.0  ;;  %v1892_v3 = vmul.f32 %v4271_v37, %v4271_v37 }
 0x966   :  { %v2119_v1 = vmul.f32 %v3315_v23, %v4198_v20  ;;  %1912 = vadd.xlane.f32.xlu1 %v1911_v40  ;;  %v1829_v6 = vpop.xlane.xlu1 %1828  ;;  %v2122_v24 = vmul.f32 %v4261_v14, %v2118_v55  ;;  %v2125_v27 = vadd.f32 %v4287_v4, %v2121_v58 }
 0x967   :  { %v3317_v17 = vpop.eup %3316  ;;  %v4292_v13 = vsub.f32 %v4134_v54, %v1862_v25  ;;  %v1863_v52 = vmul.f32 0.03125, %v1829_v6  ;;  %v1914_v35 = vsel %vm587_vm0, %v1892_v3, 0.0  ;;  %v1893_v16 = vmul.f32 %v4279_v33, %v4279_v33 }
 0x968   :  { %v2123_v61 = vmul.f32 %v4261_v14, %v2119_v1  ;;  %v2120_v34 = vmul.f32 %v3317_v17, %v4203_v38  ;;  %1915 = vadd.xlane.f32.xlu0 %v1914_v35  ;;  %v1832_v20 = vpop.xlane.xlu0 %1831  ;;  %v2126_v7 = vadd.f32 %v4287_v4, %v2122_v24 }
 0x969   :  { %v4302_v11 = vsub.f32 %v4136_v8, %v1863_v52  ;;  %v1864_v54 = vmul.f32 0.03125, %v1832_v20  ;;  %v1917_v9 = vsel %vm587_vm0, %v1893_v16, 0.0  ;;  %v1894_v29 = vmul.f32 %v4292_v13, %v4292_v13 }
 0x96a   :  { %v2124_v51 = vmul.f32 %v4261_v14, %v2120_v34  ;;  %1918 = vadd.xlane.f32.xlu1 %v1917_v9  ;;  %v1835_v57 = vpop.xlane.xlu1 %1834  ;;  %v2129_v38 = vpack.c.bf16 %v2126_v7, %v2125_v27  ;;  %v2127_v47 = vadd.f32 %v4287_v4, %v2123_v61 }
 0x96b   :  { %v4309_v49 = vsub.f32 %v4132_v60, %v1864_v54  ;;  %v1865_v15 = vmul.f32 0.03125, %v1835_v57  ;;  %v1920_v45 = vsel %vm587_vm0, %v1894_v29, 0.0  ;;  %v1895_v8 = vmul.f32 %v4302_v11, %v4302_v11 }
 0x96c   :  { %1921 = vadd.xlane.f32.xlu0 %v1920_v45  ;;  %v1838_v39 = vpop.xlane.xlu0 %1837  ;;  %2951 = vmatprep.mubr.msk.bf16.mxu1 %vm587_vm0, %v2129_v38  ;;  %v2128_v42 = vadd.f32 %v4287_v4, %v2124_v51 }
 0x96d   :  { %v4318_v50 = vsub.f32 %v4142_v5, %v1865_v15  ;;  %v1866_v0 = vmul.f32 0.03125, %v1838_v39  ;;  %v1923_v60 = vsel %vm587_vm0, %v1895_v8, 0.0  ;;  %v1896_v19 = vmul.f32 %v4309_v49, %v4309_v49  ;;  %v3269_v8 = vld [vmem:[%s4557_s18 + $0x8] sm:$0xff]  }
 0x96e   :  { %1924 = vadd.xlane.f32.xlu1 %v1923_v60  ;;  %v1841_v10 = vpop.xlane.xlu1 %1840  ;;  %v2130_v30 = vpack.c.bf16 %v2128_v42, %v2127_v47 }
 0x96f   :  { %v4324_v44 = vsub.f32 %v4146_v62, %v1866_v0  ;;  %v1867_v55 = vmul.f32 0.03125, %v1841_v10  ;;  %v1926_v59 = vsel %vm587_vm0, %v1896_v19, 0.0  ;;  %v1897_v58 = vmul.f32 %v4318_v50, %v4318_v50 }
 0x970   :  { %1927 = vadd.xlane.f32.xlu0 %v1926_v59  ;;  %v1844_v5 = vpop.xlane.xlu0 %1843  ;;  %2952 = vmatmul.mubr.msk.bf16.vlgmr.msra.gmra.mrb[8].mxu1 %vm587_vm0, %v2130_v30 }
 0x971   :  { %v4331_v23 = vsub.f32 %v4148_v36, %v1867_v55  ;;  %v1868_v25 = vmul.f32 0.03125, %v1844_v5  ;;  %v1929_v40 = vsel %vm587_vm0, %v1897_v58, 0.0  ;;  %v1898_v62 = vmul.f32 %v4324_v44, %v4324_v44 }
 0x972   :  { %1930 = vadd.xlane.f32.xlu1 %v1929_v40  ;;  %v1847_v3 = vpop.xlane.xlu1 %1846 }
 0x973   :  { %v4337_v1 = vsub.f32 %v4144_v56, %v1868_v25  ;;  %v1869_v6 = vmul.f32 0.03125, %v1847_v3  ;;  %v1932_v24 = vsel %vm587_vm0, %v1898_v62, 0.0  ;;  %v1899_v17 = vmul.f32 %v4331_v23, %v4331_v23 }
 0x974   :  { %1933 = vadd.xlane.f32.xlu0 %v1932_v24  ;;  %v1850_v36 = vpop.xlane.xlu0 %1849 }
 0x975   :  { %v4343_v52 = vsub.f32 %v4154_v21, %v1869_v6  ;;  %v1870_v35 = vmul.f32 0.03125, %v1850_v36  ;;  %v1935_v16 = vsel %vm587_vm0, %v1899_v17, 0.0  ;;  %v1900_v61 = vmul.f32 %v4337_v1, %v4337_v1 }
 0x976   :  { %1936 = vadd.xlane.f32.xlu1 %v1935_v16  ;;  %v1853_v56 = vpop.xlane.xlu1 %1852 }
 0x977   :  { %v4349_v34 = vsub.f32 %v4158_v43, %v1870_v35  ;;  %v1871_v20 = vmul.f32 0.03125, %v1853_v56  ;;  %v1938_v27 = vsel %vm587_vm0, %v1900_v61, 0.0  ;;  %v1901_v7 = vmul.f32 %v4343_v52, %v4343_v52 }
 0x978   :  { %1939 = vadd.xlane.f32.xlu0 %v1938_v27  ;;  %v1856_v21 = vpop.xlane.xlu0 %1855 }
 0x979   :  { %v4355_v54 = vsub.f32 %v4160_v28, %v1871_v20  ;;  %v1872_v9 = vmul.f32 0.03125, %v1856_v21  ;;  %v1941_v29 = vsel %vm587_vm0, %v1901_v7, 0.0  ;;  %v1902_v51 = vmul.f32 %v4349_v34, %v4349_v34 }
 0x97a   :  { %1942 = vadd.xlane.f32.xlu1 %v1941_v29 }
 0x97b   :  { %v4361_v43 = vsub.f32 %v4156_v18, %v1872_v9  ;;  %v1944_v57 = vsel %vm587_vm0, %v1902_v51, 0.0  ;;  %v1903_v38 = vmul.f32 %v4355_v54, %v4355_v54  ;;  %v3268_v18 = vld [vmem:[%s4557_s18] sm:$0xff]  }
 0x97c   :  { %1945 = vadd.xlane.f32.xlu0 %v1944_v57  ;;  %2955 = vmatprep.subr.bf16.mxu1 %v3268_v18 }
 0x97d   :  { %v1947_v15 = vsel %vm587_vm0, %v1903_v38, 0.0  ;;  %v1904_v28 = vmul.f32 %v4361_v43, %v4361_v43  ;;  %2956 = vmatpush3.bf16.msra.mxu1 %v3268_v18 }
 0x97e   :  { %1948 = vadd.xlane.f32.xlu1 %v1947_v15  ;;  %2957 = vmatprep.subr.bf16.mxu1 %v3269_v8 }
 0x97f   :  { %v1950_v45 = vsel %vm587_vm0, %v1904_v28, 0.0 }
 0x980   :  { %1951 = vadd.xlane.f32.xlu0 %v1950_v45 }
 0x981   :  { %2958 = vmatpush3.bf16.msra.mxu1 %v3269_v8 }
 0x9ef   :  { %v1907_v39 = vpop.xlane.xlu1 %1906 }
 0x9f0   :  { %v1953_v47 = vmul.f32 0.03125, %v1907_v39 }
 0x9f1   :  { %v1910_v42 = vpop.xlane.xlu0 %1909 }
 0x9f2   :  { %v1969_v0 = vadd.f32 1e-05, %v1953_v47  ;;  %v1954_v60 = vmul.f32 0.03125, %v1910_v42 }
 0x9f3   :  { %v1913_v19 = vpop.xlane.xlu1 %1912 }
 0x9f4   :  { %3318 = vrsqrt.f32 %v1969_v0  ;;  %v1970_v10 = vadd.f32 1e-05, %v1954_v60  ;;  %v1955_v30 = vmul.f32 0.03125, %v1913_v19 }
 0x9f5   :  { %v1916_v55 = vpop.xlane.xlu0 %1915 }
 0x9f6   :  { %3320 = vrsqrt.f32 %v1970_v10  ;;  %v1971_v59 = vadd.f32 1e-05, %v1955_v30  ;;  %v1956_v58 = vmul.f32 0.03125, %v1916_v55 }
 0x9f7   :  { %v1919_v5 = vpop.xlane.xlu1 %1918 }
 0x9f8   :  { %3322 = vrsqrt.f32 %v1971_v59  ;;  %v1972_v25 = vadd.f32 1e-05, %v1956_v58  ;;  %v1957_v40 = vmul.f32 0.03125, %v1919_v5 }
 0x9f9   :  { %v1922_v62 = vpop.xlane.xlu0 %1921 }
 0x9fa   :  { %3324 = vrsqrt.f32 %v1972_v25  ;;  %v1973_v3 = vadd.f32 1e-05, %v1957_v40  ;;  %v1958_v6 = vmul.f32 0.03125, %v1922_v62 }
 0x9fb   :  { %v1925_v24 = vpop.xlane.xlu1 %1924 }
 0x9fc   :  { %3326 = vrsqrt.f32 %v1973_v3  ;;  %v1974_v17 = vadd.f32 1e-05, %v1958_v6  ;;  %v1959_v36 = vmul.f32 0.03125, %v1925_v24 }
 0x9fd   :  { %v1928_v35 = vpop.xlane.xlu0 %1927 }
 0x9fe   :  { %v3319_v16 = vpop.eup %3318  ;;  %3328 = vrsqrt.f32 %v1974_v17  ;;  %v1975_v61 = vadd.f32 1e-05, %v1959_v36  ;;  %v1960_v56 = vmul.f32 0.03125, %v1928_v35 }
 0x9ff   :  { %v2001_v20 = vmul.f32 %v3319_v16, %v4251_v41  ;;  %v1931_v27 = vpop.xlane.xlu1 %1930 }
 0xa00   :  { %v3321_v7 = vpop.eup %3320  ;;  %3330 = vrsqrt.f32 %v1975_v61  ;;  %v1976_v21 = vadd.f32 1e-05, %v1960_v56  ;;  %v1961_v9 = vmul.f32 0.03125, %v1931_v27 }
 0xa01   :  { %v2002_v29 = vmul.f32 %v3321_v7, %v4254_v46  ;;  %v1934_v51 = vpop.xlane.xlu0 %1933  ;;  %v2023_v57 = vmul.f32 %v4261_v14, %v2001_v20 }
 0xa02   :  { %v3323_v38 = vpop.eup %3322  ;;  %3332 = vrsqrt.f32 %v1976_v21  ;;  %v1977_v15 = vadd.f32 1e-05, %v1961_v9  ;;  %v1962_v28 = vmul.f32 0.03125, %v1934_v51 }
 0xa03   :  { %v2003_v45 = vmul.f32 %v3323_v38, %v4264_v48  ;;  %v1937_v18 = vpop.xlane.xlu1 %1936  ;;  %v2024_v8 = vmul.f32 %v4261_v14, %v2002_v29  ;;  %v2045_v60 = vadd.f32 %v4287_v4, %v2023_v57 }
 0xa04   :  { %v3325_v41 = vpop.eup %3324  ;;  %3334 = vrsqrt.f32 %v1977_v15  ;;  %v1978_v39 = vadd.f32 1e-05, %v1962_v28  ;;  %v1963_v47 = vmul.f32 0.03125, %v1937_v18 }
 0xa05   :  { %v2025_v42 = vmul.f32 %v4261_v14, %v2003_v45  ;;  %v2004_v46 = vmul.f32 %v3325_v41, %v4271_v37  ;;  %v1940_v0 = vpop.xlane.xlu0 %1939  ;;  %v2046_v19 = vadd.f32 %v4287_v4, %v2024_v8 }
 0xa06   :  { %v3327_v10 = vpop.eup %3326  ;;  %3336 = vrsqrt.f32 %v1978_v39  ;;  %v1979_v30 = vadd.f32 1e-05, %v1963_v47  ;;  %v1964_v48 = vmul.f32 0.03125, %v1940_v0 }
 0xa07   :  { %v2026_v55 = vmul.f32 %v4261_v14, %v2004_v46  ;;  %v2005_v59 = vmul.f32 %v3327_v10, %v4279_v33  ;;  %v1943_v58 = vpop.xlane.xlu1 %1942  ;;  %v2061_v5 = vpack.c.bf16 %v2046_v19, %v2045_v60  ;;  %v2047_v6 = vadd.f32 %v4287_v4, %v2025_v42 }
 0xa08   :  { %v3329_v25 = vpop.eup %3328  ;;  %3338 = vrsqrt.f32 %v1979_v30  ;;  %v1980_v40 = vadd.f32 1e-05, %v1964_v48  ;;  %v1965_v62 = vmul.f32 0.03125, %v1943_v58 }
 0xa09   :  { %v2006_v37 = vmul.f32 %v3329_v25, %v4292_v13  ;;  %v1946_v3 = vpop.xlane.xlu0 %1945  ;;  %2959 = vmatprep.mubr.msk.bf16.mxu1 %vm587_vm0, %v2061_v5  ;;  %v2048_v24 = vadd.f32 %v4287_v4, %v2026_v55  ;;  %v2027_v17 = vmul.f32 %v4261_v14, %v2005_v59 }
 0xa0a   :  { %v3331_v36 = vpop.eup %3330  ;;  %3340 = vrsqrt.f32 %v1980_v40  ;;  %v1981_v33 = vadd.f32 1e-05, %v1965_v62  ;;  %v1966_v35 = vmul.f32 0.03125, %v1946_v3 }
 0xa0b   :  { %v2007_v16 = vmul.f32 %v3331_v36, %v4302_v11  ;;  %v1949_v61 = vpop.xlane.xlu1 %1948  ;;  %v2062_v56 = vpack.c.bf16 %v2048_v24, %v2047_v6  ;;  %v2028_v20 = vmul.f32 %v4261_v14, %v2006_v37  ;;  %v2049_v29 = vadd.f32 %v4287_v4, %v2027_v17 }
 0xa0c   :  { %v3333_v13 = vpop.eup %3332  ;;  %3342 = vrsqrt.f32 %v1981_v33  ;;  %v1982_v27 = vadd.f32 1e-05, %v1966_v35  ;;  %v1967_v7 = vmul.f32 0.03125, %v1949_v61 }
 0xa0d   :  { %v2008_v21 = vmul.f32 %v3333_v13, %v4309_v49  ;;  %v1952_v9 = vpop.xlane.xlu0 %1951  ;;  %2960 = vmatmul.mubr.msk.bf16.vlgmr.msra.gmra.mrb[12].mxu1 %vm587_vm0, %v2062_v56  ;;  %v2050_v51 = vadd.f32 %v4287_v4, %v2028_v20  ;;  %v2029_v57 = vmul.f32 %v4261_v14, %v2007_v16 }
 0xa0e   :  { %v3335_v11 = vpop.eup %3334  ;;  %3344 = vrsqrt.f32 %v1982_v27  ;;  %v1983_v38 = vadd.f32 1e-05, %v1967_v7  ;;  %v1968_v15 = vmul.f32 0.03125, %v1952_v9 }
 0xa0f   :  { %v2009_v28 = vmul.f32 %v3335_v11, %v4318_v50  ;;  %v2063_v45 = vpack.c.bf16 %v2050_v51, %v2049_v29  ;;  %v2030_v18 = vmul.f32 %v4261_v14, %v2008_v21  ;;  %v2051_v39 = vadd.f32 %v4287_v4, %v2029_v57 }
 0xa10   :  { %v3337_v8 = vpop.eup %3336  ;;  %3346 = vrsqrt.f32 %v1983_v38  ;;  %v1984_v49 = vadd.f32 1e-05, %v1968_v15 }
 0xa11   :  { %v2010_v41 = vmul.f32 %v3337_v8, %v4324_v44  ;;  %2963 = vmatprep.mubr.msk.bf16.mxu1 %vm587_vm0, %v2063_v45  ;;  %v2052_v47 = vadd.f32 %v4287_v4, %v2030_v18  ;;  %v2031_v42 = vmul.f32 %v4261_v14, %v2009_v28 }
 0xa12   :  { %v3339_v46 = vpop.eup %3338  ;;  %3348 = vrsqrt.f32 %v1984_v49 }
 0xa13   :  { %v2011_v50 = vmul.f32 %v3339_v46, %v4331_v23  ;;  %v2064_v0 = vpack.c.bf16 %v2052_v47, %v2051_v39  ;;  %v2032_v60 = vmul.f32 %v4261_v14, %v2010_v41  ;;  %v2053_v44 = vadd.f32 %v4287_v4, %v2031_v42 }
 0xa14   :  { %v3341_v19 = vpop.eup %3340 }
 0xa15   :  { %v2012_v10 = vmul.f32 %v3341_v19, %v4337_v1  ;;  %2964 = vmatmul.mubr.msk.bf16.gmra.mrb[16].mxu1 %vm587_vm0, %v2064_v0  ;;  %v2054_v30 = vadd.f32 %v4287_v4, %v2032_v60  ;;  %v2033_v48 = vmul.f32 %v4261_v14, %v2011_v50 }
 0xa16   :  { %v3343_v55 = vpop.eup %3342 }
 0xa17   :  { %v2013_v59 = vmul.f32 %v3343_v55, %v4343_v52  ;;  %v2065_v58 = vpack.c.bf16 %v2054_v30, %v2053_v44  ;;  %v2034_v23 = vmul.f32 %v4261_v14, %v2012_v10  ;;  %v2055_v1 = vadd.f32 %v4287_v4, %v2033_v48 }
 0xa18   :  { %v3345_v5 = vpop.eup %3344 }
 0xa19   :  { %v2014_v25 = vmul.f32 %v3345_v5, %v4349_v34  ;;  %2967 = vmatprep.mubr.msk.bf16.mxu1 %vm587_vm0, %v2065_v58  ;;  %v2056_v40 = vadd.f32 %v4287_v4, %v2034_v23  ;;  %v2035_v62 = vmul.f32 %v4261_v14, %v2013_v59 }
 0xa1a   :  { %v3347_v37 = vpop.eup %3346 }
 0xa1b   :  { %v2015_v3 = vmul.f32 %v3347_v37, %v4355_v54  ;;  %v2066_v6 = vpack.c.bf16 %v2056_v40, %v2055_v1  ;;  %v2036_v52 = vmul.f32 %v4261_v14, %v2014_v25  ;;  %v2057_v34 = vadd.f32 %v4287_v4, %v2035_v62 }
 0xa1c   :  { %v3349_v24 = vpop.eup %3348 }
 0xa1d   :  { %v2016_v17 = vmul.f32 %v3349_v24, %v4361_v43  ;;  %2968 = vmatmul.mubr.msk.bf16.gmra.mrb[20].mxu1 %vm587_vm0, %v2066_v6  ;;  %v2058_v36 = vadd.f32 %v4287_v4, %v2036_v52  ;;  %v2037_v33 = vmul.f32 %v4261_v14, %v2015_v3 }
 0xa1f   :  { %v2067_v35 = vpack.c.bf16 %v2058_v36, %v2057_v34  ;;  %v2038_v16 = vmul.f32 %v4261_v14, %v2016_v17  ;;  %v2059_v54 = vadd.f32 %v4287_v4, %v2037_v33 }
 0xa21   :  { %2971 = vmatprep.mubr.msk.bf16.mxu1 %vm587_vm0, %v2067_v35  ;;  %v2060_v61 = vadd.f32 %v4287_v4, %v2038_v16 }
 0xa23   :  { %v2068_v56 = vpack.c.bf16 %v2060_v61, %v2059_v54 }
 0xa25   :  { %2972 = vmatmul.mubr.msk.bf16.gmra.mrb[24].mxu1 %vm587_vm0, %v2068_v56 }
 0xa26   :  { %2979 = vmatprep.mubr.msk.bf16.mxu1 %vm587_vm0, %v4062_v32  ;;  %v4451_v32 = vld [vmem:[%s4558_s17] ss:$0 sm:$0xff] }
 0xa43   :  { %v2953_v43 = vpop.f32.mrb[8].mxu1 }
 0xa44   :  { %v2192_v20 = vpop.f32.mrb[9].mxu1 }
 0xa45   :  { %v2954_v13 = vpop.f32.mrb[10].mxu1 }
 0xa46   :  { %v2341_v27 = vpack.c.bf16 %v2954_v13, %v2953_v43  ;;  %v2195_v7 = vpop.f32.mrb[11].mxu1 }
 0xa47   :  { %v2340_v21 = vpack.c.bf16 %v2195_v7, %v2192_v20 }
 0xa49   :  { %2975 = vmatprep.subr.bf16.mxu1 %v2340_v21 }
 0xa4a   :  { %2976 = vmatpush3.bf16.msra.mxu1 %v2340_v21 }
 0xa4b   :  { %2977 = vmatprep.subr.bf16.mxu1 %v2341_v27 }
 0xa4e   :  { %2978 = vmatpush3.bf16.msra.mxu1 %v2341_v27 }
 0xa51   :  { %2980 = vmatmul.mubr.msk.bf16.vlgmr.msra.gmra.mrb[12].mxu1 %vm587_vm0, %v4069_v31 }
 0xa52   :  { %2983 = vmatprep.mubr.msk.bf16.mxu1 %vm587_vm0, %v4076_v22 }
 0xa59   :  { %2984 = vmatmul.mubr.msk.bf16.gmra.mrb[16].mxu1 %vm587_vm0, %v4083_v12 }
 0xa5a   :  { %2987 = vmatprep.mubr.msk.bf16.mxu1 %vm587_vm0, %v4090_v2 }
 0xa61   :  { %2988 = vmatmul.mubr.msk.bf16.gmra.mrb[20].mxu1 %vm587_vm0, %v4097_v63 }
 0xa62   :  { %2991 = vmatprep.mubr.msk.bf16.mxu1 %vm587_vm0, %v4104_v53 }
 0xa69   :  { %2992 = vmatmul.mubr.msk.bf16.gmra.mrb[24].mxu1 %vm587_vm0, %v4111_v26 }
 0xb24   :  { %v2981_v31 = vpop.f32.mrb[12].mxu1 }
 0xb25   :  { %v2391_v22 = vadd.f32 %v2981_v31, %v4451_v32  ;;  %v2382_v12 = vpop.f32.mrb[13].mxu1 }
 0xb26   :  { %v2383_v2 = vadd.f32 %v4451_v32, %v2382_v12  ;;  %v2982_v14 = vpop.f32.mrb[14].mxu1 }
 0xb27   :  { %v2463_v4 = vmax.f32 %v2391_v22, 0.0  ;;  %v2394_v63 = vadd.f32 %v2982_v14, %v4451_v32  ;;  %v2385_v9 = vpop.f32.mrb[15].mxu1 }
 0xb28   :  { %v2461_v53 = vmax.f32 %v2383_v2, 0.0  ;;  %v2386_v26 = vadd.f32 %v4451_v32, %v2385_v9 }
 0xb29   :  { %v2663_v29 = vpack.c.bf16 %v2463_v4, %v2463_v4  ;;  %v2464_v51 = vmax.f32 %v2394_v63, 0.0 }
 0xb2a   :  { %v2661_v57 = vpack.c.bf16 %v2461_v53, %v2461_v53  ;;  %v2462_v11 = vmax.f32 %v2386_v26, 0.0 }
 0xb2b   :  { %2544 = vst.msk [vmem:[%s4559_s26 + $0x8] sm:$0xf] %vm2541_vm1, %v2663_v29  ;;  %v2664_v38 = vpack.c.bf16 %v2464_v51, %v2464_v51 }
 0xb2c   :  { %2542 = vst.msk [vmem:[%s4559_s26] sm:$0xf] %vm2541_vm1, %v2661_v57  ;;  %v2662_v15 = vpack.c.bf16 %v2462_v11, %v2462_v11  ;;  %v2985_v28 = vpop.f32.mrb[16].mxu1 }
 0xb2d   :  { %2545 = vst.msk [vmem:[%s4559_s26 + $0xc] sm:$0xf] %vm2541_vm1, %v2664_v38  ;;  %v2407_v45 = vadd.f32 %v2985_v28, %v4451_v32  ;;  %v2398_v18 = vpop.f32.mrb[17].mxu1 }
 0xb2e   :  { %2543 = vst.msk [vmem:[%s4559_s26 + $0x4] sm:$0xf] %vm2541_vm1, %v2662_v15  ;;  %v2399_v8 = vadd.f32 %v4451_v32, %v2398_v18  ;;  %v2986_v49 = vpop.f32.mrb[18].mxu1 }
 0xb2f   :  { %v2467_v41 = vmax.f32 %v2407_v45, 0.0  ;;  %v2410_v39 = vadd.f32 %v2986_v49, %v4451_v32  ;;  %v2401_v47 = vpop.f32.mrb[19].mxu1 }
 0xb30   :  { %v2465_v42 = vmax.f32 %v2399_v8, 0.0  ;;  %v2402_v46 = vadd.f32 %v4451_v32, %v2401_v47 }
 0xb31   :  { %v2667_v50 = vpack.c.bf16 %v2467_v41, %v2467_v41  ;;  %v2468_v0 = vmax.f32 %v2410_v39, 0.0 }
 0xb32   :  { %v2665_v60 = vpack.c.bf16 %v2465_v42, %v2465_v42  ;;  %v2466_v19 = vmax.f32 %v2402_v46, 0.0 }
 0xb33   :  { %2548 = vst.msk [vmem:[%s4559_s26 + $0x18] sm:$0xf] %vm2541_vm1, %v2667_v50  ;;  %v2668_v10 = vpack.c.bf16 %v2468_v0, %v2468_v0 }
 0xb34   :  { %2546 = vst.msk [vmem:[%s4559_s26 + $0x10] sm:$0xf] %vm2541_vm1, %v2665_v60  ;;  %v2666_v44 = vpack.c.bf16 %v2466_v19, %v2466_v19  ;;  %v2989_v30 = vpop.f32.mrb[20].mxu1 }
 0xb35   :  { %2549 = vst.msk [vmem:[%s4559_s26 + $0x1c] sm:$0xf] %vm2541_vm1, %v2668_v10  ;;  %v2423_v48 = vadd.f32 %v2989_v30, %v4451_v32  ;;  %v2414_v55 = vpop.f32.mrb[21].mxu1 }
 0xb36   :  { %2547 = vst.msk [vmem:[%s4559_s26 + $0x14] sm:$0xf] %vm2541_vm1, %v2666_v44  ;;  %v2415_v59 = vadd.f32 %v4451_v32, %v2414_v55  ;;  %v2990_v58 = vpop.f32.mrb[22].mxu1 }
 0xb37   :  { %v2471_v23 = vmax.f32 %v2423_v48, 0.0  ;;  %v2426_v5 = vadd.f32 %v2990_v58, %v4451_v32  ;;  %v2417_v25 = vpop.f32.mrb[23].mxu1 }
 0xb38   :  { %v2469_v1 = vmax.f32 %v2415_v59, 0.0  ;;  %v2418_v40 = vadd.f32 %v4451_v32, %v2417_v25 }
 0xb39   :  { %v2671_v62 = vpack.c.bf16 %v2471_v23, %v2471_v23  ;;  %v2472_v37 = vmax.f32 %v2426_v5, 0.0 }
 0xb3a   :  { %v2669_v3 = vpack.c.bf16 %v2469_v1, %v2469_v1  ;;  %v2470_v6 = vmax.f32 %v2418_v40, 0.0 }
 0xb3b   :  { %2552 = vst.msk [vmem:[%s4559_s26 + $0x28] sm:$0xf] %vm2541_vm1, %v2671_v62  ;;  %v2672_v52 = vpack.c.bf16 %v2472_v37, %v2472_v37 }
 0xb3c   :  { %2550 = vst.msk [vmem:[%s4559_s26 + $0x20] sm:$0xf] %vm2541_vm1, %v2669_v3  ;;  %v2670_v24 = vpack.c.bf16 %v2470_v6, %v2470_v6  ;;  %v2993_v17 = vpop.f32.mrb[24].mxu1 }
 0xb3d   :  { %2553 = vst.msk [vmem:[%s4559_s26 + $0x2c] sm:$0xf] %vm2541_vm1, %v2672_v52  ;;  %v2439_v34 = vadd.f32 %v2993_v17, %v4451_v32  ;;  %v2430_v36 = vpop.f32.mrb[25].mxu1 }
 0xb3e   :  { %2551 = vst.msk [vmem:[%s4559_s26 + $0x24] sm:$0xf] %vm2541_vm1, %v2670_v24  ;;  %v2431_v33 = vadd.f32 %v4451_v32, %v2430_v36  ;;  %v2994_v35 = vpop.f32.mrb[26].mxu1 }
 0xb3f   :  { %v2475_v16 = vmax.f32 %v2439_v34, 0.0  ;;  %v2442_v54 = vadd.f32 %v2994_v35, %v4451_v32  ;;  %v2433_v61 = vpop.f32.mrb[27].mxu1 }
 0xb40   :  { %v2473_v56 = vmax.f32 %v2431_v33, 0.0  ;;  %v2434_v43 = vadd.f32 %v4451_v32, %v2433_v61 }
 0xb41   :  { %v2675_v20 = vpack.c.bf16 %v2475_v16, %v2475_v16  ;;  %v2476_v13 = vmax.f32 %v2442_v54, 0.0 }
 0xb42   :  { %v2673_v27 = vpack.c.bf16 %v2473_v56, %v2473_v56  ;;  %v2474_v7 = vmax.f32 %v2434_v43, 0.0 }
 0xb43   :  { %2556 = vst.msk [vmem:[%s4559_s26 + $0x38] sm:$0xf] %vm2541_vm1, %v2675_v20  ;;  %v2676_v21 = vpack.c.bf16 %v2476_v13, %v2476_v13 }
 0xb44   :  { %2554 = vst.msk [vmem:[%s4559_s26 + $0x30] sm:$0xf] %vm2541_vm1, %v2673_v27  ;;  %v2674_v31 = vpack.c.bf16 %v2474_v7, %v2474_v7 }
 0xb45   :  { %2557 = vst.msk [vmem:[%s4559_s26 + $0x3c] sm:$0xf] %vm2541_vm1, %v2676_v21 }
 0xb46   :  { %2555 = vst.msk [vmem:[%s4559_s26 + $0x34] sm:$0xf] %vm2541_vm1, %v2674_v31 }

// kernel: gnn_forward.5
= control target key start
LH: loop header
LB: loop body
LE: loop exit
PB: predicated region body
PF: predicated region fallthrough
CT: control target
= control target key end

     0   :  { %s3549_s21 = smov 127   ;;  %s3550_s22 = smov 126   ;;  %v4578_v2 = vmov 0.0   ;;  %vm3553_vm0 = vmmov 0   ;;  %v3554_v5 = vmov 0   ;;  %s4542_s0 = inlined_call_operand.vmem [shape: bf16[2,32,64], index: 0, kind: input, shape index: {}]   ;;  %s4543_s1 = inlined_call_operand.vmem [shape: bf16[16,128], index: 1, kind: input, shape index: {}]   ;;  %s4544_s2 = inlined_call_operand.vmem [shape: f32[16,1], index: 2, kind: input, shape index: {}]   ;;  %s4545_s3 = inlined_call_operand.vmem [shape: bf16[16,64], index: 3, kind: input, shape index: {}]   ;;  %s4546_s4 = inlined_call_operand.vmem [shape: f32[16,1], index: 4, kind: input, shape index: {}]   ;;  %s4547_s5 = inlined_call_operand.vmem [shape: bf16[16,64], index: 5, kind: input, shape index: {}]   ;;  %s4548_s6 = inlined_call_operand.vmem [shape: f32[16,1], index: 6, kind: input, shape index: {}]   ;;  %s4549_s7 = inlined_call_operand.vmem [shape: bf16[16,55,32], index: 7, kind: input, shape index: {}]   ;;  %s4550_s8 = inlined_call_operand.vmem [shape: f32[1,32], index: 8, kind: input, shape index: {}]   ;;  %s4551_s9 = inlined_call_operand.vmem [shape: bf16[32,2], index: 9, kind: input, shape index: {}]   ;;  %s4552_s10 = inlined_call_operand.vmem [shape: f32[1,2], index: 10, kind: input, shape index: {}]   ;;  %s4553_s11 = inlined_call_operand.hbm [shape: f32[2,2], index: 11, kind: output, shape index: {}]  }
   0x1   :  { %v3448_v0 = vld [vmem:[%s4542_s0] sm:$0xff]   ;;  %v3449_v1 = vld [vmem:[%s4542_s0 + $0x8] sm:$0xff]   ;;  %2958 = vmatprep.subr.bf16.mxu0 %v4578_v2  ;;  %2978 = vmatprep.subr.bf16.mxu1 %v4578_v2  ;;  %s3552_s23 = smov 125  }
   0x2   :  { %56 = vrot.lane.b32.xlu0 %v3448_v0, %s3549_s21  ;;  %62 = vrot.lane.b32.xlu1 %v3448_v0, %s3550_s22  ;;  %v76_v3 = vld [vmem:[%s4544_s2] sm:$0xff]  ;;  %v77_v4 = vld [vmem:[%s4544_s2 + $0x8] sm:$0xff] }
   0x3   :  { %2959 = vmatpush3.bf16.msra.mxu0 %v3448_v0  ;;  %2974 = vmatprep.mubr.msk.bf16.mxu0 %vm3553_vm0, %v4578_v2 }
   0x4   :  { %2960 = vmatprep.subr.bf16.mxu0 %v4578_v2  ;;  %2986 = vmatprep.mubr.msk.bf16.mxu1 %vm3553_vm0, %v4578_v2 }
   0x5   :  { %3446 = vset.pattern.permute.xlu0 %v3554_v5  ;;  %3447 = vset.pattern.permute.xlu1 %v3554_v5 }
   0x6   :  { %58 = vrot.lane.b32.xlu0 %v3449_v1, %s3549_s21  ;;  %64 = vrot.lane.b32.xlu1 %v3449_v1, %s3550_s22 }
   0x7   :  { %2961 = vmatpush3.bf16.msra.mxu0 %v3449_v1 }
   0x8   :  { %2962 = vmatprep.subr.bf16.mxu0 %v4578_v2 }
   0xa   :  { %68 = vrot.lane.b32.xlu0 %v3448_v0, %s3552_s23  ;;  %70 = vrot.lane.b32.xlu1 %v3449_v1, %s3552_s23 }
   0xe   :  { %80 = vperm.xlu0 %3446, %v76_v3   ;;  %85 = vperm.xlu1 %3447, %v77_v4  }
   0xf   :  { %16 = vsyncpa [#allocation3], 0  ;;  %v3651_v12 = vld [vmem:[%s4543_s1] sm:$0xff]   ;;  %v151_v25 = vld [vmem:[%s4546_s4 + $0x8] sm:$0xff]  ;;  %vm167_vm1 = vcmask 523264   ;;  %vm334_vm2 = vcmask 1042432  }
  0x10   :  { %v150_v24 = vld [vmem:[%s4546_s4] sm:$0xff]  ;;  %v228_v42 = vld [vmem:[%s4548_s6 + $0x8] sm:$0xff]  ;;  %v3744_v51 = vld [vmem:[%s4549_s7 + $0x10] sm:$0xff]   ;;  %vm335_vm3 = vcmask 1043456   ;;  %v3555_v53 = vmov 65535   ;;  %vm330_vm4 = vcmask 449536  }
  0x11   :  { %v3678_v29 = vld [vmem:[%s4545_s3] sm:$0xff]   ;;  %v3734_v50 = vld [vmem:[%s4549_s7 + $0x8] sm:$0xff]   ;;  %v336_v54 = vsel %vm334_vm2, 4294967295, %v3555_v53  ;;  %v3459_v55 = vld [vmem:[%s4549_s7 + $0x18] ss:$0 sps:$4 sm:$0xff]   ;;  %vm2440_vm5 = vcmask 1040384  }
  0x12   :  { %v227_v41 = vld [vmem:[%s4548_s6] sm:$0xff]  ;;  %v3750_v52 = vld [vmem:[%s4549_s7 + $0x2c] sm:$0xff]   ;;  %v3756_v56 = vsel %vm335_vm3, %v336_v54, 0  ;;  %v3460_v58 = vld [vmem:[%s4549_s7 + $0x34] ss:$0 sps:$4 sm:$0xff]   ;;  %vm2466_vm6 = vcmask 261120  }
  0x13   :  { %v3704_v43 = vld [vmem:[%s4549_s7 + $0x1c] sm:$0xff]   ;;  %v3710_v44 = vld [vmem:[%s4549_s7 + $0x24] sm:$0xff]   ;;  %v3760_v57 = vand.u32 %v3459_v55, %v3756_v56  ;;  %v3768_v59 = vand.u32 %v3460_v58, %v3756_v56  ;;  %v3776_v60 = vld [vmem:[%s4542_s0 + $0x10] sm:$0xff]   ;;  %vm2510_vm7 = vcmask 9216  }
  0x14   :  { %v3720_v48 = vld [vmem:[%s4547_s5] sm:$0xff]   ;;  %v3783_v61 = vld [vmem:[%s4542_s0 + $0x18] sm:$0xff]  }
  0x15   :  { %v3725_v49 = vld [vmem:[%s4549_s7] sm:$0xff]   ;;  %v3485_v53 = vld [vmem:[%s4549_s7 + $0xdc] ss:$0 sps:$4 sm:$0xff]  }
  0x16   :  { %v3984_v54 = vld [vmem:[%s4549_s7 + $0xb8] sm:$0xff]   ;;  %v3486_v55 = vld [vmem:[%s4549_s7 + $0xc0] ss:$0 sps:$4 sm:$0xff]   ;;  %v3992_v58 = vand.u32 %v3485_v53, %v3756_v56 }
  0x74   :  { %v57_v6 = vpop.permute.xlu0 %56  ;;  %v63_v8 = vpop.permute.xlu1 %62 }
  0x75   :  { %2963 = vmatpush3.bf16.msra.mxu0 %v57_v6 }
  0x76   :  { %2964 = vmatprep.subr.bf16.mxu0 %v4578_v2 }
  0x78   :  { %v59_v7 = vpop.permute.xlu0 %58  ;;  %v65_v9 = vpop.permute.xlu1 %64 }
  0x79   :  { %2965 = vmatpush3.bf16.msra.mxu0 %v59_v7 }
  0x7a   :  { %2966 = vmatprep.subr.bf16.mxu0 %v4578_v2 }
  0x7c   :  { %v69_v10 = vpop.permute.xlu0 %68  ;;  %v71_v11 = vpop.permute.xlu1 %70 }
  0x7d   :  { %2967 = vmatpush3.bf16.msra.mxu0 %v63_v8 }
  0x7e   :  { %2968 = vmatprep.subr.bf16.mxu0 %v4578_v2 }
  0x81   :  { %2969 = vmatpush3.bf16.msra.mxu0 %v65_v9  ;;  %v3804_v9 = vld [vmem:[%s4549_s7 + $0x54] sm:$0xff]  }
  0x82   :  { %2970 = vmatprep.subr.bf16.mxu0 %v4578_v2 }
  0x85   :  { %2971 = vmatpush3.bf16.msra.mxu0 %v69_v10 }
  0x86   :  { %2972 = vmatprep.subr.bf16.mxu0 %v4578_v2 }
  0x89   :  { %2973 = vmatpush3.bf16.msra.mxu0 %v71_v11  ;;  %v3811_v11 = vld [vmem:[%s4549_s7 + $0x38] sm:$0xff]  }
  0x8a   :  { %3002 = vmatprep.subr.bf16.mxu0 %v4578_v2 }
  0x8c   :  { %2975 = vmatmul.mubr.bf16.vlgmr.msra.gmra.mrb[0].mxu0 %v3651_v12 }
  0x8d   :  { %3010 = vmatprep.mubr.msk.bf16.mxu0 %vm3553_vm0, %v4578_v2  ;;  %v3657_v13 = vpop.permute.xlu0 %80  ;;  %v3659_v15 = vpop.permute.xlu1 %85  ;;  %3003 = vmatpush3.bf16.msra.mxu0 %v3704_v43 }
  0x8e   :  { %3004 = vmatprep.subr.bf16.mxu0 %v4578_v2 }
  0x91   :  { %3005 = vmatpush3.bf16.msra.mxu0 %v3710_v44 }
  0x92   :  { %3006 = vmatprep.subr.bf16.mxu0 %v4578_v2 }
  0x95   :  { %3007 = vmatpush3.bf16.msra.mxu0 %v3750_v52 }
  0x96   :  { %3008 = vmatprep.subr.bf16.mxu0 %v4578_v2 }
  0x99   :  { %3009 = vmatpush3.bf16.msra.mxu0 %v3768_v59 }
  0x9a   :  { %3026 = vmatprep.subr.bf16.mxu0 %v4578_v2 }
 0x15f   :  { %v128_v14 = vpop.f32.mrb[0].mxu0 }
 0x160   :  { %v129_v16 = vadd.f32 %v128_v14, %v3657_v13  ;;  %v2976_v17 = vpop.f32.mrb[1].mxu0 }
 0x161   :  { %v131_v18 = vpop.f32.mrb[2].mxu0  ;;  %v3833_v17 = vld [vmem:[%s4549_s7 + $0x40] sm:$0xff]  }
 0x162   :  { %v132_v19 = vadd.f32 %v131_v18, %v3659_v15  ;;  %v2977_v20 = vpop.f32.mrb[3].mxu0  ;;  %v135_v21 = vmax.f32 %v129_v16, 0.0  ;;  %v3822_v16 = vld [vmem:[%s4549_s7 + $0x5c] sm:$0xff]   ;;  %v3842_v18 = vld [vmem:[%s4549_s7 + $0x64] sm:$0xff]  }
 0x163   :  { %v3852_v20 = vld [vmem:[%s4549_s7 + $0x48] sm:$0xff]  }
 0x164   :  { %v136_v22 = vmax.f32 %v132_v19, 0.0  ;;  %v3469_v19 = vld [vmem:[%s4549_s7 + $0x6c] ss:$0 sps:$4 sm:$0xff]  }
 0x166   :  { %v137_v23 = vpack.c.bf16 %v136_v22, %v135_v21  ;;  %v3470_v21 = vld [vmem:[%s4549_s7 + $0x50] ss:$0 sps:$4 sm:$0xff]   ;;  %v3860_v22 = vand.u32 %v3469_v19, %v3756_v56  ;;  %v3493_v19 = vld [vmem:[%s4549_s7 + $0x114] ss:$0 sps:$4 sm:$0xff]  }
 0x168   :  { %142 = vrot.lane.b32.xlu0 %v137_v23, %s3550_s22  ;;  %139 = vrot.lane.b32.xlu1 %v137_v23, %s3549_s21 }
 0x169   :  { %2979 = vmatpush3.bf16.msra.mxu1 %v137_v23 }
 0x16a   :  { %2980 = vmatprep.subr.bf16.mxu1 %v4578_v2 }
 0x16c   :  { %154 = vperm.xlu0 %3446, %v150_v24   ;;  %145 = vrot.lane.b32.xlu1 %v137_v23, %s3552_s23  ;;  %v3865_v23 = vand.u32 %v3470_v21, %v3756_v56  ;;  %v3872_v24 = vld [vmem:[%s4549_s7 + $0x8c] sm:$0xff]  }
 0x16d   :  { %v4050_v21 = vld [vmem:[%s4549_s7 + $0xf0] sm:$0xff]  }
 0x16e   :  { %4583 = vst [vmem:[#allocation5_spill] sm:$0xff] %v4050_v21 }
 0x170   :  { %159 = vperm.xlu1 %3447, %v151_v25  }
 0x1da   :  { %v140_v26 = vpop.permute.xlu1 %139  ;;  %v143_v27 = vpop.permute.xlu0 %142 }
 0x1db   :  { %2981 = vmatpush3.bf16.msra.mxu1 %v140_v26  ;;  %v3880_v26 = vld [vmem:[%s4549_s7 + $0x70] sm:$0xff]  }
 0x1dc   :  { %2982 = vmatprep.subr.bf16.mxu1 %v4578_v2 }
 0x1de   :  { %v146_v28 = vpop.permute.xlu1 %145 }
 0x1df   :  { %2983 = vmatpush3.bf16.msra.mxu1 %v143_v27 }
 0x1e0   :  { %2984 = vmatprep.subr.bf16.mxu1 %v4578_v2 }
 0x1e3   :  { %2985 = vmatpush3.bf16.msra.mxu1 %v146_v28  ;;  %v3889_v28 = vld [vmem:[%s4549_s7 + $0x94] sm:$0xff]  }
 0x1e4   :  { %2990 = vmatprep.subr.bf16.mxu1 %v4578_v2 }
 0x1e6   :  { %2987 = vmatmul.mubr.msk.bf16.vlgmr.msra.gmra.mrb[0].mxu1 %vm167_vm1, %v3678_v29 }
 0x1e7   :  { %2998 = vmatprep.mubr.msk.bf16.mxu1 %vm3553_vm0, %v4578_v2 }
 0x1eb   :  { %v3685_v30 = vpop.permute.xlu0 %154 }
 0x1ef   :  { %v3688_v34 = vpop.permute.xlu1 %159 }
 0x2b9   :  { %v205_v31 = vpop.f32.mrb[0].mxu1 }
 0x2ba   :  { %v206_v32 = vadd.f32 %v205_v31, %v3685_v30  ;;  %v2988_v33 = vpop.f32.mrb[1].mxu1  ;;  %v3899_v31 = vld [vmem:[%s4549_s7 + $0x78] sm:$0xff]  }
 0x2bb   :  { %v208_v35 = vpop.f32.mrb[2].mxu1  ;;  %v3477_v33 = vld [vmem:[%s4549_s7 + $0xa4] ss:$0 sps:$4 sm:$0xff]  }
 0x2bc   :  { %v209_v36 = vadd.f32 %v208_v35, %v3688_v34  ;;  %v2989_v37 = vpop.f32.mrb[3].mxu1  ;;  %v212_v38 = vmax.f32 %v206_v32, 0.0  ;;  %v3908_v32 = vld [vmem:[%s4549_s7 + $0x9c] sm:$0xff]  }
 0x2bd   :  { %v3918_v35 = vld [vmem:[%s4549_s7 + $0x80] sm:$0xff]   ;;  %v3926_v37 = vand.u32 %v3477_v33, %v3756_v56 }
 0x2be   :  { %v213_v39 = vmax.f32 %v209_v36, 0.0  ;;  %v3478_v36 = vld [vmem:[%s4549_s7 + $0x88] ss:$0 sps:$4 sm:$0xff]  }
 0x2c0   :  { %v214_v40 = vpack.c.bf16 %v213_v39, %v212_v38  ;;  %v3931_v38 = vand.u32 %v3478_v36, %v3756_v56  ;;  %v3938_v39 = vld [vmem:[%s4549_s7 + $0xc4] sm:$0xff]   ;;  %v4070_v36 = vld [vmem:[%s4549_s7 + $0x134] sm:$0xff]  }
 0x2c1   :  { %4586 = vst [vmem:[#allocation8_spill] sm:$0xff] %v4070_v36 }
 0x2c2   :  { %219 = vrot.lane.b32.xlu1 %v214_v40, %s3550_s22  ;;  %216 = vrot.lane.b32.xlu0 %v214_v40, %s3549_s21 }
 0x2c3   :  { %2991 = vmatpush3.bf16.msra.mxu1 %v214_v40 }
 0x2c4   :  { %2992 = vmatprep.subr.bf16.mxu1 %v4578_v2 }
 0x2c6   :  { %231 = vperm.xlu1 %3447, %v227_v41   ;;  %222 = vrot.lane.b32.xlu0 %v214_v40, %s3552_s23  ;;  %v3946_v41 = vld [vmem:[%s4549_s7 + $0xa8] sm:$0xff]  }
 0x2ca   :  { %236 = vperm.xlu0 %3446, %v228_v42   ;;  %1546 = vrot.lane.b32.xlu1 %v3776_v60, %s3549_s21 }
 0x2ce   :  { %1548 = vrot.lane.b32.xlu0 %v3783_v61, %s3549_s21  ;;  %1552 = vrot.lane.b32.xlu1 %v3776_v60, %s3550_s22 }
 0x2d2   :  { %1554 = vrot.lane.b32.xlu0 %v3783_v61, %s3550_s22  ;;  %1558 = vrot.lane.b32.xlu1 %v3776_v60, %s3552_s23 }
 0x2d6   :  { %1560 = vrot.lane.b32.xlu0 %v3783_v61, %s3552_s23 }
 0x334   :  { %v217_v45 = vpop.permute.xlu0 %216  ;;  %v220_v46 = vpop.permute.xlu1 %219 }
 0x335   :  { %2993 = vmatpush3.bf16.msra.mxu1 %v217_v45  ;;  %v3955_v45 = vld [vmem:[%s4549_s7 + $0xcc] sm:$0xff]  }
 0x336   :  { %2994 = vmatprep.subr.bf16.mxu1 %v4578_v2 }
 0x338   :  { %v223_v47 = vpop.permute.xlu0 %222 }
 0x339   :  { %2995 = vmatpush3.bf16.msra.mxu1 %v220_v46  ;;  %v3965_v46 = vld [vmem:[%s4549_s7 + $0xb0] sm:$0xff]  }
 0x33a   :  { %2996 = vmatprep.subr.bf16.mxu1 %v4578_v2 }
 0x33d   :  { %2997 = vmatpush3.bf16.msra.mxu1 %v223_v47  ;;  %v3974_v47 = vld [vmem:[%s4549_s7 + $0xd4] sm:$0xff]  }
 0x33e   :  { %3014 = vmatprep.subr.bf16.mxu1 %v4578_v2 }
 0x340   :  { %2999 = vmatmul.mubr.msk.bf16.vlgmr.msra.gmra.mrb[4].mxu1 %vm167_vm1, %v3720_v48 }
 0x341   :  { %3015 = vmatpush3.bf16.msra.mxu1 %v3725_v49  ;;  %3022 = vmatprep.mubr.msk.bf16.mxu1 %vm3553_vm0, %v4578_v2 }
 0x342   :  { %3016 = vmatprep.subr.bf16.mxu1 %v4578_v2 }
 0x345   :  { %3017 = vmatpush3.bf16.msra.mxu1 %v3734_v50  ;;  %v3795_v62 = vpop.permute.xlu1 %231 }
 0x346   :  { %3018 = vmatprep.subr.bf16.mxu1 %v4578_v2 }
 0x349   :  { %3019 = vmatpush3.bf16.msra.mxu1 %v3744_v51  ;;  %v3798_v3 = vpop.permute.xlu0 %236 }
 0x34a   :  { %3020 = vmatprep.subr.bf16.mxu1 %v4578_v2 }
 0x34d   :  { %3021 = vmatpush3.bf16.msra.mxu1 %v3760_v57 }
 0x34e   :  { %3038 = vmatprep.subr.bf16.mxu1 %v4578_v2 }
 0x413   :  { %v281_v63 = vpop.f32.mrb[4].mxu1 }
 0x414   :  { %v282_v0 = vadd.f32 %v281_v63, %v3795_v62  ;;  %v3000_v1 = vpop.f32.mrb[5].mxu1  ;;  %v3997_v63 = vand.u32 %v3486_v55, %v3756_v56  ;;  %v4087_v55 = vld [vmem:[%s4549_s7 + $0x13c] sm:$0xff]  }
 0x415   :  { %v284_v4 = vpop.f32.mrb[6].mxu1  ;;  %4588 = vst [vmem:[#allocation10_spill] sm:$0xff] %v4087_v55 }
 0x416   :  { %v285_v5 = vadd.f32 %v284_v4, %v3798_v3  ;;  %v3001_v6 = vpop.f32.mrb[7].mxu1  ;;  %v288_v7 = vmax.f32 %v282_v0, 0.0  ;;  %v4004_v0 = vld [vmem:[%s4549_s7 + $0xfc] sm:$0xff]  }
 0x417   :  { %v4012_v4 = vld [vmem:[%s4549_s7 + $0xe0] sm:$0xff]  }
 0x418   :  { %v289_v8 = vmax.f32 %v285_v5, 0.0  ;;  %v4021_v6 = vld [vmem:[%s4549_s7 + $0x104] sm:$0xff]  }
 0x41a   :  { %v3806_v10 = vpack.c.bf16 %v289_v8, %v288_v7  ;;  %v4031_v7 = vld [vmem:[%s4549_s7 + $0xe8] sm:$0xff]  }
 0x41b   :  { %v4040_v8 = vld [vmem:[%s4549_s7 + $0x10c] sm:$0xff]  }
 0x41c   :  { %3023 = vmatmul.mubr.msk.bf16.vlgmr.msra.gmra.mrb[8].mxu1 %vm330_vm4, %v3806_v10  ;;  %v3816_v14 = vshrl.u32 %v3806_v10, 16  ;;  %v456_v27 = vrot.slane %v3806_v10, 1  ;;  %v610_v42 = vrot.slane %v3806_v10, 2  ;;  %v764_v5 = vrot.slane %v3806_v10, 3 }
 0x41d   :  { %3039 = vmatpush3.bf16.msra.mxu1 %v3804_v9  ;;  %3046 = vmatprep.mubr.msk.bf16.mxu1 %vm3553_vm0, %v4578_v2  ;;  %v918_v53 = vrot.slane %v3806_v10, 4 }
 0x41e   :  { %3011 = vmatmul.mubr.msk.bf16.vlgmr.msra.gmra.mrb[4].mxu0 %vm330_vm4, %v3816_v14  ;;  %3040 = vmatprep.subr.bf16.mxu1 %v4578_v2  ;;  %v533_v25 = vrot.slane %v3816_v14, 1  ;;  %v687_v40 = vrot.slane %v3816_v14, 2  ;;  %v841_v1 = vrot.slane %v3816_v14, 3 }
 0x41f   :  { %3027 = vmatpush3.bf16.msra.mxu0 %v3811_v11  ;;  %3034 = vmatprep.mubr.msk.bf16.mxu0 %vm3553_vm0, %v4578_v2 }
 0x420   :  { %3028 = vmatprep.subr.bf16.mxu0 %v4578_v2 }
 0x421   :  { %3041 = vmatpush3.bf16.msra.mxu1 %v3822_v16 }
 0x422   :  { %3042 = vmatprep.subr.bf16.mxu1 %v4578_v2 }
 0x423   :  { %3029 = vmatpush3.bf16.msra.mxu0 %v3833_v17 }
 0x424   :  { %3030 = vmatprep.subr.bf16.mxu0 %v4578_v2 }
 0x425   :  { %3043 = vmatpush3.bf16.msra.mxu1 %v3842_v18 }
 0x426   :  { %3044 = vmatprep.subr.bf16.mxu1 %v4578_v2 }
 0x427   :  { %3031 = vmatpush3.bf16.msra.mxu0 %v3852_v20 }
 0x428   :  { %3032 = vmatprep.subr.bf16.mxu0 %v4578_v2 }
 0x429   :  { %3045 = vmatpush3.bf16.msra.mxu1 %v3860_v22 }
 0x42a   :  { %3062 = vmatprep.subr.bf16.mxu1 %v4578_v2 }
 0x42b   :  { %3033 = vmatpush3.bf16.msra.mxu0 %v3865_v23 }
 0x42c   :  { %3047 = vmatmul.mubr.msk.bf16.vlgmr.msra.gmra.mrb[12].mxu1 %vm330_vm4, %v533_v25  ;;  %3050 = vmatprep.subr.bf16.mxu0 %v4578_v2  ;;  %v3494_v25 = vld [vmem:[%s4549_s7 + $0xf8] ss:$0 sps:$4 sm:$0xff]  }
 0x42d   :  { %3063 = vmatpush3.bf16.msra.mxu1 %v3872_v24  ;;  %3070 = vmatprep.mubr.msk.bf16.mxu1 %vm3553_vm0, %v4578_v2  ;;  %v4063_v33 = vand.u32 %v3494_v25, %v3756_v56  ;;  %v4116_v25 = vld [vmem:[%s4549_s7 + $0x128] sm:$0xff]  }
 0x42e   :  { %3035 = vmatmul.mubr.msk.bf16.vlgmr.msra.gmra.mrb[8].mxu0 %vm330_vm4, %v456_v27  ;;  %3064 = vmatprep.subr.bf16.mxu1 %v4578_v2  ;;  %v4058_v27 = vand.u32 %v3493_v19, %v3756_v56  ;;  %v3501_v19 = vld [vmem:[%s4549_s7 + $0x14c] ss:$0 sps:$4 sm:$0xff]   ;;  %4591 = vst [vmem:[#allocation13_spill] sm:$0xff] %v4116_v25 }
 0x42f   :  { %3051 = vmatpush3.bf16.msra.mxu0 %v3880_v26  ;;  %3058 = vmatprep.mubr.msk.bf16.mxu0 %vm3553_vm0, %v4578_v2  ;;  %4585 = vst [vmem:[#allocation7_spill] sm:$0xff] %v4063_v33 }
 0x430   :  { %3052 = vmatprep.subr.bf16.mxu0 %v4578_v2  ;;  %4584 = vst [vmem:[#allocation6_spill] sm:$0xff] %v4058_v27 }
 0x431   :  { %3065 = vmatpush3.bf16.msra.mxu1 %v3889_v28 }
 0x432   :  { %3066 = vmatprep.subr.bf16.mxu1 %v4578_v2 }
 0x433   :  { %3053 = vmatpush3.bf16.msra.mxu0 %v3899_v31 }
 0x434   :  { %3054 = vmatprep.subr.bf16.mxu0 %v4578_v2 }
 0x435   :  { %3067 = vmatpush3.bf16.msra.mxu1 %v3908_v32 }
 0x436   :  { %3068 = vmatprep.subr.bf16.mxu1 %v4578_v2 }
 0x437   :  { %3055 = vmatpush3.bf16.msra.mxu0 %v3918_v35 }
 0x438   :  { %3056 = vmatprep.subr.bf16.mxu0 %v4578_v2 }
 0x439   :  { %3069 = vmatpush3.bf16.msra.mxu1 %v3926_v37 }
 0x43a   :  { %3086 = vmatprep.subr.bf16.mxu1 %v4578_v2 }
 0x43b   :  { %3057 = vmatpush3.bf16.msra.mxu0 %v3931_v38 }
 0x43c   :  { %3071 = vmatmul.mubr.msk.bf16.vlgmr.msra.gmra.mrb[16].mxu1 %vm330_vm4, %v687_v40  ;;  %3074 = vmatprep.subr.bf16.mxu0 %v4578_v2  ;;  %v995_v40 = vrot.slane %v3816_v14, 4 }
 0x43d   :  { %3087 = vmatpush3.bf16.msra.mxu1 %v3938_v39  ;;  %3094 = vmatprep.mubr.msk.bf16.mxu1 %vm3553_vm0, %v4578_v2 }
 0x43e   :  { %3059 = vmatmul.mubr.msk.bf16.vlgmr.msra.gmra.mrb[12].mxu0 %vm330_vm4, %v610_v42  ;;  %3088 = vmatprep.subr.bf16.mxu1 %v4578_v2  ;;  %v4078_v42 = vld [vmem:[%s4549_s7 + $0x118] sm:$0xff]  }
 0x43f   :  { %3075 = vmatpush3.bf16.msra.mxu0 %v3946_v41  ;;  %3082 = vmatprep.mubr.msk.bf16.mxu0 %vm3553_vm0, %v4578_v2  ;;  %4587 = vst [vmem:[#allocation9_spill] sm:$0xff] %v4078_v42 }
 0x440   :  { %3076 = vmatprep.subr.bf16.mxu0 %v4578_v2 }
 0x441   :  { %3089 = vmatpush3.bf16.msra.mxu1 %v3955_v45 }
 0x442   :  { %3090 = vmatprep.subr.bf16.mxu1 %v4578_v2 }
 0x443   :  { %3077 = vmatpush3.bf16.msra.mxu0 %v3965_v46 }
 0x444   :  { %3078 = vmatprep.subr.bf16.mxu0 %v4578_v2 }
 0x445   :  { %3091 = vmatpush3.bf16.msra.mxu1 %v3974_v47 }
 0x446   :  { %3092 = vmatprep.subr.bf16.mxu1 %v4578_v2 }
 0x447   :  { %3079 = vmatpush3.bf16.msra.mxu0 %v3984_v54 }
 0x448   :  { %3080 = vmatprep.subr.bf16.mxu0 %v4578_v2 }
 0x449   :  { %3093 = vmatpush3.bf16.msra.mxu1 %v3992_v58 }
 0x44a   :  { %3110 = vmatprep.subr.bf16.mxu1 %v4578_v2 }
 0x44b   :  { %3081 = vmatpush3.bf16.msra.mxu0 %v3997_v63 }
 0x44c   :  { %3095 = vmatmul.mubr.msk.bf16.vlgmr.msra.gmra.mrb[20].mxu1 %vm330_vm4, %v841_v1  ;;  %3098 = vmatprep.subr.bf16.mxu0 %v4578_v2  ;;  %v4097_v1 = vld [vmem:[%s4549_s7 + $0x120] sm:$0xff]  }
 0x44d   :  { %3111 = vmatpush3.bf16.msra.mxu1 %v4004_v0  ;;  %3118 = vmatprep.mubr.msk.bf16.mxu1 %vm3553_vm0, %v4578_v2  ;;  %4589 = vst [vmem:[#allocation11_spill] sm:$0xff] %v4097_v1 }
 0x44e   :  { %3083 = vmatmul.mubr.msk.bf16.vlgmr.msra.gmra.mrb[16].mxu0 %vm330_vm4, %v764_v5  ;;  %3112 = vmatprep.subr.bf16.mxu1 %v4578_v2  ;;  %v4106_v5 = vld [vmem:[%s4549_s7 + $0x144] sm:$0xff]  }
 0x44f   :  { %3099 = vmatpush3.bf16.msra.mxu0 %v4012_v4  ;;  %3106 = vmatprep.mubr.msk.bf16.mxu0 %vm3553_vm0, %v4578_v2  ;;  %4590 = vst [vmem:[#allocation12_spill] sm:$0xff] %v4106_v5 }
 0x450   :  { %3100 = vmatprep.subr.bf16.mxu0 %v4578_v2 }
 0x451   :  { %3113 = vmatpush3.bf16.msra.mxu1 %v4021_v6 }
 0x452   :  { %3114 = vmatprep.subr.bf16.mxu1 %v4578_v2 }
 0x453   :  { %3101 = vmatpush3.bf16.msra.mxu0 %v4031_v7 }
 0x454   :  { %3102 = vmatprep.subr.bf16.mxu0 %v4578_v2 }
 0x455   :  { %3115 = vmatpush3.bf16.msra.mxu1 %v4040_v8 }
 0x456   :  { %3116 = vmatprep.subr.bf16.mxu1 %v4578_v2 }
 0x457   :  { %3103 = vmatpush3.bf16.msra.mxu0 %v4050_v21 }
 0x458   :  { %3104 = vmatprep.subr.bf16.mxu0 %v4578_v2 }
 0x459   :  { %3117 = vmatpush3.bf16.msra.mxu1 %v4058_v27 }
 0x45a   :  { %3134 = vmatprep.subr.bf16.mxu1 %v4578_v2 }
 0x45b   :  { %3105 = vmatpush3.bf16.msra.mxu0 %v4063_v33 }
 0x45c   :  { %3119 = vmatmul.mubr.msk.bf16.vlgmr.msra.gmra.mrb[24].mxu1 %vm330_vm4, %v995_v40  ;;  %3122 = vmatprep.subr.bf16.mxu0 %v4578_v2  ;;  %v3502_v40 = vld [vmem:[%s4549_s7 + $0x130] ss:$0 sps:$4 sm:$0xff]  }
 0x45d   :  { %3135 = vmatpush3.bf16.msra.mxu1 %v4070_v36  ;;  %3142 = vmatprep.mubr.msk.bf16.mxu1 %vm3553_vm0, %v4578_v2 }
 0x45e   :  { %3107 = vmatmul.mubr.msk.bf16.vlgmr.msra.gmra.mrb[20].mxu0 %vm330_vm4, %v918_v53  ;;  %3136 = vmatprep.subr.bf16.mxu1 %v4578_v2  ;;  %v4124_v53 = vand.u32 %v3501_v19, %v3756_v56  ;;  %v4144_v19 = vld [vmem:[%s4549_s7 + $0x150] sm:$0xff]  }
 0x45f   :  { %3123 = vmatpush3.bf16.msra.mxu0 %v4078_v42  ;;  %3130 = vmatprep.mubr.msk.bf16.mxu0 %vm3553_vm0, %v4578_v2  ;;  %4595 = vst [vmem:[#allocation17_spill] sm:$0xff] %v4144_v19 }
 0x460   :  { %3124 = vmatprep.subr.bf16.mxu0 %v4578_v2  ;;  %4592 = vst [vmem:[#allocation14_spill] sm:$0xff] %v4124_v53 }
 0x461   :  { %3137 = vmatpush3.bf16.msra.mxu1 %v4087_v55  ;;  %v4136_v55 = vld [vmem:[%s4549_s7 + $0x16c] sm:$0xff]  }
 0x462   :  { %3138 = vmatprep.subr.bf16.mxu1 %v4578_v2  ;;  %4594 = vst [vmem:[#allocation16_spill] sm:$0xff] %v4136_v55 }
 0x463   :  { %3125 = vmatpush3.bf16.msra.mxu0 %v4097_v1  ;;  %v4129_v1 = vand.u32 %v3502_v40, %v3756_v56  ;;  %v1072_v40 = vrot.slane %v3806_v10, 5 }
 0x464   :  { %3126 = vmatprep.subr.bf16.mxu0 %v4578_v2 }
 0x465   :  { %3139 = vmatpush3.bf16.msra.mxu1 %v4106_v5  ;;  %4593 = vst [vmem:[#allocation15_spill] sm:$0xff] %v4129_v1  ;;  %v1149_v5 = vrot.slane %v3816_v14, 5 }
 0x466   :  { %3140 = vmatprep.subr.bf16.mxu1 %v4578_v2 }
 0x467   :  { %3127 = vmatpush3.bf16.msra.mxu0 %v4116_v25  ;;  %v4202_v25 = vld [vmem:[%s4549_s7 + $0x1a4] sm:$0xff]  }
 0x468   :  { %3128 = vmatprep.subr.bf16.mxu0 %v4578_v2  ;;  %4602 = vst [vmem:[#allocation24_spill] sm:$0xff] %v4202_v25 }
 0x469   :  { %3141 = vmatpush3.bf16.msra.mxu1 %v4124_v53  ;;  %v4153_v53 = vld [vmem:[%s4549_s7 + $0x174] sm:$0xff]  }
 0x46a   :  { %3158 = vmatprep.subr.bf16.mxu1 %v4578_v2  ;;  %4596 = vst [vmem:[#allocation18_spill] sm:$0xff] %v4153_v53 }
 0x46b   :  { %3129 = vmatpush3.bf16.msra.mxu0 %v4129_v1 }
 0x46c   :  { %3143 = vmatmul.mubr.msk.bf16.vlgmr.msra.gmra.mrb[28].mxu1 %vm330_vm4, %v1149_v5  ;;  %3146 = vmatprep.subr.bf16.mxu0 %v4578_v2  ;;  %v4163_v5 = vld [vmem:[%s4549_s7 + $0x158] sm:$0xff]  }
 0x46d   :  { %3159 = vmatpush3.bf16.msra.mxu1 %v4136_v55  ;;  %3166 = vmatprep.mubr.msk.bf16.mxu1 %vm3553_vm0, %v4578_v2  ;;  %4597 = vst [vmem:[#allocation19_spill] sm:$0xff] %v4163_v5  ;;  %v4182_v55 = vld [vmem:[%s4549_s7 + $0x160] sm:$0xff]  }
 0x46e   :  { %3131 = vmatmul.mubr.msk.bf16.vlgmr.msra.gmra.mrb[24].mxu0 %vm330_vm4, %v1072_v40  ;;  %3160 = vmatprep.subr.bf16.mxu1 %v4578_v2  ;;  %v4172_v40 = vld [vmem:[%s4549_s7 + $0x17c] sm:$0xff]   ;;  %4599 = vst [vmem:[#allocation21_spill] sm:$0xff] %v4182_v55 }
 0x46f   :  { %3147 = vmatpush3.bf16.msra.mxu0 %v4144_v19  ;;  %3154 = vmatprep.mubr.msk.bf16.mxu0 %vm3553_vm0, %v4578_v2  ;;  %4598 = vst [vmem:[#allocation20_spill] sm:$0xff] %v4172_v40  ;;  %v3509_v19 = vld [vmem:[%s4549_s7 + $0x184] ss:$0 sps:$4 sm:$0xff]  }
 0x470   :  { %3148 = vmatprep.subr.bf16.mxu0 %v4578_v2  ;;  %v4190_v1 = vand.u32 %v3509_v19, %v3756_v56  ;;  %v1226_v19 = vrot.slane %v3806_v10, 6 }
 0x471   :  { %3161 = vmatpush3.bf16.msra.mxu1 %v4153_v53  ;;  %v3510_v53 = vld [vmem:[%s4549_s7 + $0x168] ss:$0 sps:$4 sm:$0xff]  }
 0x472   :  { %3162 = vmatprep.subr.bf16.mxu1 %v4578_v2  ;;  %4600 = vst [vmem:[#allocation22_spill] sm:$0xff] %v4190_v1 }
 0x473   :  { %3149 = vmatpush3.bf16.msra.mxu0 %v4163_v5  ;;  %v4195_v5 = vand.u32 %v3510_v53, %v3756_v56  ;;  %v4210_v53 = vld [vmem:[%s4549_s7 + $0x188] sm:$0xff]  }
 0x474   :  { %3150 = vmatprep.subr.bf16.mxu0 %v4578_v2  ;;  %4603 = vst [vmem:[#allocation25_spill] sm:$0xff] %v4210_v53 }
 0x475   :  { %3163 = vmatpush3.bf16.msra.mxu1 %v4172_v40  ;;  %4601 = vst [vmem:[#allocation23_spill] sm:$0xff] %v4195_v5  ;;  %v1303_v40 = vrot.slane %v3816_v14, 6 }
 0x476   :  { %3164 = vmatprep.subr.bf16.mxu1 %v4578_v2 }
 0x477   :  { %3151 = vmatpush3.bf16.msra.mxu0 %v4182_v55  ;;  %v1457_v55 = vrot.slane %v3816_v14, 7 }
 0x478   :  { %3152 = vmatprep.subr.bf16.mxu0 %v4578_v2 }
 0x479   :  { %3165 = vmatpush3.bf16.msra.mxu1 %v4190_v1  ;;  %v4219_v1 = vld [vmem:[%s4549_s7 + $0x1ac] sm:$0xff]  }
 0x47a   :  { %3182 = vmatprep.subr.bf16.mxu1 %v4578_v2  ;;  %4604 = vst [vmem:[#allocation26_spill] sm:$0xff] %v4219_v1 }
 0x47b   :  { %3153 = vmatpush3.bf16.msra.mxu0 %v4195_v5 }
 0x47c   :  { %3167 = vmatmul.mubr.msk.bf16.vlgmr.msra.gmra.mrb[32].mxu1 %vm330_vm4, %v1303_v40  ;;  %3170 = vmatprep.subr.bf16.mxu0 %v4578_v2  ;;  %v4229_v40 = vld [vmem:[%s4549_s7 + $0x190] sm:$0xff]  }
 0x47d   :  { %3183 = vmatpush3.bf16.msra.mxu1 %v4202_v25  ;;  %3190 = vmatprep.mubr.msk.bf16.mxu1 %vm3553_vm0, %v4578_v2  ;;  %4605 = vst [vmem:[#allocation27_spill] sm:$0xff] %v4229_v40  ;;  %v4248_v25 = vld [vmem:[%s4549_s7 + $0x198] sm:$0xff]  }
 0x47e   :  { %3155 = vmatmul.mubr.msk.bf16.vlgmr.msra.gmra.mrb[28].mxu0 %vm330_vm4, %v1226_v19  ;;  %3184 = vmatprep.subr.bf16.mxu1 %v4578_v2  ;;  %v4238_v19 = vld [vmem:[%s4549_s7 + $0x1b4] sm:$0xff]   ;;  %4607 = vst [vmem:[#allocation29_spill] sm:$0xff] %v4248_v25 }
 0x47f   :  { %3171 = vmatpush3.bf16.msra.mxu0 %v4210_v53  ;;  %3178 = vmatprep.mubr.msk.bf16.mxu0 %vm3553_vm0, %v4578_v2  ;;  %4606 = vst [vmem:[#allocation28_spill] sm:$0xff] %v4238_v19  ;;  %v3517_v53 = vld [vmem:[%s4549_s7 + $0x1bc] ss:$0 sps:$4 sm:$0xff]  }
 0x480   :  { %3172 = vmatprep.subr.bf16.mxu0 %v4578_v2  ;;  %v4256_v5 = vand.u32 %v3517_v53, %v3756_v56  ;;  %v1380_v53 = vrot.slane %v3806_v10, 7  ;;  %v1549_v10 = vpop.permute.xlu0 %1548 }
 0x481   :  { %3185 = vmatpush3.bf16.msra.mxu1 %v4219_v1  ;;  %v3518_v1 = vld [vmem:[%s4549_s7 + $0x1a0] ss:$0 sps:$4 sm:$0xff]  }
 0x482   :  { %3186 = vmatprep.subr.bf16.mxu1 %v4578_v2  ;;  %4608 = vst [vmem:[#allocation30_spill] sm:$0xff] %v4256_v5 }
 0x483   :  { %3173 = vmatpush3.bf16.msra.mxu0 %v4229_v40  ;;  %v4261_v40 = vand.u32 %v3518_v1, %v3756_v56  ;;  %v1547_v56 = vpop.permute.xlu1 %1546 }
 0x484   :  { %3174 = vmatprep.subr.bf16.mxu0 %v4578_v2 }
 0x485   :  { %3187 = vmatpush3.bf16.msra.mxu1 %v4238_v19  ;;  %4609 = vst [vmem:[#allocation31_spill] sm:$0xff] %v4261_v40 }
 0x486   :  { %3188 = vmatprep.subr.bf16.mxu1 %v4578_v2 }
 0x487   :  { %3175 = vmatpush3.bf16.msra.mxu0 %v4248_v25  ;;  %v1553_v14 = vpop.permute.xlu1 %1552 }
 0x488   :  { %3176 = vmatprep.subr.bf16.mxu0 %v4578_v2 }
 0x489   :  { %3189 = vmatpush3.bf16.msra.mxu1 %v4256_v5 }
 0x48a   :  { %3214 = vmatprep.subr.bf16.mxu1 %v4578_v2 }
 0x48b   :  { %3177 = vmatpush3.bf16.msra.mxu0 %v4261_v40 }
 0x48c   :  { %3191 = vmatmul.mubr.msk.bf16.vlgmr.msra.gmra.mrb[36].mxu1 %vm330_vm4, %v1457_v55  ;;  %3194 = vmatprep.subr.bf16.mxu0 %v4578_v2  ;;  %v1559_v55 = vpop.permute.xlu1 %1558 }
 0x48d   :  { %3222 = vmatprep.mubr.msk.bf16.mxu1 %vm3553_vm0, %v4578_v2 }
 0x48e   :  { %3179 = vmatmul.mubr.msk.bf16.vlgmr.msra.gmra.mrb[32].mxu0 %vm330_vm4, %v1380_v53 }
 0x48f   :  { %3195 = vmatpush3.bf16.msra.mxu0 %v3776_v60  ;;  %3210 = vmatprep.mubr.msk.bf16.mxu0 %vm3553_vm0, %v4578_v2  ;;  %v1555_v60 = vpop.permute.xlu0 %1554 }
 0x490   :  { %3196 = vmatprep.subr.bf16.mxu0 %v4578_v2 }
 0x493   :  { %3197 = vmatpush3.bf16.msra.mxu0 %v3783_v61  ;;  %v1561_v61 = vpop.permute.xlu0 %1560 }
 0x494   :  { %3198 = vmatprep.subr.bf16.mxu0 %v4578_v2 }
 0x497   :  { %3199 = vmatpush3.bf16.msra.mxu0 %v1547_v56 }
 0x498   :  { %3200 = vmatprep.subr.bf16.mxu0 %v4578_v2 }
 0x49b   :  { %3201 = vmatpush3.bf16.msra.mxu0 %v1549_v10 }
 0x49c   :  { %3202 = vmatprep.subr.bf16.mxu0 %v4578_v2 }
 0x49f   :  { %3203 = vmatpush3.bf16.msra.mxu0 %v1553_v14 }
 0x4a0   :  { %3204 = vmatprep.subr.bf16.mxu0 %v4578_v2 }
 0x4a3   :  { %3205 = vmatpush3.bf16.msra.mxu0 %v1555_v60 }
 0x4a4   :  { %3206 = vmatprep.subr.bf16.mxu0 %v4578_v2 }
 0x4a7   :  { %3207 = vmatpush3.bf16.msra.mxu0 %v1559_v55 }
 0x4a8   :  { %3208 = vmatprep.subr.bf16.mxu0 %v4578_v2 }
 0x4ab   :  { %3209 = vmatpush3.bf16.msra.mxu0 %v1561_v61 }
 0x4ac   :  { %3238 = vmatprep.subr.bf16.mxu0 %v4578_v2 }
 0x4ae   :  { %3211 = vmatmul.mubr.bf16.vlgmr.msra.gmra.mrb[36].mxu0 %v3651_v12 }
 0x4af   :  { %3239 = vmatpush3.bf16.msra.mxu0 %v3704_v43  ;;  %3246 = vmatprep.mubr.msk.bf16.mxu0 %vm3553_vm0, %v4578_v2 }
 0x4b0   :  { %3240 = vmatprep.subr.bf16.mxu0 %v4578_v2 }
 0x4b3   :  { %3241 = vmatpush3.bf16.msra.mxu0 %v3710_v44 }
 0x4b4   :  { %3242 = vmatprep.subr.bf16.mxu0 %v4578_v2 }
 0x4b7   :  { %3243 = vmatpush3.bf16.msra.mxu0 %v3750_v52 }
 0x4b8   :  { %3244 = vmatprep.subr.bf16.mxu0 %v4578_v2 }
 0x4bb   :  { %3245 = vmatpush3.bf16.msra.mxu0 %v3768_v59 }
 0x4bc   :  { %3262 = vmatprep.subr.bf16.mxu0 %v4578_v2 }
 0x4ef   :  { %v441_v12 = vpop.f32.mrb[8].mxu1 }
 0x4f0   :  { %v3024_v1 = vpop.f32.mrb[9].mxu1 }
 0x4f1   :  { %v375_v43 = vpop.f32.mrb[4].mxu0  ;;  %v444_v53 = vpop.f32.mrb[10].mxu1 }
 0x4f2   :  { %v442_v56 = vadd.f32 %v441_v12, %v375_v43  ;;  %v3012_v10 = vpop.f32.mrb[5].mxu0  ;;  %v3025_v14 = vpop.f32.mrb[11].mxu1 }
 0x4f3   :  { %v378_v60 = vpop.f32.mrb[6].mxu0 }
 0x4f4   :  { %v3013_v55 = vpop.f32.mrb[7].mxu0 }
 0x4ff   :  { %v595_v44 = vpop.f32.mrb[12].mxu1 }
 0x500   :  { %v3048_v61 = vpop.f32.mrb[13].mxu1 }
 0x501   :  { %v518_v40 = vpop.f32.mrb[8].mxu0  ;;  %v598_v5 = vpop.f32.mrb[14].mxu1 }
 0x502   :  { %v524_v52 = vadd.f32 %v518_v40, %v442_v56  ;;  %v3036_v25 = vpop.f32.mrb[9].mxu0  ;;  %v3049_v19 = vpop.f32.mrb[15].mxu1 }
 0x503   :  { %v521_v42 = vpop.f32.mrb[10].mxu0 }
 0x504   :  { %v3037_v59 = vpop.f32.mrb[11].mxu0  ;;  %v601_v36 = vadd.f32 %v595_v44, %v524_v52 }
 0x50f   :  { %v749_v2 = vpop.f32.mrb[16].mxu1 }
 0x510   :  { %v3072_v33 = vpop.f32.mrb[17].mxu1 }
 0x511   :  { %v672_v1 = vpop.f32.mrb[12].mxu0  ;;  %v752_v27 = vpop.f32.mrb[18].mxu1 }
 0x512   :  { %v678_v53 = vadd.f32 %v672_v1, %v601_v36  ;;  %v3060_v12 = vpop.f32.mrb[13].mxu0  ;;  %v3073_v43 = vpop.f32.mrb[19].mxu1 }
 0x513   :  { %v675_v10 = vpop.f32.mrb[14].mxu0 }
 0x514   :  { %v3061_v14 = vpop.f32.mrb[15].mxu0  ;;  %v755_v60 = vadd.f32 %v749_v2, %v678_v53 }
 0x51f   :  { %v903_v55 = vpop.f32.mrb[20].mxu1 }
 0x520   :  { %v3096_v61 = vpop.f32.mrb[21].mxu1 }
 0x521   :  { %v826_v21 = vpop.f32.mrb[16].mxu0  ;;  %v906_v5 = vpop.f32.mrb[22].mxu1 }
 0x522   :  { %v832_v40 = vadd.f32 %v826_v21, %v755_v60  ;;  %v3084_v25 = vpop.f32.mrb[17].mxu0  ;;  %v3097_v19 = vpop.f32.mrb[23].mxu1 }
 0x523   :  { %v829_v42 = vpop.f32.mrb[18].mxu0 }
 0x524   :  { %v3085_v56 = vpop.f32.mrb[19].mxu0  ;;  %v909_v44 = vadd.f32 %v903_v55, %v832_v40 }
 0x52f   :  { %v1057_v52 = vpop.f32.mrb[24].mxu1 }
 0x530   :  { %v3120_v33 = vpop.f32.mrb[25].mxu1 }
 0x531   :  { %v980_v59 = vpop.f32.mrb[20].mxu0  ;;  %v1060_v27 = vpop.f32.mrb[26].mxu1 }
 0x532   :  { %v986_v36 = vadd.f32 %v980_v59, %v909_v44  ;;  %v3108_v1 = vpop.f32.mrb[21].mxu0  ;;  %v3121_v12 = vpop.f32.mrb[27].mxu1 }
 0x533   :  { %v983_v43 = vpop.f32.mrb[22].mxu0 }
 0x534   :  { %v3109_v10 = vpop.f32.mrb[23].mxu0  ;;  %v1063_v2 = vadd.f32 %v1057_v52, %v986_v36 }
 0x53f   :  { %v1211_v53 = vpop.f32.mrb[28].mxu1 }
 0x540   :  { %v3144_v14 = vpop.f32.mrb[29].mxu1 }
 0x541   :  { %v1134_v61 = vpop.f32.mrb[24].mxu0  ;;  %v1214_v5 = vpop.f32.mrb[30].mxu1 }
 0x542   :  { %v1140_v21 = vadd.f32 %v1134_v61, %v1063_v2  ;;  %v3132_v60 = vpop.f32.mrb[25].mxu0  ;;  %v3145_v25 = vpop.f32.mrb[31].mxu1 }
 0x543   :  { %v1137_v19 = vpop.f32.mrb[26].mxu0 }
 0x544   :  { %v3133_v42 = vpop.f32.mrb[27].mxu0  ;;  %v1217_v55 = vadd.f32 %v1211_v53, %v1140_v21 }
 0x54f   :  { %v1365_v40 = vpop.f32.mrb[32].mxu1 }
 0x550   :  { %v3168_v56 = vpop.f32.mrb[33].mxu1 }
 0x551   :  { %v1288_v33 = vpop.f32.mrb[28].mxu0  ;;  %v1368_v27 = vpop.f32.mrb[34].mxu1 }
 0x552   :  { %v1294_v44 = vadd.f32 %v1288_v33, %v1217_v55  ;;  %v3156_v59 = vpop.f32.mrb[29].mxu0  ;;  %v3169_v1 = vpop.f32.mrb[35].mxu1 }
 0x553   :  { %v1291_v12 = vpop.f32.mrb[30].mxu0  ;;  %v4610_v1 = vmov 0.0  }
 0x554   :  { %v3157_v43 = vpop.f32.mrb[31].mxu0  ;;  %v1371_v52 = vadd.f32 %v1365_v40, %v1294_v44 }
 0x55f   :  { %v1519_v36 = vpop.f32.mrb[36].mxu1 }
 0x560   :  { %v3192_v10 = vpop.f32.mrb[37].mxu1 }
 0x561   :  { %v1442_v14 = vpop.f32.mrb[32].mxu0  ;;  %v1522_v5 = vpop.f32.mrb[38].mxu1 }
 0x562   :  { %v1448_v2 = vadd.f32 %v1442_v14, %v1371_v52  ;;  %v3180_v61 = vpop.f32.mrb[33].mxu0  ;;  %v3193_v60 = vpop.f32.mrb[39].mxu1 }
 0x563   :  { %v1445_v25 = vpop.f32.mrb[34].mxu0 }
 0x564   :  { %v4297_v19 = vadd.f32 %v1519_v36, %v1448_v2  ;;  %v3181_v53 = vpop.f32.mrb[35].mxu0 }
 0x581   :  { %v1598_v21 = vpop.f32.mrb[36].mxu0 }
 0x582   :  { %v1599_v42 = vadd.f32 %v1598_v21, %v3657_v13  ;;  %v3212_v55 = vpop.f32.mrb[37].mxu0 }
 0x583   :  { %v1601_v56 = vpop.f32.mrb[38].mxu0 }
 0x584   :  { %v1602_v33 = vadd.f32 %v1601_v56, %v3659_v15  ;;  %v3213_v27 = vpop.f32.mrb[39].mxu0  ;;  %v1605_v40 = vmax.f32 %v1599_v42, 0.0 }
 0x585   :  { %v4632_v27 = vld [vmem:[#allocation26_spill] sm:$0xff] }
 0x586   :  { %v1606_v44 = vmax.f32 %v1602_v33, 0.0  ;;  %v4631_v33 = vld [vmem:[#allocation25_spill] sm:$0xff] }
 0x588   :  { %v1607_v59 = vpack.c.bf16 %v1606_v44, %v1605_v40  ;;  %v4633_v40 = vld [vmem:[#allocation27_spill] sm:$0xff]  ;;  %v4634_v44 = vld [vmem:[#allocation28_spill] sm:$0xff] }
 0x58a   :  { %1612 = vrot.lane.b32.xlu0 %v1607_v59, %s3550_s22  ;;  %1609 = vrot.lane.b32.xlu1 %v1607_v59, %s3549_s21 }
 0x58b   :  { %3215 = vmatpush3.bf16.msra.mxu1 %v1607_v59 }
 0x58c   :  { %3216 = vmatprep.subr.bf16.mxu1 %v4610_v1 }
 0x58e   :  { %1615 = vrot.lane.b32.xlu1 %v1607_v59, %s3552_s23  ;;  %v4635_v59 = vld [vmem:[#allocation29_spill] sm:$0xff] }
 0x5fc   :  { %v1610_v12 = vpop.permute.xlu1 %1609  ;;  %v1613_v13 = vpop.permute.xlu0 %1612 }
 0x5fd   :  { %3217 = vmatpush3.bf16.msra.mxu1 %v1610_v12  ;;  %v4636_v12 = vld [vmem:[#allocation30_spill] sm:$0xff] }
 0x5fe   :  { %3218 = vmatprep.subr.bf16.mxu1 %v4610_v1 }
 0x600   :  { %v1616_v15 = vpop.permute.xlu1 %1615 }
 0x601   :  { %3219 = vmatpush3.bf16.msra.mxu1 %v1613_v13 }
 0x602   :  { %3220 = vmatprep.subr.bf16.mxu1 %v4610_v1 }
 0x605   :  { %3221 = vmatpush3.bf16.msra.mxu1 %v1616_v15  ;;  %v4637_v15 = vld [vmem:[#allocation31_spill] sm:$0xff] }
 0x606   :  { %3226 = vmatprep.subr.bf16.mxu1 %v4610_v1 }
 0x608   :  { %3223 = vmatmul.mubr.msk.bf16.vlgmr.msra.gmra.mrb[40].mxu1 %vm167_vm1, %v3678_v29 }
 0x609   :  { %3234 = vmatprep.mubr.msk.bf16.mxu1 %vm3553_vm0, %v4610_v1 }
 0x6db   :  { %v1652_v43 = vpop.f32.mrb[40].mxu1 }
 0x6dc   :  { %v1653_v52 = vadd.f32 %v1652_v43, %v3685_v30  ;;  %v3224_v36 = vpop.f32.mrb[41].mxu1 }
 0x6dd   :  { %v1655_v10 = vpop.f32.mrb[42].mxu1  ;;  %v3520_v36 = vld [vmem:[%s4551_s9 + $0x8] sm:$0xff]  }
 0x6de   :  { %v1656_v14 = vadd.f32 %v1655_v10, %v3688_v34  ;;  %v3225_v5 = vpop.f32.mrb[43].mxu1  ;;  %v1659_v2 = vmax.f32 %v1653_v52, 0.0  ;;  %v3519_v52 = vld [vmem:[%s4551_s9] sm:$0xff]  }
 0x6e0   :  { %v1660_v61 = vmax.f32 %v1656_v14, 0.0 }
 0x6e2   :  { %v1661_v60 = vpack.c.bf16 %v1660_v61, %v1659_v2 }
 0x6e4   :  { %1666 = vrot.lane.b32.xlu1 %v1661_v60, %s3550_s22  ;;  %1663 = vrot.lane.b32.xlu0 %v1661_v60, %s3549_s21 }
 0x6e5   :  { %3227 = vmatpush3.bf16.msra.mxu1 %v1661_v60 }
 0x6e6   :  { %3228 = vmatprep.subr.bf16.mxu1 %v4610_v1 }
 0x6e8   :  { %1669 = vrot.lane.b32.xlu0 %v1661_v60, %s3552_s23 }
 0x756   :  { %v1664_v29 = vpop.permute.xlu0 %1663  ;;  %v1667_v30 = vpop.permute.xlu1 %1666 }
 0x757   :  { %3229 = vmatpush3.bf16.msra.mxu1 %v1664_v29 }
 0x758   :  { %3230 = vmatprep.subr.bf16.mxu1 %v4610_v1 }
 0x75a   :  { %v1670_v34 = vpop.permute.xlu0 %1669 }
 0x75b   :  { %3231 = vmatpush3.bf16.msra.mxu1 %v1667_v30 }
 0x75c   :  { %3232 = vmatprep.subr.bf16.mxu1 %v4610_v1 }
 0x75f   :  { %3233 = vmatpush3.bf16.msra.mxu1 %v1670_v34 }
 0x760   :  { %3250 = vmatprep.subr.bf16.mxu1 %v4610_v1 }
 0x762   :  { %3235 = vmatmul.mubr.msk.bf16.vlgmr.msra.gmra.mrb[44].mxu1 %vm167_vm1, %v3720_v48 }
 0x763   :  { %3251 = vmatpush3.bf16.msra.mxu1 %v3725_v49  ;;  %3258 = vmatprep.mubr.msk.bf16.mxu1 %vm3553_vm0, %v4610_v1 }
 0x764   :  { %3252 = vmatprep.subr.bf16.mxu1 %v4610_v1 }
 0x767   :  { %3253 = vmatpush3.bf16.msra.mxu1 %v3734_v50 }
 0x768   :  { %3254 = vmatprep.subr.bf16.mxu1 %v4610_v1 }
 0x76b   :  { %3255 = vmatpush3.bf16.msra.mxu1 %v3744_v51 }
 0x76c   :  { %3256 = vmatprep.subr.bf16.mxu1 %v4610_v1 }
 0x76f   :  { %3257 = vmatpush3.bf16.msra.mxu1 %v3760_v57 }
 0x770   :  { %3274 = vmatprep.subr.bf16.mxu1 %v4610_v1 }
 0x835   :  { %v1706_v48 = vpop.f32.mrb[44].mxu1 }
 0x836   :  { %v1707_v49 = vadd.f32 %v1706_v48, %v3795_v62  ;;  %v3236_v25 = vpop.f32.mrb[45].mxu1 }
 0x837   :  { %v1709_v53 = vpop.f32.mrb[46].mxu1 }
 0x838   :  { %v1710_v21 = vadd.f32 %v1709_v53, %v3798_v3  ;;  %v3237_v42 = vpop.f32.mrb[47].mxu1  ;;  %v1713_v55 = vmax.f32 %v1707_v49, 0.0 }
 0x83a   :  { %v1714_v50 = vmax.f32 %v1710_v21, 0.0 }
 0x83c   :  { %v4335_v56 = vpack.c.bf16 %v1714_v50, %v1713_v55 }
 0x83e   :  { %3259 = vmatmul.mubr.msk.bf16.vlgmr.msra.gmra.mrb[48].mxu1 %vm330_vm4, %v4335_v56  ;;  %v4340_v51 = vshrl.u32 %v4335_v56, 16  ;;  %v1805_v62 = vrot.slane %v4335_v56, 1  ;;  %v2345_v43 = vrot.slane %v4335_v56, 7 }
 0x83f   :  { %3275 = vmatpush3.bf16.msra.mxu1 %v3804_v9  ;;  %3282 = vmatprep.mubr.msk.bf16.mxu1 %vm3553_vm0, %v4610_v1  ;;  %v1895_v9 = vrot.slane %v4335_v56, 2 }
 0x840   :  { %3247 = vmatmul.mubr.msk.bf16.vlgmr.msra.gmra.mrb[40].mxu0 %vm330_vm4, %v4340_v51  ;;  %3276 = vmatprep.subr.bf16.mxu1 %v4610_v1  ;;  %v1850_v57 = vrot.slane %v4340_v51, 1  ;;  %v1940_v3 = vrot.slane %v4340_v51, 2  ;;  %v2390_v13 = vrot.slane %v4340_v51, 7 }
 0x841   :  { %3263 = vmatpush3.bf16.msra.mxu0 %v3811_v11  ;;  %3270 = vmatprep.mubr.msk.bf16.mxu0 %vm3553_vm0, %v4610_v1  ;;  %v2030_v11 = vrot.slane %v4340_v51, 3 }
 0x842   :  { %3264 = vmatprep.subr.bf16.mxu0 %v4610_v1 }
 0x843   :  { %3277 = vmatpush3.bf16.msra.mxu1 %v3822_v16  ;;  %v1985_v16 = vrot.slane %v4335_v56, 3 }
 0x844   :  { %3278 = vmatprep.subr.bf16.mxu1 %v4610_v1 }
 0x845   :  { %3265 = vmatpush3.bf16.msra.mxu0 %v3833_v17  ;;  %v4611_v17 = vld [vmem:[#allocation5_spill] sm:$0xff] }
 0x846   :  { %3266 = vmatprep.subr.bf16.mxu0 %v4610_v1 }
 0x847   :  { %3279 = vmatpush3.bf16.msra.mxu1 %v3842_v18  ;;  %v4612_v18 = vld [vmem:[#allocation6_spill] sm:$0xff] }
 0x848   :  { %3280 = vmatprep.subr.bf16.mxu1 %v4610_v1 }
 0x849   :  { %3267 = vmatpush3.bf16.msra.mxu0 %v3852_v20  ;;  %v2120_v20 = vrot.slane %v4340_v51, 4 }
 0x84a   :  { %3268 = vmatprep.subr.bf16.mxu0 %v4610_v1 }
 0x84b   :  { %3281 = vmatpush3.bf16.msra.mxu1 %v3860_v22  ;;  %v4613_v22 = vld [vmem:[#allocation7_spill] sm:$0xff] }
 0x84c   :  { %3298 = vmatprep.subr.bf16.mxu1 %v4610_v1 }
 0x84d   :  { %3269 = vmatpush3.bf16.msra.mxu0 %v3865_v23  ;;  %v2075_v23 = vrot.slane %v4335_v56, 4 }
 0x84e   :  { %3283 = vmatmul.mubr.msk.bf16.vlgmr.msra.gmra.mrb[52].mxu1 %vm330_vm4, %v1850_v57  ;;  %3286 = vmatprep.subr.bf16.mxu0 %v4610_v1 }
 0x84f   :  { %3299 = vmatpush3.bf16.msra.mxu1 %v3872_v24  ;;  %3306 = vmatprep.mubr.msk.bf16.mxu1 %vm3553_vm0, %v4610_v1  ;;  %v4614_v24 = vld [vmem:[#allocation8_spill] sm:$0xff] }
 0x850   :  { %3271 = vmatmul.mubr.msk.bf16.vlgmr.msra.gmra.mrb[44].mxu0 %vm330_vm4, %v1805_v62  ;;  %3300 = vmatprep.subr.bf16.mxu1 %v4610_v1 }
 0x851   :  { %3287 = vmatpush3.bf16.msra.mxu0 %v3880_v26  ;;  %3294 = vmatprep.mubr.msk.bf16.mxu0 %vm3553_vm0, %v4610_v1  ;;  %v4615_v26 = vld [vmem:[#allocation9_spill] sm:$0xff] }
 0x852   :  { %3288 = vmatprep.subr.bf16.mxu0 %v4610_v1 }
 0x853   :  { %3301 = vmatpush3.bf16.msra.mxu1 %v3889_v28  ;;  %v4616_v28 = vld [vmem:[#allocation10_spill] sm:$0xff] }
 0x854   :  { %3302 = vmatprep.subr.bf16.mxu1 %v4610_v1 }
 0x855   :  { %3289 = vmatpush3.bf16.msra.mxu0 %v3899_v31  ;;  %v4617_v31 = vld [vmem:[#allocation11_spill] sm:$0xff] }
 0x856   :  { %3290 = vmatprep.subr.bf16.mxu0 %v4610_v1 }
 0x857   :  { %3303 = vmatpush3.bf16.msra.mxu1 %v3908_v32  ;;  %v4618_v32 = vld [vmem:[#allocation12_spill] sm:$0xff] }
 0x858   :  { %3304 = vmatprep.subr.bf16.mxu1 %v4610_v1 }
 0x859   :  { %3291 = vmatpush3.bf16.msra.mxu0 %v3918_v35  ;;  %v4619_v35 = vld [vmem:[#allocation13_spill] sm:$0xff] }
 0x85a   :  { %3292 = vmatprep.subr.bf16.mxu0 %v4610_v1 }
 0x85b   :  { %3305 = vmatpush3.bf16.msra.mxu1 %v3926_v37  ;;  %v4620_v37 = vld [vmem:[#allocation14_spill] sm:$0xff] }
 0x85c   :  { %3322 = vmatprep.subr.bf16.mxu1 %v4610_v1 }
 0x85d   :  { %3293 = vmatpush3.bf16.msra.mxu0 %v3931_v38  ;;  %v2210_v38 = vrot.slane %v4340_v51, 5 }
 0x85e   :  { %3307 = vmatmul.mubr.msk.bf16.vlgmr.msra.gmra.mrb[56].mxu1 %vm330_vm4, %v1940_v3  ;;  %3310 = vmatprep.subr.bf16.mxu0 %v4610_v1 }
 0x85f   :  { %3323 = vmatpush3.bf16.msra.mxu1 %v3938_v39  ;;  %3330 = vmatprep.mubr.msk.bf16.mxu1 %vm3553_vm0, %v4610_v1  ;;  %v4621_v39 = vld [vmem:[#allocation15_spill] sm:$0xff] }
 0x860   :  { %3295 = vmatmul.mubr.msk.bf16.vlgmr.msra.gmra.mrb[48].mxu0 %vm330_vm4, %v1895_v9  ;;  %3324 = vmatprep.subr.bf16.mxu1 %v4610_v1 }
 0x861   :  { %3311 = vmatpush3.bf16.msra.mxu0 %v3946_v41  ;;  %3318 = vmatprep.mubr.msk.bf16.mxu0 %vm3553_vm0, %v4610_v1  ;;  %v2165_v41 = vrot.slane %v4335_v56, 5 }
 0x862   :  { %3312 = vmatprep.subr.bf16.mxu0 %v4610_v1 }
 0x863   :  { %3325 = vmatpush3.bf16.msra.mxu1 %v3955_v45  ;;  %v4622_v45 = vld [vmem:[#allocation16_spill] sm:$0xff] }
 0x864   :  { %3326 = vmatprep.subr.bf16.mxu1 %v4610_v1 }
 0x865   :  { %3313 = vmatpush3.bf16.msra.mxu0 %v3965_v46  ;;  %v4623_v46 = vld [vmem:[#allocation17_spill] sm:$0xff] }
 0x866   :  { %3314 = vmatprep.subr.bf16.mxu0 %v4610_v1 }
 0x867   :  { %3327 = vmatpush3.bf16.msra.mxu1 %v3974_v47  ;;  %v4624_v47 = vld [vmem:[#allocation18_spill] sm:$0xff] }
 0x868   :  { %3328 = vmatprep.subr.bf16.mxu1 %v4610_v1 }
 0x869   :  { %3315 = vmatpush3.bf16.msra.mxu0 %v3984_v54  ;;  %v4625_v54 = vld [vmem:[#allocation19_spill] sm:$0xff] }
 0x86a   :  { %3316 = vmatprep.subr.bf16.mxu0 %v4610_v1 }
 0x86b   :  { %3329 = vmatpush3.bf16.msra.mxu1 %v3992_v58  ;;  %v4626_v58 = vld [vmem:[#allocation20_spill] sm:$0xff] }
 0x86c   :  { %3346 = vmatprep.subr.bf16.mxu1 %v4610_v1 }
 0x86d   :  { %3317 = vmatpush3.bf16.msra.mxu0 %v3997_v63  ;;  %v4627_v63 = vld [vmem:[#allocation21_spill] sm:$0xff] }
 0x86e   :  { %3331 = vmatmul.mubr.msk.bf16.vlgmr.msra.gmra.mrb[60].mxu1 %vm330_vm4, %v2030_v11  ;;  %3334 = vmatprep.subr.bf16.mxu0 %v4610_v1 }
 0x86f   :  { %3347 = vmatpush3.bf16.msra.mxu1 %v4004_v0  ;;  %3354 = vmatprep.mubr.msk.bf16.mxu1 %vm3553_vm0, %v4610_v1  ;;  %v4628_v0 = vld [vmem:[#allocation22_spill] sm:$0xff] }
 0x870   :  { %3319 = vmatmul.mubr.msk.bf16.vlgmr.msra.gmra.mrb[52].mxu0 %vm330_vm4, %v1985_v16  ;;  %3348 = vmatprep.subr.bf16.mxu1 %v4610_v1 }
 0x871   :  { %3335 = vmatpush3.bf16.msra.mxu0 %v4012_v4  ;;  %3342 = vmatprep.mubr.msk.bf16.mxu0 %vm3553_vm0, %v4610_v1  ;;  %v2300_v4 = vrot.slane %v4340_v51, 6 }
 0x872   :  { %3336 = vmatprep.subr.bf16.mxu0 %v4610_v1 }
 0x873   :  { %3349 = vmatpush3.bf16.msra.mxu1 %v4021_v6  ;;  %v4629_v6 = vld [vmem:[#allocation23_spill] sm:$0xff] }
 0x874   :  { %3350 = vmatprep.subr.bf16.mxu1 %v4610_v1 }
 0x875   :  { %3337 = vmatpush3.bf16.msra.mxu0 %v4031_v7  ;;  %v2255_v7 = vrot.slane %v4335_v56, 6 }
 0x876   :  { %3338 = vmatprep.subr.bf16.mxu0 %v4610_v1 }
 0x877   :  { %3351 = vmatpush3.bf16.msra.mxu1 %v4040_v8  ;;  %v4630_v8 = vld [vmem:[#allocation24_spill] sm:$0xff] }
 0x878   :  { %3352 = vmatprep.subr.bf16.mxu1 %v4610_v1 }
 0x879   :  { %3339 = vmatpush3.bf16.msra.mxu0 %v4611_v17 }
 0x87a   :  { %3340 = vmatprep.subr.bf16.mxu0 %v4610_v1 }
 0x87b   :  { %3353 = vmatpush3.bf16.msra.mxu1 %v4612_v18 }
 0x87c   :  { %3370 = vmatprep.subr.bf16.mxu1 %v4610_v1 }
 0x87d   :  { %3341 = vmatpush3.bf16.msra.mxu0 %v4613_v22 }
 0x87e   :  { %3355 = vmatmul.mubr.msk.bf16.vlgmr.msra.gmra.mrb[64].mxu1 %vm330_vm4, %v2120_v20  ;;  %3358 = vmatprep.subr.bf16.mxu0 %v4610_v1 }
 0x87f   :  { %3371 = vmatpush3.bf16.msra.mxu1 %v4614_v24  ;;  %3378 = vmatprep.mubr.msk.bf16.mxu1 %vm3553_vm0, %v4610_v1 }
 0x880   :  { %3343 = vmatmul.mubr.msk.bf16.vlgmr.msra.gmra.mrb[56].mxu0 %vm330_vm4, %v2075_v23  ;;  %3372 = vmatprep.subr.bf16.mxu1 %v4610_v1 }
 0x881   :  { %3359 = vmatpush3.bf16.msra.mxu0 %v4615_v26  ;;  %3366 = vmatprep.mubr.msk.bf16.mxu0 %vm3553_vm0, %v4610_v1 }
 0x882   :  { %3360 = vmatprep.subr.bf16.mxu0 %v4610_v1 }
 0x883   :  { %3373 = vmatpush3.bf16.msra.mxu1 %v4616_v28 }
 0x884   :  { %3374 = vmatprep.subr.bf16.mxu1 %v4610_v1 }
 0x885   :  { %3361 = vmatpush3.bf16.msra.mxu0 %v4617_v31 }
 0x886   :  { %3362 = vmatprep.subr.bf16.mxu0 %v4610_v1 }
 0x887   :  { %3375 = vmatpush3.bf16.msra.mxu1 %v4618_v32 }
 0x888   :  { %3376 = vmatprep.subr.bf16.mxu1 %v4610_v1 }
 0x889   :  { %3363 = vmatpush3.bf16.msra.mxu0 %v4619_v35 }
 0x88a   :  { %3364 = vmatprep.subr.bf16.mxu0 %v4610_v1 }
 0x88b   :  { %3377 = vmatpush3.bf16.msra.mxu1 %v4620_v37 }
 0x88c   :  { %3394 = vmatprep.subr.bf16.mxu1 %v4610_v1 }
 0x88d   :  { %3365 = vmatpush3.bf16.msra.mxu0 %v4621_v39 }
 0x88e   :  { %3379 = vmatmul.mubr.msk.bf16.vlgmr.msra.gmra.mrb[68].mxu1 %vm330_vm4, %v2210_v38  ;;  %3382 = vmatprep.subr.bf16.mxu0 %v4610_v1 }
 0x88f   :  { %3395 = vmatpush3.bf16.msra.mxu1 %v4622_v45  ;;  %3402 = vmatprep.mubr.msk.bf16.mxu1 %vm3553_vm0, %v4610_v1 }
 0x890   :  { %3367 = vmatmul.mubr.msk.bf16.vlgmr.msra.gmra.mrb[60].mxu0 %vm330_vm4, %v2165_v41  ;;  %3396 = vmatprep.subr.bf16.mxu1 %v4610_v1 }
 0x891   :  { %3383 = vmatpush3.bf16.msra.mxu0 %v4623_v46  ;;  %3390 = vmatprep.mubr.msk.bf16.mxu0 %vm3553_vm0, %v4610_v1 }
 0x892   :  { %3384 = vmatprep.subr.bf16.mxu0 %v4610_v1 }
 0x893   :  { %3397 = vmatpush3.bf16.msra.mxu1 %v4624_v47 }
 0x894   :  { %3398 = vmatprep.subr.bf16.mxu1 %v4610_v1 }
 0x895   :  { %3385 = vmatpush3.bf16.msra.mxu0 %v4625_v54 }
 0x896   :  { %3386 = vmatprep.subr.bf16.mxu0 %v4610_v1 }
 0x897   :  { %3399 = vmatpush3.bf16.msra.mxu1 %v4626_v58 }
 0x898   :  { %3400 = vmatprep.subr.bf16.mxu1 %v4610_v1 }
 0x899   :  { %3387 = vmatpush3.bf16.msra.mxu0 %v4627_v63 }
 0x89a   :  { %3388 = vmatprep.subr.bf16.mxu0 %v4610_v1 }
 0x89b   :  { %3401 = vmatpush3.bf16.msra.mxu1 %v4628_v0 }
 0x89c   :  { %3418 = vmatprep.subr.bf16.mxu1 %v4610_v1 }
 0x89d   :  { %3389 = vmatpush3.bf16.msra.mxu0 %v4629_v6 }
 0x89e   :  { %3403 = vmatmul.mubr.msk.bf16.vlgmr.msra.gmra.mrb[72].mxu1 %vm330_vm4, %v2300_v4  ;;  %3406 = vmatprep.subr.bf16.mxu0 %v4610_v1 }
 0x89f   :  { %3419 = vmatpush3.bf16.msra.mxu1 %v4630_v8  ;;  %3426 = vmatprep.mubr.msk.bf16.mxu1 %vm3553_vm0, %v4610_v1 }
 0x8a0   :  { %3391 = vmatmul.mubr.msk.bf16.vlgmr.msra.gmra.mrb[64].mxu0 %vm330_vm4, %v2255_v7  ;;  %3420 = vmatprep.subr.bf16.mxu1 %v4610_v1 }
 0x8a1   :  { %3407 = vmatpush3.bf16.msra.mxu0 %v4631_v33  ;;  %3414 = vmatprep.mubr.msk.bf16.mxu0 %vm3553_vm0, %v4610_v1 }
 0x8a2   :  { %3408 = vmatprep.subr.bf16.mxu0 %v4610_v1 }
 0x8a3   :  { %3421 = vmatpush3.bf16.msra.mxu1 %v4632_v27 }
 0x8a4   :  { %3422 = vmatprep.subr.bf16.mxu1 %v4610_v1 }
 0x8a5   :  { %3409 = vmatpush3.bf16.msra.mxu0 %v4633_v40 }
 0x8a6   :  { %3410 = vmatprep.subr.bf16.mxu0 %v4610_v1 }
 0x8a7   :  { %3423 = vmatpush3.bf16.msra.mxu1 %v4634_v44 }
 0x8a8   :  { %3424 = vmatprep.subr.bf16.mxu1 %v4610_v1 }
 0x8a9   :  { %3411 = vmatpush3.bf16.msra.mxu0 %v4635_v59 }
 0x8aa   :  { %3412 = vmatprep.subr.bf16.mxu0 %v4610_v1 }
 0x8ab   :  { %3425 = vmatpush3.bf16.msra.mxu1 %v4636_v12 }
 0x8ad   :  { %3413 = vmatpush3.bf16.msra.mxu0 %v4637_v15 }
 0x8ae   :  { %3427 = vmatmul.mubr.msk.bf16.vlgmr.msra.gmra.mrb[76].mxu1 %vm330_vm4, %v2390_v13  ;;  %3430 = vmatprep.subr.bf16.mxu0 %v4610_v1 }
 0x8b0   :  { %3415 = vmatmul.mubr.msk.bf16.vlgmr.msra.gmra.mrb[68].mxu0 %vm330_vm4, %v2345_v43 }
 0x8b1   :  { %3434 = vmatprep.mubr.msk.bf16.mxu0 %vm3553_vm0, %v4610_v1  ;;  %3431 = vmatpush3.bf16.msra.mxu0 %v3519_v52 }
 0x8b2   :  { %3432 = vmatprep.subr.bf16.mxu0 %v4610_v1 }
 0x8b5   :  { %3433 = vmatpush3.bf16.msra.mxu0 %v3520_v36 }
 0x911   :  { %v1798_v10 = vpop.f32.mrb[48].mxu1 }
 0x912   :  { %v3260_v14 = vpop.f32.mrb[49].mxu1 }
 0x913   :  { %v1756_v5 = vpop.f32.mrb[40].mxu0  ;;  %v1801_v2 = vpop.f32.mrb[50].mxu1 }
 0x914   :  { %v1799_v61 = vadd.f32 %v1798_v10, %v1756_v5  ;;  %v3248_v60 = vpop.f32.mrb[41].mxu0  ;;  %v3261_v29 = vpop.f32.mrb[51].mxu1 }
 0x915   :  { %v1759_v30 = vpop.f32.mrb[42].mxu0 }
 0x916   :  { %v3249_v34 = vpop.f32.mrb[43].mxu0 }
 0x921   :  { %v1888_v48 = vpop.f32.mrb[52].mxu1 }
 0x922   :  { %v3284_v49 = vpop.f32.mrb[53].mxu1 }
 0x923   :  { %v1843_v25 = vpop.f32.mrb[44].mxu0  ;;  %v1891_v53 = vpop.f32.mrb[54].mxu1 }
 0x924   :  { %v1849_v21 = vadd.f32 %v1843_v25, %v1799_v61  ;;  %v3272_v1 = vpop.f32.mrb[45].mxu0  ;;  %v3285_v42 = vpop.f32.mrb[55].mxu1 }
 0x925   :  { %v1846_v55 = vpop.f32.mrb[46].mxu0 }
 0x926   :  { %v3273_v50 = vpop.f32.mrb[47].mxu0  ;;  %v1894_v56 = vadd.f32 %v1888_v48, %v1849_v21  ;;  %v1526_v21 = vld [vmem:[%s4550_s8] sm:$0x1]  ;;  %s3556_s8 = smov [#allocation2]  }
 0x927   :  { %v1527_v50 = vadd.f32 %v1526_v21, %v4297_v19 }
 0x931   :  { %v1978_v51 = vpop.f32.mrb[56].mxu1 }
 0x932   :  { %v3308_v57 = vpop.f32.mrb[57].mxu1 }
 0x933   :  { %v1933_v62 = vpop.f32.mrb[48].mxu0  ;;  %v1981_v3 = vpop.f32.mrb[58].mxu1  ;;  %v1528_v57 = vmax.f32 %v1527_v50, 0.0 }
 0x934   :  { %v1939_v9 = vadd.f32 %v1933_v62, %v1894_v56  ;;  %v3296_v11 = vpop.f32.mrb[49].mxu0  ;;  %v3309_v16 = vpop.f32.mrb[59].mxu1 }
 0x935   :  { %v1936_v17 = vpop.f32.mrb[50].mxu0  ;;  %v2753_v11 = vld [vmem:[%s4552_s10] ss:$0 sm:$0xff]  ;;  %s2529_s10 = sshll.u32 %s3556_s8, 4  ;;  %s2530_s10 = int_to_ptr.vmem [resolvable:$true] %s2529_s10 }
 0x936   :  { %v3297_v18 = vpop.f32.mrb[51].mxu0  ;;  %v1984_v20 = vadd.f32 %v1978_v51, %v1939_v9  ;;  %s3525_s0 = scalar_lea.vmem %s2530_s10, 32  ;;  %p3530_p1 = scmp.lt.s32.totalorder %s2530_s10, %s2530_s10 }
 0x937   :  { %p3526_p0 = scmp.ne.s32.totalorder %s2530_s10, %s3525_s0  ;;  %p3531_p2 = scmp.lt.s32.totalorder %s3525_s0, %s3525_s0 }
 0x939   :  { %p3532_p3 = por %p3531_p2, %p3530_p1 }
 0x93b   :  { %p3533_p4 = pnand %p3532_p3, %p3526_p0 }
 0x941   :  { %v2068_v22 = vpop.f32.mrb[60].mxu1 }
 0x942   :  { %v3332_v23 = vpop.f32.mrb[61].mxu1 }
 0x943   :  { %v2023_v24 = vpop.f32.mrb[52].mxu0  ;;  %v2071_v26 = vpop.f32.mrb[62].mxu1 }
 0x944   :  { %v2029_v28 = vadd.f32 %v2023_v24, %v1984_v20  ;;  %v3320_v31 = vpop.f32.mrb[53].mxu0  ;;  %v3333_v32 = vpop.f32.mrb[63].mxu1 }
 0x945   :  { %v2026_v35 = vpop.f32.mrb[54].mxu0 }
 0x946   :  { %v3321_v37 = vpop.f32.mrb[55].mxu0  ;;  %v2074_v38 = vadd.f32 %v2068_v22, %v2029_v28 }
 0x951   :  { %v2158_v39 = vpop.f32.mrb[64].mxu1 }
 0x952   :  { %v3356_v41 = vpop.f32.mrb[65].mxu1 }
 0x953   :  { %v2113_v45 = vpop.f32.mrb[56].mxu0  ;;  %v2161_v46 = vpop.f32.mrb[66].mxu1 }
 0x954   :  { %v2119_v47 = vadd.f32 %v2113_v45, %v2074_v38  ;;  %v3344_v54 = vpop.f32.mrb[57].mxu0  ;;  %v3357_v58 = vpop.f32.mrb[67].mxu1 }
 0x955   :  { %v2116_v63 = vpop.f32.mrb[58].mxu0 }
 0x956   :  { %v3345_v0 = vpop.f32.mrb[59].mxu0  ;;  %v2164_v4 = vadd.f32 %v2158_v39, %v2119_v47 }
 0x961   :  { %v2248_v6 = vpop.f32.mrb[68].mxu1 }
 0x962   :  { %v3380_v7 = vpop.f32.mrb[69].mxu1 }
 0x963   :  { %v2203_v8 = vpop.f32.mrb[60].mxu0  ;;  %v2251_v33 = vpop.f32.mrb[70].mxu1 }
 0x964   :  { %v2209_v27 = vadd.f32 %v2203_v8, %v2164_v4  ;;  %v3368_v40 = vpop.f32.mrb[61].mxu0  ;;  %v3381_v44 = vpop.f32.mrb[71].mxu1 }
 0x965   :  { %v2206_v59 = vpop.f32.mrb[62].mxu0 }
 0x966   :  { %v3369_v12 = vpop.f32.mrb[63].mxu0  ;;  %v2254_v13 = vadd.f32 %v2248_v6, %v2209_v27 }
 0x971   :  { %v2338_v15 = vpop.f32.mrb[72].mxu1 }
 0x972   :  { %v3404_v43 = vpop.f32.mrb[73].mxu1 }
 0x973   :  { %v2293_v52 = vpop.f32.mrb[64].mxu0  ;;  %v2341_v36 = vpop.f32.mrb[74].mxu1 }
 0x974   :  { %v2299_v10 = vadd.f32 %v2293_v52, %v2254_v13  ;;  %v3392_v14 = vpop.f32.mrb[65].mxu0  ;;  %v3405_v5 = vpop.f32.mrb[75].mxu1 }
 0x975   :  { %v2296_v2 = vpop.f32.mrb[66].mxu0 }
 0x976   :  { %v3393_v61 = vpop.f32.mrb[67].mxu0  ;;  %v2344_v60 = vadd.f32 %v2338_v15, %v2299_v10 }
 0x981   :  { %v2428_v29 = vpop.f32.mrb[76].mxu1 }
 0x982   :  { %v3428_v30 = vpop.f32.mrb[77].mxu1 }
 0x983   :  { %v2383_v34 = vpop.f32.mrb[68].mxu0  ;;  %v2431_v48 = vpop.f32.mrb[78].mxu1 }
 0x984   :  { %v2389_v49 = vadd.f32 %v2383_v34, %v2344_v60  ;;  %v3416_v25 = vpop.f32.mrb[69].mxu0  ;;  %v3429_v53 = vpop.f32.mrb[79].mxu1 }
 0x985   :  { %v2386_v1 = vpop.f32.mrb[70].mxu0 }
 0x986   :  { %v2434_v42 = vadd.f32 %v2428_v29, %v2389_v49  ;;  %v3417_v55 = vpop.f32.mrb[71].mxu0 }
 0x988   :  { %v2435_v56 = vadd.f32 %v2434_v42, %v1526_v21 }
 0x98a   :  { %v2436_v51 = vmax.f32 %v2435_v56, 0.0 }
 0x98c   :  { %v2438_v62 = vrot.slane %v2436_v51, 7 }
 0x98e   :  { %v2441_v3 = vsel %vm2440_vm5, %v1528_v57, %v2438_v62 }
 0x98f   :  { %v2442_v9 = vpack.c.bf16 %v2441_v3, %v2441_v3 }
 0x991   :  { %3435 = vmatmul.mubr.msk.bf16.vlgmr.msra.gmra.mrb[72].mxu0 %vm2466_vm6, %v2442_v9 }
 0xa64   :  { %v2504_v16 = vpop.f32.mrb[72].mxu0 }
 0xa65   :  { %v2505_v17 = vadd.f32 %v2753_v11, %v2504_v16  ;;  %v3436_v18 = vpop.f32.mrb[73].mxu0 }
 0xa66   :  { %v2507_v20 = vpop.f32.mrb[74].mxu0 }
 0xa67   :  { %v3437_v22 = vpop.f32.mrb[75].mxu0  ;;  %v2511_v19 = vsel %vm2510_vm7, %v2505_v17, -inf }
 0xa68   :  { %2512 = vmax.xlane.f32.xlu1 %v2511_v19 }
 0xaf5   :  { %v2513_v23 = vpop.xlane.xlu1 %2512 }
 0xaf6   :  { %v2514_v24 = vsub.f32 %v2505_v17, %v2513_v23 }
 0xaf8   :  { %v2515_v26 = vmul.f32 1.442695, %v2514_v24 }
 0xafa   :  { %3521 = vpow2.f32 %v2515_v26 }
 0xb04   :  { %v3522_v28 = vpop.eup %3521 }
 0xb05   :  { %v2517_v31 = vsel %vm2510_vm7, %v3522_v28, 0.0 }
 0xb06   :  { %2518 = vadd.xlane.f32.xlu0 %v2517_v31 }
 0xb93   :  { %v2519_v32 = vpop.xlane.xlu0 %2518 }
 0xb94   :  { %3523 = vrcp.f32 %v2519_v32 }
 0xb9e   :  { %v3524_v35 = vpop.eup %3523 }
 0xb9f   :  { %v2521_v37 = vmul.f32 %v3524_v35, %v3522_v28 }
 0xba1   :  { %2522 = vst.msk [vmem:[#allocation2] sm:$0x3] %vm2510_vm7, %v2521_v37 }
 0xba2   :  { %3536 = shalt.err (!%p3533_p4)
}
 0xba3   :  { %s3537_s19 = scalar_lea.hbm %s4553_s11, 32 }
 0xba4   :  { %p3538_p5 = scmp.ne.s32.totalorder %s4553_s11, %s3537_s19  ;;  %p3541_p6 = scmp.lt.u32.totalorder %s3537_s19, %s4553_s11 }
 0xba6   :  { %p3543_p7 = pnand %p3541_p6, %p3538_p5 }
 0xba8   :  { %3546 = shalt.err (!%p3543_p7)
}
 0xba9   :  { %2532 = dma.vmem_to_hbm [thread:$0]  %s2530_s10, 32, %s4553_s11, [#allocation3]  }
 0xbaa   :  { %3547 = dma.done.wait [#allocation3], 32  }
 0xbab   :  { %3548 = vsyncadd [#allocation3], 4294967264 }
 0xbac   :  { %2536 = vsyncpa [#allocation3], 1 }

</bundles_post_ra>
